<compile_context>
chip_gen: v6e
topology: v6e:2x2x1
jax: 0.10.0
libtpu: 0.0.40
codegen_flags: <defaults>
</compile_context>

<pallas_src>
import jax
import jax.numpy as jnp
import numpy as np
from jax import lax
from jax.experimental import pallas as pl
from jax.experimental.pallas import tpu as pltpu

HI = jax.lax.Precision.HIGHEST  # host/ref matmuls in true f32 (match the in-kernel MXU)


# ----------------------------------------------------------------------------
# Pallas kernel: whole RK4 (torchdiffeq 3/8-rule) CDE integration, one invocation.
# ----------------------------------------------------------------------------
def _cde_rk4_kernel(z0_ref, const_ref, bias1_ref, dxs_ref,
                    w1_ref, w2_ref, b2_ref, w3_ref, b3_ref, out_ref):
    T = dxs_ref.shape[0]
    L_dim = z0_ref.shape[1]
    LC = dxs_ref.shape[-1]
    C = LC // L_dim

    # Loop-invariant operands hoisted once.
    const_h = const_ref[...]          # (Bp, H): z0[:, L_dim:] @ W1[L_dim:z_dim]
    w1 = w1_ref[...]                  # (L_dim, H)  active-state rows of W1
    w2 = w2_ref[...]                  # (H, H)
    b2 = b2_ref[...]                  # (1, H)
    w3 = w3_ref[...]                  # (H, LC)     c-major permuted columns
    b3 = b3_ref[...]                  # (1, LC)     c-major permuted

    def vfield(zv, bias_s, dxs_s):
        # bias_s already holds b1 + t_stage * W1[time_row]; dxs_s is dt * dX/ds
        # pre-tiled to LC lanes (c-major), so the return value is dt * f(t, z)·dX.
        # Layer 1: K = L_dim is tiny -> rank-1 VPU expansion, keep the MXU free.
        acc = bias_s + const_h                                    # (Bp, H)
        for k_ in range(L_dim):
            acc = acc + zv[:, k_:k_ + 1] * w1[k_:k_ + 1, :]
        h1 = jnp.tanh(acc)
        h2 = jnp.tanh(jnp.dot(h1, w2, preferred_element_type=jnp.float32) + b2)
        o = jnp.dot(h2, w3, preferred_element_type=jnp.float32) + b3   # (Bp, LC)
        # Contraction with dX: elementwise mul then a (C-1)-term strided lane-sum
        # (VPU/XLU) instead of a third MXU matmul against a group-sum matrix.
        prod = o * dxs_s
        res = prod[:, 0:L_dim]
        for c_ in range(1, C):
            res = res + prod[:, c_ * L_dim:(c_ + 1) * L_dim]
        return res                                                # (Bp, L_dim)

    third = jnp.float32(1.0 / 3.0)
    z = z0_ref[...]                                               # (Bp, L_dim)
    traj = [z]
    for t in range(1, T):                                         # static loop (small T)
        k1 = vfield(z, bias1_ref[t, 0], dxs_ref[t, 0])
        k2 = vfield(z + k1 * third, bias1_ref[t, 1], dxs_ref[t, 1])
        k3 = vfield(z + (k2 - k1 * third), bias1_ref[t, 2], dxs_ref[t, 2])
        k4 = vfield(z + (k1 - k2 + k3), bias1_ref[t, 3], dxs_ref[t, 3])
        z = z + (k1 + 3.0 * (k2 + k3) + k4) * jnp.float32(0.125)
        traj.append(z)
    # Single lane-dense writeback of the whole trajectory.
    out_ref[...] = jnp.concatenate(traj, axis=-1)                 # (Bp, T*L_dim)


# ----------------------------------------------------------------------------
# Glue shared by the Pallas path and the pure-JAX reference: control-path spline
# (torchcde hermite-cubic-with-backward-differences) and RK4 stage quantities.
# ----------------------------------------------------------------------------
def _prepare(x, y):
    B, T, x_dim = x.shape
    y_dim = y.shape[-1]

    # use_mean=True branch: mean of y over the batch, concatenated with x.
    y_mean = jnp.mean(y, axis=0, keepdims=True)
    data = jnp.concatenate(
        [x, jnp.broadcast_to(y_mean, (B, T, y_dim))], axis=-1).astype(jnp.float32)

    # hermite_cubic_coefficients_with_backward_differences (knots at 0..T-1).
    tsp = jnp.arange(T, dtype=jnp.float32)
    tdiff = (tsp[1:] - tsp[:-1])[None, :, None]
    derivs = (data[:, 1:] - data[:, :-1]) / tdiff
    d_prev = jnp.concatenate([derivs[:, :1], derivs[:, :-1]], axis=1)
    d_next = derivs
    xdiff = data[:, 1:] - data[:, :-1]
    b_c = d_prev
    two_c = 2.0 * (3.0 * (xdiff / tdiff - b_c) - d_next + d_prev) / tdiff
    three_d = (d_next - b_c) / (tdiff * tdiff) - two_c / tdiff

    # RK4 (3/8 rule) stage times between consecutive evaluation times.
    times = x[0, :, 0].astype(jnp.float32)
    t0, t1 = times[:-1], times[1:]
    dts = t1 - t0
    stage_t = jnp.stack([t0, t0 + dts / 3.0, t0 + 2.0 * dts / 3.0, t1], axis=1)
    stage_t = jnp.concatenate([jnp.zeros((1, 4), jnp.float32), stage_t], axis=0)  # (T,4)
    dt_arr = jnp.concatenate([jnp.zeros((1,), jnp.float32), dts], axis=0)          # (T,)

    # Spline derivative X'(s) at every stage time (torchcde CubicSpline.derivative).
    q = stage_t.reshape(-1)
    idx = jnp.clip(jnp.searchsorted(tsp, q, side="left") - 1, 0, T - 2)
    frac = (q - tsp[idx])[None, :, None]
    dX = b_c[:, idx] + (two_c[:, idx] + three_d[:, idx] * frac) * frac   # (B, 4T, C)
    dX = dX.reshape(B, T, 4, x_dim + y_dim).transpose(1, 2, 0, 3)        # (T, 4, B, C)

    return stage_t, dt_arr, dX


# ----------------------------------------------------------------------------
# Pallas forward.
# ----------------------------------------------------------------------------
def cde_decoder_forward_pallas(params, x, z, y, *, L_dim):
    B, T, x_dim = x.shape
    y_dim = y.shape[-1]
    z_dim = z.shape[-1]
    C = x_dim + y_dim
    H = params["W2"].shape[0]
    LC = L_dim * C

    stage_t, dt_arr, dX = _prepare(x, y)

    W1, b1 = params["W1"], params["b1"]
    W1a = W1[:L_dim]                                   # (L_dim, H) active rows
    W1r = W1[L_dim:z_dim]                              # frozen-latent rows
    w1t = W1[z_dim]                                    # (H,) time row

    # Per-stage folded bias: b1 + t_stage * W1[time_row]  -> (T, 4, 1, H).
    bias1 = (b1[None, None, :]
             + stage_t[:, :, None] * w1t[None, None, :]).astype(jnp.float32)
    bias1 = bias1[:, :, None, :]

    # Frozen z-columns (never updated by the CDE) contribute a constant (B, H).
    z32 = z.astype(jnp.float32)
    const_bh = jnp.dot(z32[:, L_dim:], W1r, precision=HI)

    # c-major permutation of W3/b3 so lanes are grouped by dX channel:
    #   column (c*L_dim + l) of W3p  ==  column (l*C + c) of W3.
    W3p = params["W3"].reshape(H, L_dim, C).transpose(0, 2, 1).reshape(H, LC)
    b3p = params["b3"].reshape(L_dim, C).T.reshape(LC)

    # Pre-tile dX to LC lanes (c-major) and fold dt (vector field linear in dX):
    #   dXs[t, s, b, c*L_dim + l] = dt[t] * dX[t, s, b, c].
    dXs = jnp.repeat(dX, L_dim, axis=-1) * dt_arr[:, None, None, None]   # (T,4,B,LC)

    # Pad batch to a multiple of 8 sublanes (f32 vreg granularity).
    Bp = max(8, ((B + 7) // 8) * 8)
    padB = Bp - B
    z0a = jnp.pad(z32[:, :L_dim], ((0, padB), (0, 0)))
    const_bh = jnp.pad(const_bh, ((0, padB), (0, 0)))
    dXs = jnp.pad(dXs, ((0, 0), (0, 0), (0, padB), (0, 0)))

    # TODO(synk): for large T / large batch, add a "parallel" batch grid axis
    # (v7x second TensorCore), T-chunked pipelining with a VMEM state scratch, and
    # vmem_limit_bytes budgeting; at these shapes everything fits trivially.
    vmem = pltpu.MemorySpace.VMEM
    out = pl.pallas_call(
        _cde_rk4_kernel,
        out_shape=jax.ShapeDtypeStruct((Bp, T * L_dim), jnp.float32),
        in_specs=[pl.BlockSpec(memory_space=vmem)] * 9,
        out_specs=pl.BlockSpec(memory_space=vmem),
    )(z0a, const_bh, bias1, dXs,
      W1a, params["W2"], params["b2"].reshape(1, H), W3p, b3p.reshape(1, LC))

    return out[:B].reshape(B, T, L_dim)                # (B, T, L_dim) = zT[:, :, :L_dim]


# ----------------------------------------------------------------------------
# Pure-JAX reference (mirrors the PyTorch math literally) for validation.
# All matmuls at HIGHEST precision so both paths are true-f32.
# ----------------------------------------------------------------------------
def cde_decoder_forward_ref(params, x, z, y, *, L_dim):
    B, T, x_dim = x.shape
    z_dim = z.shape[-1]
    C = x_dim + y.shape[-1]
    stage_t, dt_arr, dX = _prepare(x, y)

    def field(t, zz, dx):
        vt = jnp.concatenate([zz, jnp.full((B, 1), t, jnp.float32)], axis=1)
        h = jnp.tanh(jnp.dot(vt, params["W1"], precision=HI) + params["b1"])
        h = jnp.tanh(jnp.dot(h, params["W2"], precision=HI) + params["b2"])
        o = jnp.dot(h, params["W3"], precision=HI) + params["b3"]
        dL = o.reshape(B, L_dim, C)
        mat = jnp.concatenate([dL, jnp.zeros((B, z_dim - L_dim, C), jnp.float32)], axis=1)
        return jnp.einsum("bzc,bc->bz", mat, dx, precision=HI)

    zz = z.astype(jnp.float32)
    traj = [zz]
    for i in range(1, T):
        dt = dt_arr[i]
        st, dx = stage_t[i], dX[i]
        k1 = field(st[0], zz, dx[0])
        k2 = field(st[1], zz + dt * k1 / 3.0, dx[1])
        k3 = field(st[2], zz + dt * (k2 - k1 / 3.0), dx[2])
        k4 = field(st[3], zz + dt * (k1 - k2 + k3), dx[3])
        zz = zz + (k1 + 3.0 * (k2 + k3) + k4) * dt * 0.125
        traj.append(zz)
    return jnp.stack(traj, axis=1)[:, :, :L_dim]


# ----------------------------------------------------------------------------
# Deterministic parameter init (only latent_cdefunc_like_previous is used by
# forward; latent_cdefunc_new / decode_layers feed the abstract decode_latent
# and are omitted).
# ----------------------------------------------------------------------------
def init_params(key, z_dim, h_dim, L_dim, C):
    inp_dim = z_dim + 1          # z_dim + x_dim (time channel appended, exclude_time=False)
    ks = jax.random.split(key, 6)
    s = 0.2
    return dict(
        W1=jax.random.normal(ks[0], (inp_dim, h_dim), jnp.float32) * s,
        b1=jax.random.normal(ks[1], (h_dim,), jnp.float32) * s,
        W2=jax.random.normal(ks[2], (h_dim, h_dim), jnp.float32) * s,
        b2=jax.random.normal(ks[3], (h_dim,), jnp.float32) * s,
        W3=jax.random.normal(ks[4], (h_dim, L_dim * C), jnp.float32) * s,
        b3=jax.random.normal(ks[5], (L_dim * C,), jnp.float32) * s,
    )


if __name__ == "__main__":
    key = jax.random.PRNGKey(0)
    B, T = 2, 8
    x_dim, y_dim, z_dim, L_dim, h_dim = 1, 3, 6, 4, 32
    C = x_dim + y_dim

    _, ky, kz, kp = jax.random.split(key, 4)
    # x carries uniformly-spaced observation times (torchcde's rk4 fixed grid then
    # coincides with the evaluation times — see fidelity note in the header).
    times = jnp.arange(T, dtype=jnp.float32)
    x = jnp.broadcast_to(times[None, :, None], (B, T, x_dim)).astype(jnp.float32)
    y = jax.random.normal(ky, (B, T, y_dim), jnp.float32)
    z = jax.random.normal(kz, (B, z_dim), jnp.float32)
    params = init_params(kp, z_dim, h_dim, L_dim, C)

    out = cde_decoder_forward_pallas(params, x, z, y, L_dim=L_dim)
    out = jax.block_until_ready(out)

    ref = cde_decoder_forward_ref(params, x, z, y, L_dim=L_dim)
    # All-f32 path on both sides; differences are pure op-reordering (~1e-6).
    np.testing.assert_allclose(np.asarray(out), np.asarray(ref), rtol=1e-4, atol=1e-4)
    assert out.shape == (B, T, L_dim)
    print("KERNEL_OK")
</pallas_src>

<mosaic_0001>
module attributes {stable_mosaic.version = 11 : i64} {
  func.func @_cde_rk4_kernel(%arg0: memref<8x4xf32, #tpu.memory_space<vmem>>, %arg1: memref<8x32xf32, #tpu.memory_space<vmem>>, %arg2: memref<8x4x1x32xf32, #tpu.memory_space<vmem>>, %arg3: memref<8x4x8x16xf32, #tpu.memory_space<vmem>>, %arg4: memref<4x32xf32, #tpu.memory_space<vmem>>, %arg5: memref<32x32xf32, #tpu.memory_space<vmem>>, %arg6: memref<1x32xf32, #tpu.memory_space<vmem>>, %arg7: memref<32x16xf32, #tpu.memory_space<vmem>>, %arg8: memref<1x16xf32, #tpu.memory_space<vmem>>, %arg9: memref<8x32xf32, #tpu.memory_space<vmem>>) attributes {dimension_semantics = [], scalar_prefetch = 0 : i64, scratch_operands = 0 : i64, tpu.core_type = #tpu.core_type<tc>} {
    %c0 = arith.constant 0 : index
    %c0_0 = arith.constant 0 : index
    %0 = vector.load %arg1[%c0, %c0_0] : memref<8x32xf32, #tpu.memory_space<vmem>>, vector<8x32xf32>
    %c0_1 = arith.constant 0 : index
    %c0_2 = arith.constant 0 : index
    %1 = vector.load %arg4[%c0_1, %c0_2] : memref<4x32xf32, #tpu.memory_space<vmem>>, vector<4x32xf32>
    %c0_3 = arith.constant 0 : index
    %c0_4 = arith.constant 0 : index
    %2 = vector.load %arg5[%c0_3, %c0_4] : memref<32x32xf32, #tpu.memory_space<vmem>>, vector<32x32xf32>
    %c0_5 = arith.constant 0 : index
    %c0_6 = arith.constant 0 : index
    %3 = vector.load %arg6[%c0_5, %c0_6] : memref<1x32xf32, #tpu.memory_space<vmem>>, vector<1x32xf32>
    %c0_7 = arith.constant 0 : index
    %c0_8 = arith.constant 0 : index
    %4 = vector.load %arg7[%c0_7, %c0_8] : memref<32x16xf32, #tpu.memory_space<vmem>>, vector<32x16xf32>
    %c0_9 = arith.constant 0 : index
    %c0_10 = arith.constant 0 : index
    %5 = vector.load %arg8[%c0_9, %c0_10] : memref<1x16xf32, #tpu.memory_space<vmem>>, vector<1x16xf32>
    %c0_11 = arith.constant 0 : index
    %c0_12 = arith.constant 0 : index
    %6 = vector.load %arg0[%c0_11, %c0_12] : memref<8x4xf32, #tpu.memory_space<vmem>>, vector<8x4xf32>
    %c1 = arith.constant 1 : index
    %c0_13 = arith.constant 0 : index
    %c0_14 = arith.constant 0 : index
    %c0_15 = arith.constant 0 : index
    %7 = vector.load %arg2[%c1, %c0_13, %c0_14, %c0_15] : memref<8x4x1x32xf32, #tpu.memory_space<vmem>>, vector<1x1x1x32xf32>
    %8 = vector.shape_cast %7 : vector<1x1x1x32xf32> to vector<1x32xf32>
    %c1_16 = arith.constant 1 : index
    %c0_17 = arith.constant 0 : index
    %c0_18 = arith.constant 0 : index
    %c0_19 = arith.constant 0 : index
    %9 = vector.load %arg3[%c1_16, %c0_17, %c0_18, %c0_19] : memref<8x4x8x16xf32, #tpu.memory_space<vmem>>, vector<1x1x8x16xf32>
    %10 = vector.shape_cast %9 : vector<1x1x8x16xf32> to vector<8x16xf32>
    %11 = vector.broadcast %8 : vector<1x32xf32> to vector<8x32xf32>
    %12 = arith.addf %11, %0 : vector<8x32xf32>
    %13 = vector.extract_strided_slice %6 {offsets = [0, 0], sizes = [8, 1], strides = [1, 1]} : vector<8x4xf32> to vector<8x1xf32>
    %14 = vector.extract_strided_slice %1 {offsets = [0, 0], sizes = [1, 32], strides = [1, 1]} : vector<4x32xf32> to vector<1x32xf32>
    %15 = vector.broadcast %13 : vector<8x1xf32> to vector<8x32xf32>
    %16 = vector.broadcast %14 : vector<1x32xf32> to vector<8x32xf32>
    %17 = arith.mulf %15, %16 : vector<8x32xf32>
    %18 = arith.addf %12, %17 : vector<8x32xf32>
    %19 = vector.extract_strided_slice %6 {offsets = [0, 1], sizes = [8, 1], strides = [1, 1]} : vector<8x4xf32> to vector<8x1xf32>
    %20 = vector.extract_strided_slice %1 {offsets = [1, 0], sizes = [1, 32], strides = [1, 1]} : vector<4x32xf32> to vector<1x32xf32>
    %21 = vector.broadcast %19 : vector<8x1xf32> to vector<8x32xf32>
    %22 = vector.broadcast %20 : vector<1x32xf32> to vector<8x32xf32>
    %23 = arith.mulf %21, %22 : vector<8x32xf32>
    %24 = arith.addf %18, %23 : vector<8x32xf32>
    %25 = vector.extract_strided_slice %6 {offsets = [0, 2], sizes = [8, 1], strides = [1, 1]} : vector<8x4xf32> to vector<8x1xf32>
    %26 = vector.extract_strided_slice %1 {offsets = [2, 0], sizes = [1, 32], strides = [1, 1]} : vector<4x32xf32> to vector<1x32xf32>
    %27 = vector.broadcast %25 : vector<8x1xf32> to vector<8x32xf32>
    %28 = vector.broadcast %26 : vector<1x32xf32> to vector<8x32xf32>
    %29 = arith.mulf %27, %28 : vector<8x32xf32>
    %30 = arith.addf %24, %29 : vector<8x32xf32>
    %31 = vector.extract_strided_slice %6 {offsets = [0, 3], sizes = [8, 1], strides = [1, 1]} : vector<8x4xf32> to vector<8x1xf32>
    %32 = vector.extract_strided_slice %1 {offsets = [3, 0], sizes = [1, 32], strides = [1, 1]} : vector<4x32xf32> to vector<1x32xf32>
    %33 = vector.broadcast %31 : vector<8x1xf32> to vector<8x32xf32>
    %34 = vector.broadcast %32 : vector<1x32xf32> to vector<8x32xf32>
    %35 = arith.mulf %33, %34 : vector<8x32xf32>
    %36 = arith.addf %30, %35 : vector<8x32xf32>
    %37 = math.tanh %36 : vector<8x32xf32>
    %cst = arith.constant dense<0.000000e+00> : vector<8x32xf32>
    %38 = tpu.matmul %37, %2, %cst {dimension_numbers = #tpu.dot_dimension_numbers<[1], [0], [0], [1], [0, 0, 1, 1], [], []>} : vector<8x32xf32>, vector<32x32xf32>, vector<8x32xf32> -> vector<8x32xf32>
    %39 = vector.broadcast %3 : vector<1x32xf32> to vector<8x32xf32>
    %40 = arith.addf %38, %39 : vector<8x32xf32>
    %41 = math.tanh %40 : vector<8x32xf32>
    %cst_20 = arith.constant dense<0.000000e+00> : vector<8x16xf32>
    %42 = tpu.matmul %41, %4, %cst_20 {dimension_numbers = #tpu.dot_dimension_numbers<[1], [0], [0], [1], [0, 0, 1, 1], [], []>} : vector<8x32xf32>, vector<32x16xf32>, vector<8x16xf32> -> vector<8x16xf32>
    %43 = vector.broadcast %5 : vector<1x16xf32> to vector<8x16xf32>
    %44 = arith.addf %42, %43 : vector<8x16xf32>
    %45 = arith.mulf %44, %10 : vector<8x16xf32>
    %46 = vector.extract_strided_slice %45 {offsets = [0, 0], sizes = [8, 4], strides = [1, 1]} : vector<8x16xf32> to vector<8x4xf32>
    %47 = vector.extract_strided_slice %45 {offsets = [0, 4], sizes = [8, 4], strides = [1, 1]} : vector<8x16xf32> to vector<8x4xf32>
    %48 = arith.addf %46, %47 : vector<8x4xf32>
    %49 = vector.extract_strided_slice %45 {offsets = [0, 8], sizes = [8, 4], strides = [1, 1]} : vector<8x16xf32> to vector<8x4xf32>
    %50 = arith.addf %48, %49 : vector<8x4xf32>
    %51 = vector.extract_strided_slice %45 {offsets = [0, 12], sizes = [8, 4], strides = [1, 1]} : vector<8x16xf32> to vector<8x4xf32>
    %52 = arith.addf %50, %51 : vector<8x4xf32>
    %cst_21 = arith.constant 0.333333343 : f32
    %53 = vector.broadcast %cst_21 : f32 to vector<8x4xf32>
    %54 = arith.mulf %52, %53 : vector<8x4xf32>
    %55 = arith.addf %6, %54 : vector<8x4xf32>
    %c1_22 = arith.constant 1 : index
    %c1_23 = arith.constant 1 : index
    %c0_24 = arith.constant 0 : index
    %c0_25 = arith.constant 0 : index
    %56 = vector.load %arg2[%c1_22, %c1_23, %c0_24, %c0_25] : memref<8x4x1x32xf32, #tpu.memory_space<vmem>>, vector<1x1x1x32xf32>
    %57 = vector.shape_cast %56 : vector<1x1x1x32xf32> to vector<1x32xf32>
    %c1_26 = arith.constant 1 : index
    %c1_27 = arith.constant 1 : index
    %c0_28 = arith.constant 0 : index
    %c0_29 = arith.constant 0 : index
    %58 = vector.load %arg3[%c1_26, %c1_27, %c0_28, %c0_29] : memref<8x4x8x16xf32, #tpu.memory_space<vmem>>, vector<1x1x8x16xf32>
    %59 = vector.shape_cast %58 : vector<1x1x8x16xf32> to vector<8x16xf32>
    %60 = vector.broadcast %57 : vector<1x32xf32> to vector<8x32xf32>
    %61 = arith.addf %60, %0 : vector<8x32xf32>
    %62 = vector.extract_strided_slice %55 {offsets = [0, 0], sizes = [8, 1], strides = [1, 1]} : vector<8x4xf32> to vector<8x1xf32>
    %63 = vector.extract_strided_slice %1 {offsets = [0, 0], sizes = [1, 32], strides = [1, 1]} : vector<4x32xf32> to vector<1x32xf32>
    %64 = vector.broadcast %62 : vector<8x1xf32> to vector<8x32xf32>
    %65 = vector.broadcast %63 : vector<1x32xf32> to vector<8x32xf32>
    %66 = arith.mulf %64, %65 : vector<8x32xf32>
    %67 = arith.addf %61, %66 : vector<8x32xf32>
    %68 = vector.extract_strided_slice %55 {offsets = [0, 1], sizes = [8, 1], strides = [1, 1]} : vector<8x4xf32> to vector<8x1xf32>
    %69 = vector.extract_strided_slice %1 {offsets = [1, 0], sizes = [1, 32], strides = [1, 1]} : vector<4x32xf32> to vector<1x32xf32>
    %70 = vector.broadcast %68 : vector<8x1xf32> to vector<8x32xf32>
    %71 = vector.broadcast %69 : vector<1x32xf32> to vector<8x32xf32>
    %72 = arith.mulf %70, %71 : vector<8x32xf32>
    %73 = arith.addf %67, %72 : vector<8x32xf32>
    %74 = vector.extract_strided_slice %55 {offsets = [0, 2], sizes = [8, 1], strides = [1, 1]} : vector<8x4xf32> to vector<8x1xf32>
    %75 = vector.extract_strided_slice %1 {offsets = [2, 0], sizes = [1, 32], strides = [1, 1]} : vector<4x32xf32> to vector<1x32xf32>
    %76 = vector.broadcast %74 : vector<8x1xf32> to vector<8x32xf32>
    %77 = vector.broadcast %75 : vector<1x32xf32> to vector<8x32xf32>
    %78 = arith.mulf %76, %77 : vector<8x32xf32>
    %79 = arith.addf %73, %78 : vector<8x32xf32>
    %80 = vector.extract_strided_slice %55 {offsets = [0, 3], sizes = [8, 1], strides = [1, 1]} : vector<8x4xf32> to vector<8x1xf32>
    %81 = vector.extract_strided_slice %1 {offsets = [3, 0], sizes = [1, 32], strides = [1, 1]} : vector<4x32xf32> to vector<1x32xf32>
    %82 = vector.broadcast %80 : vector<8x1xf32> to vector<8x32xf32>
    %83 = vector.broadcast %81 : vector<1x32xf32> to vector<8x32xf32>
    %84 = arith.mulf %82, %83 : vector<8x32xf32>
    %85 = arith.addf %79, %84 : vector<8x32xf32>
    %86 = math.tanh %85 : vector<8x32xf32>
    %cst_30 = arith.constant dense<0.000000e+00> : vector<8x32xf32>
    %87 = tpu.matmul %86, %2, %cst_30 {dimension_numbers = #tpu.dot_dimension_numbers<[1], [0], [0], [1], [0, 0, 1, 1], [], []>} : vector<8x32xf32>, vector<32x32xf32>, vector<8x32xf32> -> vector<8x32xf32>
    %88 = vector.broadcast %3 : vector<1x32xf32> to vector<8x32xf32>
    %89 = arith.addf %87, %88 : vector<8x32xf32>
    %90 = math.tanh %89 : vector<8x32xf32>
    %cst_31 = arith.constant dense<0.000000e+00> : vector<8x16xf32>
    %91 = tpu.matmul %90, %4, %cst_31 {dimension_numbers = #tpu.dot_dimension_numbers<[1], [0], [0], [1], [0, 0, 1, 1], [], []>} : vector<8x32xf32>, vector<32x16xf32>, vector<8x16xf32> -> vector<8x16xf32>
    %92 = vector.broadcast %5 : vector<1x16xf32> to vector<8x16xf32>
    %93 = arith.addf %91, %92 : vector<8x16xf32>
    %94 = arith.mulf %93, %59 : vector<8x16xf32>
    %95 = vector.extract_strided_slice %94 {offsets = [0, 0], sizes = [8, 4], strides = [1, 1]} : vector<8x16xf32> to vector<8x4xf32>
    %96 = vector.extract_strided_slice %94 {offsets = [0, 4], sizes = [8, 4], strides = [1, 1]} : vector<8x16xf32> to vector<8x4xf32>
    %97 = arith.addf %95, %96 : vector<8x4xf32>
    %98 = vector.extract_strided_slice %94 {offsets = [0, 8], sizes = [8, 4], strides = [1, 1]} : vector<8x16xf32> to vector<8x4xf32>
    %99 = arith.addf %97, %98 : vector<8x4xf32>
    %100 = vector.extract_strided_slice %94 {offsets = [0, 12], sizes = [8, 4], strides = [1, 1]} : vector<8x16xf32> to vector<8x4xf32>
    %101 = arith.addf %99, %100 : vector<8x4xf32>
    %cst_32 = arith.constant 0.333333343 : f32
    %102 = vector.broadcast %cst_32 : f32 to vector<8x4xf32>
    %103 = arith.mulf %52, %102 : vector<8x4xf32>
    %104 = arith.subf %101, %103 : vector<8x4xf32>
    %105 = arith.addf %6, %104 : vector<8x4xf32>
    %c1_33 = arith.constant 1 : index
    %c2 = arith.constant 2 : index
    %c0_34 = arith.constant 0 : index
    %c0_35 = arith.constant 0 : index
    %106 = vector.load %arg2[%c1_33, %c2, %c0_34, %c0_35] : memref<8x4x1x32xf32, #tpu.memory_space<vmem>>, vector<1x1x1x32xf32>
    %107 = vector.shape_cast %106 : vector<1x1x1x32xf32> to vector<1x32xf32>
    %c1_36 = arith.constant 1 : index
    %c2_37 = arith.constant 2 : index
    %c0_38 = arith.constant 0 : index
    %c0_39 = arith.constant 0 : index
    %108 = vector.load %arg3[%c1_36, %c2_37, %c0_38, %c0_39] : memref<8x4x8x16xf32, #tpu.memory_space<vmem>>, vector<1x1x8x16xf32>
    %109 = vector.shape_cast %108 : vector<1x1x8x16xf32> to vector<8x16xf32>
    %110 = vector.broadcast %107 : vector<1x32xf32> to vector<8x32xf32>
    %111 = arith.addf %110, %0 : vector<8x32xf32>
    %112 = vector.extract_strided_slice %105 {offsets = [0, 0], sizes = [8, 1], strides = [1, 1]} : vector<8x4xf32> to vector<8x1xf32>
    %113 = vector.extract_strided_slice %1 {offsets = [0, 0], sizes = [1, 32], strides = [1, 1]} : vector<4x32xf32> to vector<1x32xf32>
    %114 = vector.broadcast %112 : vector<8x1xf32> to vector<8x32xf32>
    %115 = vector.broadcast %113 : vector<1x32xf32> to vector<8x32xf32>
    %116 = arith.mulf %114, %115 : vector<8x32xf32>
    %117 = arith.addf %111, %116 : vector<8x32xf32>
    %118 = vector.extract_strided_slice %105 {offsets = [0, 1], sizes = [8, 1], strides = [1, 1]} : vector<8x4xf32> to vector<8x1xf32>
    %119 = vector.extract_strided_slice %1 {offsets = [1, 0], sizes = [1, 32], strides = [1, 1]} : vector<4x32xf32> to vector<1x32xf32>
    %120 = vector.broadcast %118 : vector<8x1xf32> to vector<8x32xf32>
    %121 = vector.broadcast %119 : vector<1x32xf32> to vector<8x32xf32>
    %122 = arith.mulf %120, %121 : vector<8x32xf32>
    %123 = arith.addf %117, %122 : vector<8x32xf32>
    %124 = vector.extract_strided_slice %105 {offsets = [0, 2], sizes = [8, 1], strides = [1, 1]} : vector<8x4xf32> to vector<8x1xf32>
    %125 = vector.extract_strided_slice %1 {offsets = [2, 0], sizes = [1, 32], strides = [1, 1]} : vector<4x32xf32> to vector<1x32xf32>
    %126 = vector.broadcast %124 : vector<8x1xf32> to vector<8x32xf32>
    %127 = vector.broadcast %125 : vector<1x32xf32> to vector<8x32xf32>
    %128 = arith.mulf %126, %127 : vector<8x32xf32>
    %129 = arith.addf %123, %128 : vector<8x32xf32>
    %130 = vector.extract_strided_slice %105 {offsets = [0, 3], sizes = [8, 1], strides = [1, 1]} : vector<8x4xf32> to vector<8x1xf32>
    %131 = vector.extract_strided_slice %1 {offsets = [3, 0], sizes = [1, 32], strides = [1, 1]} : vector<4x32xf32> to vector<1x32xf32>
    %132 = vector.broadcast %130 : vector<8x1xf32> to vector<8x32xf32>
    %133 = vector.broadcast %131 : vector<1x32xf32> to vector<8x32xf32>
    %134 = arith.mulf %132, %133 : vector<8x32xf32>
    %135 = arith.addf %129, %134 : vector<8x32xf32>
    %136 = math.tanh %135 : vector<8x32xf32>
    %cst_40 = arith.constant dense<0.000000e+00> : vector<8x32xf32>
    %137 = tpu.matmul %136, %2, %cst_40 {dimension_numbers = #tpu.dot_dimension_numbers<[1], [0], [0], [1], [0, 0, 1, 1], [], []>} : vector<8x32xf32>, vector<32x32xf32>, vector<8x32xf32> -> vector<8x32xf32>
    %138 = vector.broadcast %3 : vector<1x32xf32> to vector<8x32xf32>
    %139 = arith.addf %137, %138 : vector<8x32xf32>
    %140 = math.tanh %139 : vector<8x32xf32>
    %cst_41 = arith.constant dense<0.000000e+00> : vector<8x16xf32>
    %141 = tpu.matmul %140, %4, %cst_41 {dimension_numbers = #tpu.dot_dimension_numbers<[1], [0], [0], [1], [0, 0, 1, 1], [], []>} : vector<8x32xf32>, vector<32x16xf32>, vector<8x16xf32> -> vector<8x16xf32>
    %142 = vector.broadcast %5 : vector<1x16xf32> to vector<8x16xf32>
    %143 = arith.addf %141, %142 : vector<8x16xf32>
    %144 = arith.mulf %143, %109 : vector<8x16xf32>
    %145 = vector.extract_strided_slice %144 {offsets = [0, 0], sizes = [8, 4], strides = [1, 1]} : vector<8x16xf32> to vector<8x4xf32>
    %146 = vector.extract_strided_slice %144 {offsets = [0, 4], sizes = [8, 4], strides = [1, 1]} : vector<8x16xf32> to vector<8x4xf32>
    %147 = arith.addf %145, %146 : vector<8x4xf32>
    %148 = vector.extract_strided_slice %144 {offsets = [0, 8], sizes = [8, 4], strides = [1, 1]} : vector<8x16xf32> to vector<8x4xf32>
    %149 = arith.addf %147, %148 : vector<8x4xf32>
    %150 = vector.extract_strided_slice %144 {offsets = [0, 12], sizes = [8, 4], strides = [1, 1]} : vector<8x16xf32> to vector<8x4xf32>
    %151 = arith.addf %149, %150 : vector<8x4xf32>
    %152 = arith.subf %52, %101 : vector<8x4xf32>
    %153 = arith.addf %152, %151 : vector<8x4xf32>
    %154 = arith.addf %6, %153 : vector<8x4xf32>
    %c1_42 = arith.constant 1 : index
    %c3 = arith.constant 3 : index
    %c0_43 = arith.constant 0 : index
    %c0_44 = arith.constant 0 : index
    %155 = vector.load %arg2[%c1_42, %c3, %c0_43, %c0_44] : memref<8x4x1x32xf32, #tpu.memory_space<vmem>>, vector<1x1x1x32xf32>
    %156 = vector.shape_cast %155 : vector<1x1x1x32xf32> to vector<1x32xf32>
    %c1_45 = arith.constant 1 : index
    %c3_46 = arith.constant 3 : index
    %c0_47 = arith.constant 0 : index
    %c0_48 = arith.constant 0 : index
    %157 = vector.load %arg3[%c1_45, %c3_46, %c0_47, %c0_48] : memref<8x4x8x16xf32, #tpu.memory_space<vmem>>, vector<1x1x8x16xf32>
    %158 = vector.shape_cast %157 : vector<1x1x8x16xf32> to vector<8x16xf32>
    %159 = vector.broadcast %156 : vector<1x32xf32> to vector<8x32xf32>
    %160 = arith.addf %159, %0 : vector<8x32xf32>
    %161 = vector.extract_strided_slice %154 {offsets = [0, 0], sizes = [8, 1], strides = [1, 1]} : vector<8x4xf32> to vector<8x1xf32>
    %162 = vector.extract_strided_slice %1 {offsets = [0, 0], sizes = [1, 32], strides = [1, 1]} : vector<4x32xf32> to vector<1x32xf32>
    %163 = vector.broadcast %161 : vector<8x1xf32> to vector<8x32xf32>
    %164 = vector.broadcast %162 : vector<1x32xf32> to vector<8x32xf32>
    %165 = arith.mulf %163, %164 : vector<8x32xf32>
    %166 = arith.addf %160, %165 : vector<8x32xf32>
    %167 = vector.extract_strided_slice %154 {offsets = [0, 1], sizes = [8, 1], strides = [1, 1]} : vector<8x4xf32> to vector<8x1xf32>
    %168 = vector.extract_strided_slice %1 {offsets = [1, 0], sizes = [1, 32], strides = [1, 1]} : vector<4x32xf32> to vector<1x32xf32>
    %169 = vector.broadcast %167 : vector<8x1xf32> to vector<8x32xf32>
    %170 = vector.broadcast %168 : vector<1x32xf32> to vector<8x32xf32>
    %171 = arith.mulf %169, %170 : vector<8x32xf32>
    %172 = arith.addf %166, %171 : vector<8x32xf32>
    %173 = vector.extract_strided_slice %154 {offsets = [0, 2], sizes = [8, 1], strides = [1, 1]} : vector<8x4xf32> to vector<8x1xf32>
    %174 = vector.extract_strided_slice %1 {offsets = [2, 0], sizes = [1, 32], strides = [1, 1]} : vector<4x32xf32> to vector<1x32xf32>
    %175 = vector.broadcast %173 : vector<8x1xf32> to vector<8x32xf32>
    %176 = vector.broadcast %174 : vector<1x32xf32> to vector<8x32xf32>
    %177 = arith.mulf %175, %176 : vector<8x32xf32>
    %178 = arith.addf %172, %177 : vector<8x32xf32>
    %179 = vector.extract_strided_slice %154 {offsets = [0, 3], sizes = [8, 1], strides = [1, 1]} : vector<8x4xf32> to vector<8x1xf32>
    %180 = vector.extract_strided_slice %1 {offsets = [3, 0], sizes = [1, 32], strides = [1, 1]} : vector<4x32xf32> to vector<1x32xf32>
    %181 = vector.broadcast %179 : vector<8x1xf32> to vector<8x32xf32>
    %182 = vector.broadcast %180 : vector<1x32xf32> to vector<8x32xf32>
    %183 = arith.mulf %181, %182 : vector<8x32xf32>
    %184 = arith.addf %178, %183 : vector<8x32xf32>
    %185 = math.tanh %184 : vector<8x32xf32>
    %cst_49 = arith.constant dense<0.000000e+00> : vector<8x32xf32>
    %186 = tpu.matmul %185, %2, %cst_49 {dimension_numbers = #tpu.dot_dimension_numbers<[1], [0], [0], [1], [0, 0, 1, 1], [], []>} : vector<8x32xf32>, vector<32x32xf32>, vector<8x32xf32> -> vector<8x32xf32>
    %187 = vector.broadcast %3 : vector<1x32xf32> to vector<8x32xf32>
    %188 = arith.addf %186, %187 : vector<8x32xf32>
    %189 = math.tanh %188 : vector<8x32xf32>
    %cst_50 = arith.constant dense<0.000000e+00> : vector<8x16xf32>
    %190 = tpu.matmul %189, %4, %cst_50 {dimension_numbers = #tpu.dot_dimension_numbers<[1], [0], [0], [1], [0, 0, 1, 1], [], []>} : vector<8x32xf32>, vector<32x16xf32>, vector<8x16xf32> -> vector<8x16xf32>
    %191 = vector.broadcast %5 : vector<1x16xf32> to vector<8x16xf32>
    %192 = arith.addf %190, %191 : vector<8x16xf32>
    %193 = arith.mulf %192, %158 : vector<8x16xf32>
    %194 = vector.extract_strided_slice %193 {offsets = [0, 0], sizes = [8, 4], strides = [1, 1]} : vector<8x16xf32> to vector<8x4xf32>
    %195 = vector.extract_strided_slice %193 {offsets = [0, 4], sizes = [8, 4], strides = [1, 1]} : vector<8x16xf32> to vector<8x4xf32>
    %196 = arith.addf %194, %195 : vector<8x4xf32>
    %197 = vector.extract_strided_slice %193 {offsets = [0, 8], sizes = [8, 4], strides = [1, 1]} : vector<8x16xf32> to vector<8x4xf32>
    %198 = arith.addf %196, %197 : vector<8x4xf32>
    %199 = vector.extract_strided_slice %193 {offsets = [0, 12], sizes = [8, 4], strides = [1, 1]} : vector<8x16xf32> to vector<8x4xf32>
    %200 = arith.addf %198, %199 : vector<8x4xf32>
    %201 = arith.addf %101, %151 : vector<8x4xf32>
    %cst_51 = arith.constant 3.000000e+00 : f32
    %202 = vector.broadcast %cst_51 : f32 to vector<8x4xf32>
    %203 = arith.mulf %202, %201 : vector<8x4xf32>
    %204 = arith.addf %52, %203 : vector<8x4xf32>
    %205 = arith.addf %204, %200 : vector<8x4xf32>
    %cst_52 = arith.constant 1.250000e-01 : f32
    %206 = vector.broadcast %cst_52 : f32 to vector<8x4xf32>
    %207 = arith.mulf %205, %206 : vector<8x4xf32>
    %208 = arith.addf %6, %207 : vector<8x4xf32>
    %c2_53 = arith.constant 2 : index
    %c0_54 = arith.constant 0 : index
    %c0_55 = arith.constant 0 : index
    %c0_56 = arith.constant 0 : index
    %209 = vector.load %arg2[%c2_53, %c0_54, %c0_55, %c0_56] : memref<8x4x1x32xf32, #tpu.memory_space<vmem>>, vector<1x1x1x32xf32>
    %210 = vector.shape_cast %209 : vector<1x1x1x32xf32> to vector<1x32xf32>
    %c2_57 = arith.constant 2 : index
    %c0_58 = arith.constant 0 : index
    %c0_59 = arith.constant 0 : index
    %c0_60 = arith.constant 0 : index
    %211 = vector.load %arg3[%c2_57, %c0_58, %c0_59, %c0_60] : memref<8x4x8x16xf32, #tpu.memory_space<vmem>>, vector<1x1x8x16xf32>
    %212 = vector.shape_cast %211 : vector<1x1x8x16xf32> to vector<8x16xf32>
    %213 = vector.broadcast %210 : vector<1x32xf32> to vector<8x32xf32>
    %214 = arith.addf %213, %0 : vector<8x32xf32>
    %215 = vector.extract_strided_slice %208 {offsets = [0, 0], sizes = [8, 1], strides = [1, 1]} : vector<8x4xf32> to vector<8x1xf32>
    %216 = vector.extract_strided_slice %1 {offsets = [0, 0], sizes = [1, 32], strides = [1, 1]} : vector<4x32xf32> to vector<1x32xf32>
    %217 = vector.broadcast %215 : vector<8x1xf32> to vector<8x32xf32>
    %218 = vector.broadcast %216 : vector<1x32xf32> to vector<8x32xf32>
    %219 = arith.mulf %217, %218 : vector<8x32xf32>
    %220 = arith.addf %214, %219 : vector<8x32xf32>
    %221 = vector.extract_strided_slice %208 {offsets = [0, 1], sizes = [8, 1], strides = [1, 1]} : vector<8x4xf32> to vector<8x1xf32>
    %222 = vector.extract_strided_slice %1 {offsets = [1, 0], sizes = [1, 32], strides = [1, 1]} : vector<4x32xf32> to vector<1x32xf32>
    %223 = vector.broadcast %221 : vector<8x1xf32> to vector<8x32xf32>
    %224 = vector.broadcast %222 : vector<1x32xf32> to vector<8x32xf32>
    %225 = arith.mulf %223, %224 : vector<8x32xf32>
    %226 = arith.addf %220, %225 : vector<8x32xf32>
    %227 = vector.extract_strided_slice %208 {offsets = [0, 2], sizes = [8, 1], strides = [1, 1]} : vector<8x4xf32> to vector<8x1xf32>
    %228 = vector.extract_strided_slice %1 {offsets = [2, 0], sizes = [1, 32], strides = [1, 1]} : vector<4x32xf32> to vector<1x32xf32>
    %229 = vector.broadcast %227 : vector<8x1xf32> to vector<8x32xf32>
    %230 = vector.broadcast %228 : vector<1x32xf32> to vector<8x32xf32>
    %231 = arith.mulf %229, %230 : vector<8x32xf32>
    %232 = arith.addf %226, %231 : vector<8x32xf32>
    %233 = vector.extract_strided_slice %208 {offsets = [0, 3], sizes = [8, 1], strides = [1, 1]} : vector<8x4xf32> to vector<8x1xf32>
    %234 = vector.extract_strided_slice %1 {offsets = [3, 0], sizes = [1, 32], strides = [1, 1]} : vector<4x32xf32> to vector<1x32xf32>
    %235 = vector.broadcast %233 : vector<8x1xf32> to vector<8x32xf32>
    %236 = vector.broadcast %234 : vector<1x32xf32> to vector<8x32xf32>
    %237 = arith.mulf %235, %236 : vector<8x32xf32>
    %238 = arith.addf %232, %237 : vector<8x32xf32>
    %239 = math.tanh %238 : vector<8x32xf32>
    %cst_61 = arith.constant dense<0.000000e+00> : vector<8x32xf32>
    %240 = tpu.matmul %239, %2, %cst_61 {dimension_numbers = #tpu.dot_dimension_numbers<[1], [0], [0], [1], [0, 0, 1, 1], [], []>} : vector<8x32xf32>, vector<32x32xf32>, vector<8x32xf32> -> vector<8x32xf32>
    %241 = vector.broadcast %3 : vector<1x32xf32> to vector<8x32xf32>
    %242 = arith.addf %240, %241 : vector<8x32xf32>
    %243 = math.tanh %242 : vector<8x32xf32>
    %cst_62 = arith.constant dense<0.000000e+00> : vector<8x16xf32>
    %244 = tpu.matmul %243, %4, %cst_62 {dimension_numbers = #tpu.dot_dimension_numbers<[1], [0], [0], [1], [0, 0, 1, 1], [], []>} : vector<8x32xf32>, vector<32x16xf32>, vector<8x16xf32> -> vector<8x16xf32>
    %245 = vector.broadcast %5 : vector<1x16xf32> to vector<8x16xf32>
    %246 = arith.addf %244, %245 : vector<8x16xf32>
    %247 = arith.mulf %246, %212 : vector<8x16xf32>
    %248 = vector.extract_strided_slice %247 {offsets = [0, 0], sizes = [8, 4], strides = [1, 1]} : vector<8x16xf32> to vector<8x4xf32>
    %249 = vector.extract_strided_slice %247 {offsets = [0, 4], sizes = [8, 4], strides = [1, 1]} : vector<8x16xf32> to vector<8x4xf32>
    %250 = arith.addf %248, %249 : vector<8x4xf32>
    %251 = vector.extract_strided_slice %247 {offsets = [0, 8], sizes = [8, 4], strides = [1, 1]} : vector<8x16xf32> to vector<8x4xf32>
    %252 = arith.addf %250, %251 : vector<8x4xf32>
    %253 = vector.extract_strided_slice %247 {offsets = [0, 12], sizes = [8, 4], strides = [1, 1]} : vector<8x16xf32> to vector<8x4xf32>
    %254 = arith.addf %252, %253 : vector<8x4xf32>
    %cst_63 = arith.constant 0.333333343 : f32
    %255 = vector.broadcast %cst_63 : f32 to vector<8x4xf32>
    %256 = arith.mulf %254, %255 : vector<8x4xf32>
    %257 = arith.addf %208, %256 : vector<8x4xf32>
    %c2_64 = arith.constant 2 : index
    %c1_65 = arith.constant 1 : index
    %c0_66 = arith.constant 0 : index
    %c0_67 = arith.constant 0 : index
    %258 = vector.load %arg2[%c2_64, %c1_65, %c0_66, %c0_67] : memref<8x4x1x32xf32, #tpu.memory_space<vmem>>, vector<1x1x1x32xf32>
    %259 = vector.shape_cast %258 : vector<1x1x1x32xf32> to vector<1x32xf32>
    %c2_68 = arith.constant 2 : index
    %c1_69 = arith.constant 1 : index
    %c0_70 = arith.constant 0 : index
    %c0_71 = arith.constant 0 : index
    %260 = vector.load %arg3[%c2_68, %c1_69, %c0_70, %c0_71] : memref<8x4x8x16xf32, #tpu.memory_space<vmem>>, vector<1x1x8x16xf32>
    %261 = vector.shape_cast %260 : vector<1x1x8x16xf32> to vector<8x16xf32>
    %262 = vector.broadcast %259 : vector<1x32xf32> to vector<8x32xf32>
    %263 = arith.addf %262, %0 : vector<8x32xf32>
    %264 = vector.extract_strided_slice %257 {offsets = [0, 0], sizes = [8, 1], strides = [1, 1]} : vector<8x4xf32> to vector<8x1xf32>
    %265 = vector.extract_strided_slice %1 {offsets = [0, 0], sizes = [1, 32], strides = [1, 1]} : vector<4x32xf32> to vector<1x32xf32>
    %266 = vector.broadcast %264 : vector<8x1xf32> to vector<8x32xf32>
    %267 = vector.broadcast %265 : vector<1x32xf32> to vector<8x32xf32>
    %268 = arith.mulf %266, %267 : vector<8x32xf32>
    %269 = arith.addf %263, %268 : vector<8x32xf32>
    %270 = vector.extract_strided_slice %257 {offsets = [0, 1], sizes = [8, 1], strides = [1, 1]} : vector<8x4xf32> to vector<8x1xf32>
    %271 = vector.extract_strided_slice %1 {offsets = [1, 0], sizes = [1, 32], strides = [1, 1]} : vector<4x32xf32> to vector<1x32xf32>
    %272 = vector.broadcast %270 : vector<8x1xf32> to vector<8x32xf32>
    %273 = vector.broadcast %271 : vector<1x32xf32> to vector<8x32xf32>
    %274 = arith.mulf %272, %273 : vector<8x32xf32>
    %275 = arith.addf %269, %274 : vector<8x32xf32>
    %276 = vector.extract_strided_slice %257 {offsets = [0, 2], sizes = [8, 1], strides = [1, 1]} : vector<8x4xf32> to vector<8x1xf32>
    %277 = vector.extract_strided_slice %1 {offsets = [2, 0], sizes = [1, 32], strides = [1, 1]} : vector<4x32xf32> to vector<1x32xf32>
    %278 = vector.broadcast %276 : vector<8x1xf32> to vector<8x32xf32>
    %279 = vector.broadcast %277 : vector<1x32xf32> to vector<8x32xf32>
    %280 = arith.mulf %278, %279 : vector<8x32xf32>
    %281 = arith.addf %275, %280 : vector<8x32xf32>
    %282 = vector.extract_strided_slice %257 {offsets = [0, 3], sizes = [8, 1], strides = [1, 1]} : vector<8x4xf32> to vector<8x1xf32>
    %283 = vector.extract_strided_slice %1 {offsets = [3, 0], sizes = [1, 32], strides = [1, 1]} : vector<4x32xf32> to vector<1x32xf32>
    %284 = vector.broadcast %282 : vector<8x1xf32> to vector<8x32xf32>
    %285 = vector.broadcast %283 : vector<1x32xf32> to vector<8x32xf32>
    %286 = arith.mulf %284, %285 : vector<8x32xf32>
    %287 = arith.addf %281, %286 : vector<8x32xf32>
    %288 = math.tanh %287 : vector<8x32xf32>
    %cst_72 = arith.constant dense<0.000000e+00> : vector<8x32xf32>
    %289 = tpu.matmul %288, %2, %cst_72 {dimension_numbers = #tpu.dot_dimension_numbers<[1], [0], [0], [1], [0, 0, 1, 1], [], []>} : vector<8x32xf32>, vector<32x32xf32>, vector<8x32xf32> -> vector<8x32xf32>
    %290 = vector.broadcast %3 : vector<1x32xf32> to vector<8x32xf32>
    %291 = arith.addf %289, %290 : vector<8x32xf32>
    %292 = math.tanh %291 : vector<8x32xf32>
    %cst_73 = arith.constant dense<0.000000e+00> : vector<8x16xf32>
    %293 = tpu.matmul %292, %4, %cst_73 {dimension_numbers = #tpu.dot_dimension_numbers<[1], [0], [0], [1], [0, 0, 1, 1], [], []>} : vector<8x32xf32>, vector<32x16xf32>, vector<8x16xf32> -> vector<8x16xf32>
    %294 = vector.broadcast %5 : vector<1x16xf32> to vector<8x16xf32>
    %295 = arith.addf %293, %294 : vector<8x16xf32>
    %296 = arith.mulf %295, %261 : vector<8x16xf32>
    %297 = vector.extract_strided_slice %296 {offsets = [0, 0], sizes = [8, 4], strides = [1, 1]} : vector<8x16xf32> to vector<8x4xf32>
    %298 = vector.extract_strided_slice %296 {offsets = [0, 4], sizes = [8, 4], strides = [1, 1]} : vector<8x16xf32> to vector<8x4xf32>
    %299 = arith.addf %297, %298 : vector<8x4xf32>
    %300 = vector.extract_strided_slice %296 {offsets = [0, 8], sizes = [8, 4], strides = [1, 1]} : vector<8x16xf32> to vector<8x4xf32>
    %301 = arith.addf %299, %300 : vector<8x4xf32>
    %302 = vector.extract_strided_slice %296 {offsets = [0, 12], sizes = [8, 4], strides = [1, 1]} : vector<8x16xf32> to vector<8x4xf32>
    %303 = arith.addf %301, %302 : vector<8x4xf32>
    %cst_74 = arith.constant 0.333333343 : f32
    %304 = vector.broadcast %cst_74 : f32 to vector<8x4xf32>
    %305 = arith.mulf %254, %304 : vector<8x4xf32>
    %306 = arith.subf %303, %305 : vector<8x4xf32>
    %307 = arith.addf %208, %306 : vector<8x4xf32>
    %c2_75 = arith.constant 2 : index
    %c2_76 = arith.constant 2 : index
    %c0_77 = arith.constant 0 : index
    %c0_78 = arith.constant 0 : index
    %308 = vector.load %arg2[%c2_75, %c2_76, %c0_77, %c0_78] : memref<8x4x1x32xf32, #tpu.memory_space<vmem>>, vector<1x1x1x32xf32>
    %309 = vector.shape_cast %308 : vector<1x1x1x32xf32> to vector<1x32xf32>
    %c2_79 = arith.constant 2 : index
    %c2_80 = arith.constant 2 : index
    %c0_81 = arith.constant 0 : index
    %c0_82 = arith.constant 0 : index
    %310 = vector.load %arg3[%c2_79, %c2_80, %c0_81, %c0_82] : memref<8x4x8x16xf32, #tpu.memory_space<vmem>>, vector<1x1x8x16xf32>
    %311 = vector.shape_cast %310 : vector<1x1x8x16xf32> to vector<8x16xf32>
    %312 = vector.broadcast %309 : vector<1x32xf32> to vector<8x32xf32>
    %313 = arith.addf %312, %0 : vector<8x32xf32>
    %314 = vector.extract_strided_slice %307 {offsets = [0, 0], sizes = [8, 1], strides = [1, 1]} : vector<8x4xf32> to vector<8x1xf32>
    %315 = vector.extract_strided_slice %1 {offsets = [0, 0], sizes = [1, 32], strides = [1, 1]} : vector<4x32xf32> to vector<1x32xf32>
    %316 = vector.broadcast %314 : vector<8x1xf32> to vector<8x32xf32>
    %317 = vector.broadcast %315 : vector<1x32xf32> to vector<8x32xf32>
    %318 = arith.mulf %316, %317 : vector<8x32xf32>
    %319 = arith.addf %313, %318 : vector<8x32xf32>
    %320 = vector.extract_strided_slice %307 {offsets = [0, 1], sizes = [8, 1], strides = [1, 1]} : vector<8x4xf32> to vector<8x1xf32>
    %321 = vector.extract_strided_slice %1 {offsets = [1, 0], sizes = [1, 32], strides = [1, 1]} : vector<4x32xf32> to vector<1x32xf32>
    %322 = vector.broadcast %320 : vector<8x1xf32> to vector<8x32xf32>
    %323 = vector.broadcast %321 : vector<1x32xf32> to vector<8x32xf32>
    %324 = arith.mulf %322, %323 : vector<8x32xf32>
    %325 = arith.addf %319, %324 : vector<8x32xf32>
    %326 = vector.extract_strided_slice %307 {offsets = [0, 2], sizes = [8, 1], strides = [1, 1]} : vector<8x4xf32> to vector<8x1xf32>
    %327 = vector.extract_strided_slice %1 {offsets = [2, 0], sizes = [1, 32], strides = [1, 1]} : vector<4x32xf32> to vector<1x32xf32>
    %328 = vector.broadcast %326 : vector<8x1xf32> to vector<8x32xf32>
    %329 = vector.broadcast %327 : vector<1x32xf32> to vector<8x32xf32>
    %330 = arith.mulf %328, %329 : vector<8x32xf32>
    %331 = arith.addf %325, %330 : vector<8x32xf32>
    %332 = vector.extract_strided_slice %307 {offsets = [0, 3], sizes = [8, 1], strides = [1, 1]} : vector<8x4xf32> to vector<8x1xf32>
    %333 = vector.extract_strided_slice %1 {offsets = [3, 0], sizes = [1, 32], strides = [1, 1]} : vector<4x32xf32> to vector<1x32xf32>
    %334 = vector.broadcast %332 : vector<8x1xf32> to vector<8x32xf32>
    %335 = vector.broadcast %333 : vector<1x32xf32> to vector<8x32xf32>
    %336 = arith.mulf %334, %335 : vector<8x32xf32>
    %337 = arith.addf %331, %336 : vector<8x32xf32>
    %338 = math.tanh %337 : vector<8x32xf32>
    %cst_83 = arith.constant dense<0.000000e+00> : vector<8x32xf32>
    %339 = tpu.matmul %338, %2, %cst_83 {dimension_numbers = #tpu.dot_dimension_numbers<[1], [0], [0], [1], [0, 0, 1, 1], [], []>} : vector<8x32xf32>, vector<32x32xf32>, vector<8x32xf32> -> vector<8x32xf32>
    %340 = vector.broadcast %3 : vector<1x32xf32> to vector<8x32xf32>
    %341 = arith.addf %339, %340 : vector<8x32xf32>
    %342 = math.tanh %341 : vector<8x32xf32>
    %cst_84 = arith.constant dense<0.000000e+00> : vector<8x16xf32>
    %343 = tpu.matmul %342, %4, %cst_84 {dimension_numbers = #tpu.dot_dimension_numbers<[1], [0], [0], [1], [0, 0, 1, 1], [], []>} : vector<8x32xf32>, vector<32x16xf32>, vector<8x16xf32> -> vector<8x16xf32>
    %344 = vector.broadcast %5 : vector<1x16xf32> to vector<8x16xf32>
    %345 = arith.addf %343, %344 : vector<8x16xf32>
    %346 = arith.mulf %345, %311 : vector<8x16xf32>
    %347 = vector.extract_strided_slice %346 {offsets = [0, 0], sizes = [8, 4], strides = [1, 1]} : vector<8x16xf32> to vector<8x4xf32>
    %348 = vector.extract_strided_slice %346 {offsets = [0, 4], sizes = [8, 4], strides = [1, 1]} : vector<8x16xf32> to vector<8x4xf32>
    %349 = arith.addf %347, %348 : vector<8x4xf32>
    %350 = vector.extract_strided_slice %346 {offsets = [0, 8], sizes = [8, 4], strides = [1, 1]} : vector<8x16xf32> to vector<8x4xf32>
    %351 = arith.addf %349, %350 : vector<8x4xf32>
    %352 = vector.extract_strided_slice %346 {offsets = [0, 12], sizes = [8, 4], strides = [1, 1]} : vector<8x16xf32> to vector<8x4xf32>
    %353 = arith.addf %351, %352 : vector<8x4xf32>
    %354 = arith.subf %254, %303 : vector<8x4xf32>
    %355 = arith.addf %354, %353 : vector<8x4xf32>
    %356 = arith.addf %208, %355 : vector<8x4xf32>
    %c2_85 = arith.constant 2 : index
    %c3_86 = arith.constant 3 : index
    %c0_87 = arith.constant 0 : index
    %c0_88 = arith.constant 0 : index
    %357 = vector.load %arg2[%c2_85, %c3_86, %c0_87, %c0_88] : memref<8x4x1x32xf32, #tpu.memory_space<vmem>>, vector<1x1x1x32xf32>
    %358 = vector.shape_cast %357 : vector<1x1x1x32xf32> to vector<1x32xf32>
    %c2_89 = arith.constant 2 : index
    %c3_90 = arith.constant 3 : index
    %c0_91 = arith.constant 0 : index
    %c0_92 = arith.constant 0 : index
    %359 = vector.load %arg3[%c2_89, %c3_90, %c0_91, %c0_92] : memref<8x4x8x16xf32, #tpu.memory_space<vmem>>, vector<1x1x8x16xf32>
    %360 = vector.shape_cast %359 : vector<1x1x8x16xf32> to vector<8x16xf32>
    %361 = vector.broadcast %358 : vector<1x32xf32> to vector<8x32xf32>
    %362 = arith.addf %361, %0 : vector<8x32xf32>
    %363 = vector.extract_strided_slice %356 {offsets = [0, 0], sizes = [8, 1], strides = [1, 1]} : vector<8x4xf32> to vector<8x1xf32>
    %364 = vector.extract_strided_slice %1 {offsets = [0, 0], sizes = [1, 32], strides = [1, 1]} : vector<4x32xf32> to vector<1x32xf32>
    %365 = vector.broadcast %363 : vector<8x1xf32> to vector<8x32xf32>
    %366 = vector.broadcast %364 : vector<1x32xf32> to vector<8x32xf32>
    %367 = arith.mulf %365, %366 : vector<8x32xf32>
    %368 = arith.addf %362, %367 : vector<8x32xf32>
    %369 = vector.extract_strided_slice %356 {offsets = [0, 1], sizes = [8, 1], strides = [1, 1]} : vector<8x4xf32> to vector<8x1xf32>
    %370 = vector.extract_strided_slice %1 {offsets = [1, 0], sizes = [1, 32], strides = [1, 1]} : vector<4x32xf32> to vector<1x32xf32>
    %371 = vector.broadcast %369 : vector<8x1xf32> to vector<8x32xf32>
    %372 = vector.broadcast %370 : vector<1x32xf32> to vector<8x32xf32>
    %373 = arith.mulf %371, %372 : vector<8x32xf32>
    %374 = arith.addf %368, %373 : vector<8x32xf32>
    %375 = vector.extract_strided_slice %356 {offsets = [0, 2], sizes = [8, 1], strides = [1, 1]} : vector<8x4xf32> to vector<8x1xf32>
    %376 = vector.extract_strided_slice %1 {offsets = [2, 0], sizes = [1, 32], strides = [1, 1]} : vector<4x32xf32> to vector<1x32xf32>
    %377 = vector.broadcast %375 : vector<8x1xf32> to vector<8x32xf32>
    %378 = vector.broadcast %376 : vector<1x32xf32> to vector<8x32xf32>
    %379 = arith.mulf %377, %378 : vector<8x32xf32>
    %380 = arith.addf %374, %379 : vector<8x32xf32>
    %381 = vector.extract_strided_slice %356 {offsets = [0, 3], sizes = [8, 1], strides = [1, 1]} : vector<8x4xf32> to vector<8x1xf32>
    %382 = vector.extract_strided_slice %1 {offsets = [3, 0], sizes = [1, 32], strides = [1, 1]} : vector<4x32xf32> to vector<1x32xf32>
    %383 = vector.broadcast %381 : vector<8x1xf32> to vector<8x32xf32>
    %384 = vector.broadcast %382 : vector<1x32xf32> to vector<8x32xf32>
    %385 = arith.mulf %383, %384 : vector<8x32xf32>
    %386 = arith.addf %380, %385 : vector<8x32xf32>
    %387 = math.tanh %386 : vector<8x32xf32>
    %cst_93 = arith.constant dense<0.000000e+00> : vector<8x32xf32>
    %388 = tpu.matmul %387, %2, %cst_93 {dimension_numbers = #tpu.dot_dimension_numbers<[1], [0], [0], [1], [0, 0, 1, 1], [], []>} : vector<8x32xf32>, vector<32x32xf32>, vector<8x32xf32> -> vector<8x32xf32>
    %389 = vector.broadcast %3 : vector<1x32xf32> to vector<8x32xf32>
    %390 = arith.addf %388, %389 : vector<8x32xf32>
    %391 = math.tanh %390 : vector<8x32xf32>
    %cst_94 = arith.constant dense<0.000000e+00> : vector<8x16xf32>
    %392 = tpu.matmul %391, %4, %cst_94 {dimension_numbers = #tpu.dot_dimension_numbers<[1], [0], [0], [1], [0, 0, 1, 1], [], []>} : vector<8x32xf32>, vector<32x16xf32>, vector<8x16xf32> -> vector<8x16xf32>
    %393 = vector.broadcast %5 : vector<1x16xf32> to vector<8x16xf32>
    %394 = arith.addf %392, %393 : vector<8x16xf32>
    %395 = arith.mulf %394, %360 : vector<8x16xf32>
    %396 = vector.extract_strided_slice %395 {offsets = [0, 0], sizes = [8, 4], strides = [1, 1]} : vector<8x16xf32> to vector<8x4xf32>
    %397 = vector.extract_strided_slice %395 {offsets = [0, 4], sizes = [8, 4], strides = [1, 1]} : vector<8x16xf32> to vector<8x4xf32>
    %398 = arith.addf %396, %397 : vector<8x4xf32>
    %399 = vector.extract_strided_slice %395 {offsets = [0, 8], sizes = [8, 4], strides = [1, 1]} : vector<8x16xf32> to vector<8x4xf32>
    %400 = arith.addf %398, %399 : vector<8x4xf32>
    %401 = vector.extract_strided_slice %395 {offsets = [0, 12], sizes = [8, 4], strides = [1, 1]} : vector<8x16xf32> to vector<8x4xf32>
    %402 = arith.addf %400, %401 : vector<8x4xf32>
    %403 = arith.addf %303, %353 : vector<8x4xf32>
    %cst_95 = arith.constant 3.000000e+00 : f32
    %404 = vector.broadcast %cst_95 : f32 to vector<8x4xf32>
    %405 = arith.mulf %404, %403 : vector<8x4xf32>
    %406 = arith.addf %254, %405 : vector<8x4xf32>
    %407 = arith.addf %406, %402 : vector<8x4xf32>
    %cst_96 = arith.constant 1.250000e-01 : f32
    %408 = vector.broadcast %cst_96 : f32 to vector<8x4xf32>
    %409 = arith.mulf %407, %408 : vector<8x4xf32>
    %410 = arith.addf %208, %409 : vector<8x4xf32>
    %c3_97 = arith.constant 3 : index
    %c0_98 = arith.constant 0 : index
    %c0_99 = arith.constant 0 : index
    %c0_100 = arith.constant 0 : index
    %411 = vector.load %arg2[%c3_97, %c0_98, %c0_99, %c0_100] : memref<8x4x1x32xf32, #tpu.memory_space<vmem>>, vector<1x1x1x32xf32>
    %412 = vector.shape_cast %411 : vector<1x1x1x32xf32> to vector<1x32xf32>
    %c3_101 = arith.constant 3 : index
    %c0_102 = arith.constant 0 : index
    %c0_103 = arith.constant 0 : index
    %c0_104 = arith.constant 0 : index
    %413 = vector.load %arg3[%c3_101, %c0_102, %c0_103, %c0_104] : memref<8x4x8x16xf32, #tpu.memory_space<vmem>>, vector<1x1x8x16xf32>
    %414 = vector.shape_cast %413 : vector<1x1x8x16xf32> to vector<8x16xf32>
    %415 = vector.broadcast %412 : vector<1x32xf32> to vector<8x32xf32>
    %416 = arith.addf %415, %0 : vector<8x32xf32>
    %417 = vector.extract_strided_slice %410 {offsets = [0, 0], sizes = [8, 1], strides = [1, 1]} : vector<8x4xf32> to vector<8x1xf32>
    %418 = vector.extract_strided_slice %1 {offsets = [0, 0], sizes = [1, 32], strides = [1, 1]} : vector<4x32xf32> to vector<1x32xf32>
    %419 = vector.broadcast %417 : vector<8x1xf32> to vector<8x32xf32>
    %420 = vector.broadcast %418 : vector<1x32xf32> to vector<8x32xf32>
    %421 = arith.mulf %419, %420 : vector<8x32xf32>
    %422 = arith.addf %416, %421 : vector<8x32xf32>
    %423 = vector.extract_strided_slice %410 {offsets = [0, 1], sizes = [8, 1], strides = [1, 1]} : vector<8x4xf32> to vector<8x1xf32>
    %424 = vector.extract_strided_slice %1 {offsets = [1, 0], sizes = [1, 32], strides = [1, 1]} : vector<4x32xf32> to vector<1x32xf32>
    %425 = vector.broadcast %423 : vector<8x1xf32> to vector<8x32xf32>
    %426 = vector.broadcast %424 : vector<1x32xf32> to vector<8x32xf32>
    %427 = arith.mulf %425, %426 : vector<8x32xf32>
    %428 = arith.addf %422, %427 : vector<8x32xf32>
    %429 = vector.extract_strided_slice %410 {offsets = [0, 2], sizes = [8, 1], strides = [1, 1]} : vector<8x4xf32> to vector<8x1xf32>
    %430 = vector.extract_strided_slice %1 {offsets = [2, 0], sizes = [1, 32], strides = [1, 1]} : vector<4x32xf32> to vector<1x32xf32>
    %431 = vector.broadcast %429 : vector<8x1xf32> to vector<8x32xf32>
    %432 = vector.broadcast %430 : vector<1x32xf32> to vector<8x32xf32>
    %433 = arith.mulf %431, %432 : vector<8x32xf32>
    %434 = arith.addf %428, %433 : vector<8x32xf32>
    %435 = vector.extract_strided_slice %410 {offsets = [0, 3], sizes = [8, 1], strides = [1, 1]} : vector<8x4xf32> to vector<8x1xf32>
    %436 = vector.extract_strided_slice %1 {offsets = [3, 0], sizes = [1, 32], strides = [1, 1]} : vector<4x32xf32> to vector<1x32xf32>
    %437 = vector.broadcast %435 : vector<8x1xf32> to vector<8x32xf32>
    %438 = vector.broadcast %436 : vector<1x32xf32> to vector<8x32xf32>
    %439 = arith.mulf %437, %438 : vector<8x32xf32>
    %440 = arith.addf %434, %439 : vector<8x32xf32>
    %441 = math.tanh %440 : vector<8x32xf32>
    %cst_105 = arith.constant dense<0.000000e+00> : vector<8x32xf32>
    %442 = tpu.matmul %441, %2, %cst_105 {dimension_numbers = #tpu.dot_dimension_numbers<[1], [0], [0], [1], [0, 0, 1, 1], [], []>} : vector<8x32xf32>, vector<32x32xf32>, vector<8x32xf32> -> vector<8x32xf32>
    %443 = vector.broadcast %3 : vector<1x32xf32> to vector<8x32xf32>
    %444 = arith.addf %442, %443 : vector<8x32xf32>
    %445 = math.tanh %444 : vector<8x32xf32>
    %cst_106 = arith.constant dense<0.000000e+00> : vector<8x16xf32>
    %446 = tpu.matmul %445, %4, %cst_106 {dimension_numbers = #tpu.dot_dimension_numbers<[1], [0], [0], [1], [0, 0, 1, 1], [], []>} : vector<8x32xf32>, vector<32x16xf32>, vector<8x16xf32> -> vector<8x16xf32>
    %447 = vector.broadcast %5 : vector<1x16xf32> to vector<8x16xf32>
    %448 = arith.addf %446, %447 : vector<8x16xf32>
    %449 = arith.mulf %448, %414 : vector<8x16xf32>
    %450 = vector.extract_strided_slice %449 {offsets = [0, 0], sizes = [8, 4], strides = [1, 1]} : vector<8x16xf32> to vector<8x4xf32>
    %451 = vector.extract_strided_slice %449 {offsets = [0, 4], sizes = [8, 4], strides = [1, 1]} : vector<8x16xf32> to vector<8x4xf32>
    %452 = arith.addf %450, %451 : vector<8x4xf32>
    %453 = vector.extract_strided_slice %449 {offsets = [0, 8], sizes = [8, 4], strides = [1, 1]} : vector<8x16xf32> to vector<8x4xf32>
    %454 = arith.addf %452, %453 : vector<8x4xf32>
    %455 = vector.extract_strided_slice %449 {offsets = [0, 12], sizes = [8, 4], strides = [1, 1]} : vector<8x16xf32> to vector<8x4xf32>
    %456 = arith.addf %454, %455 : vector<8x4xf32>
    %cst_107 = arith.constant 0.333333343 : f32
    %457 = vector.broadcast %cst_107 : f32 to vector<8x4xf32>
    %458 = arith.mulf %456, %457 : vector<8x4xf32>
    %459 = arith.addf %410, %458 : vector<8x4xf32>
    %c3_108 = arith.constant 3 : index
    %c1_109 = arith.constant 1 : index
    %c0_110 = arith.constant 0 : index
    %c0_111 = arith.constant 0 : index
    %460 = vector.load %arg2[%c3_108, %c1_109, %c0_110, %c0_111] : memref<8x4x1x32xf32, #tpu.memory_space<vmem>>, vector<1x1x1x32xf32>
    %461 = vector.shape_cast %460 : vector<1x1x1x32xf32> to vector<1x32xf32>
    %c3_112 = arith.constant 3 : index
    %c1_113 = arith.constant 1 : index
    %c0_114 = arith.constant 0 : index
    %c0_115 = arith.constant 0 : index
    %462 = vector.load %arg3[%c3_112, %c1_113, %c0_114, %c0_115] : memref<8x4x8x16xf32, #tpu.memory_space<vmem>>, vector<1x1x8x16xf32>
    %463 = vector.shape_cast %462 : vector<1x1x8x16xf32> to vector<8x16xf32>
    %464 = vector.broadcast %461 : vector<1x32xf32> to vector<8x32xf32>
    %465 = arith.addf %464, %0 : vector<8x32xf32>
    %466 = vector.extract_strided_slice %459 {offsets = [0, 0], sizes = [8, 1], strides = [1, 1]} : vector<8x4xf32> to vector<8x1xf32>
    %467 = vector.extract_strided_slice %1 {offsets = [0, 0], sizes = [1, 32], strides = [1, 1]} : vector<4x32xf32> to vector<1x32xf32>
    %468 = vector.broadcast %466 : vector<8x1xf32> to vector<8x32xf32>
    %469 = vector.broadcast %467 : vector<1x32xf32> to vector<8x32xf32>
    %470 = arith.mulf %468, %469 : vector<8x32xf32>
    %471 = arith.addf %465, %470 : vector<8x32xf32>
    %472 = vector.extract_strided_slice %459 {offsets = [0, 1], sizes = [8, 1], strides = [1, 1]} : vector<8x4xf32> to vector<8x1xf32>
    %473 = vector.extract_strided_slice %1 {offsets = [1, 0], sizes = [1, 32], strides = [1, 1]} : vector<4x32xf32> to vector<1x32xf32>
    %474 = vector.broadcast %472 : vector<8x1xf32> to vector<8x32xf32>
    %475 = vector.broadcast %473 : vector<1x32xf32> to vector<8x32xf32>
    %476 = arith.mulf %474, %475 : vector<8x32xf32>
    %477 = arith.addf %471, %476 : vector<8x32xf32>
    %478 = vector.extract_strided_slice %459 {offsets = [0, 2], sizes = [8, 1], strides = [1, 1]} : vector<8x4xf32> to vector<8x1xf32>
    %479 = vector.extract_strided_slice %1 {offsets = [2, 0], sizes = [1, 32], strides = [1, 1]} : vector<4x32xf32> to vector<1x32xf32>
    %480 = vector.broadcast %478 : vector<8x1xf32> to vector<8x32xf32>
    %481 = vector.broadcast %479 : vector<1x32xf32> to vector<8x32xf32>
    %482 = arith.mulf %480, %481 : vector<8x32xf32>
    %483 = arith.addf %477, %482 : vector<8x32xf32>
    %484 = vector.extract_strided_slice %459 {offsets = [0, 3], sizes = [8, 1], strides = [1, 1]} : vector<8x4xf32> to vector<8x1xf32>
    %485 = vector.extract_strided_slice %1 {offsets = [3, 0], sizes = [1, 32], strides = [1, 1]} : vector<4x32xf32> to vector<1x32xf32>
    %486 = vector.broadcast %484 : vector<8x1xf32> to vector<8x32xf32>
    %487 = vector.broadcast %485 : vector<1x32xf32> to vector<8x32xf32>
    %488 = arith.mulf %486, %487 : vector<8x32xf32>
    %489 = arith.addf %483, %488 : vector<8x32xf32>
    %490 = math.tanh %489 : vector<8x32xf32>
    %cst_116 = arith.constant dense<0.000000e+00> : vector<8x32xf32>
    %491 = tpu.matmul %490, %2, %cst_116 {dimension_numbers = #tpu.dot_dimension_numbers<[1], [0], [0], [1], [0, 0, 1, 1], [], []>} : vector<8x32xf32>, vector<32x32xf32>, vector<8x32xf32> -> vector<8x32xf32>
    %492 = vector.broadcast %3 : vector<1x32xf32> to vector<8x32xf32>
    %493 = arith.addf %491, %492 : vector<8x32xf32>
    %494 = math.tanh %493 : vector<8x32xf32>
    %cst_117 = arith.constant dense<0.000000e+00> : vector<8x16xf32>
    %495 = tpu.matmul %494, %4, %cst_117 {dimension_numbers = #tpu.dot_dimension_numbers<[1], [0], [0], [1], [0, 0, 1, 1], [], []>} : vector<8x32xf32>, vector<32x16xf32>, vector<8x16xf32> -> vector<8x16xf32>
    %496 = vector.broadcast %5 : vector<1x16xf32> to vector<8x16xf32>
    %497 = arith.addf %495, %496 : vector<8x16xf32>
    %498 = arith.mulf %497, %463 : vector<8x16xf32>
    %499 = vector.extract_strided_slice %498 {offsets = [0, 0], sizes = [8, 4], strides = [1, 1]} : vector<8x16xf32> to vector<8x4xf32>
    %500 = vector.extract_strided_slice %498 {offsets = [0, 4], sizes = [8, 4], strides = [1, 1]} : vector<8x16xf32> to vector<8x4xf32>
    %501 = arith.addf %499, %500 : vector<8x4xf32>
    %502 = vector.extract_strided_slice %498 {offsets = [0, 8], sizes = [8, 4], strides = [1, 1]} : vector<8x16xf32> to vector<8x4xf32>
    %503 = arith.addf %501, %502 : vector<8x4xf32>
    %504 = vector.extract_strided_slice %498 {offsets = [0, 12], sizes = [8, 4], strides = [1, 1]} : vector<8x16xf32> to vector<8x4xf32>
    %505 = arith.addf %503, %504 : vector<8x4xf32>
    %cst_118 = arith.constant 0.333333343 : f32
    %506 = vector.broadcast %cst_118 : f32 to vector<8x4xf32>
    %507 = arith.mulf %456, %506 : vector<8x4xf32>
    %508 = arith.subf %505, %507 : vector<8x4xf32>
    %509 = arith.addf %410, %508 : vector<8x4xf32>
    %c3_119 = arith.constant 3 : index
    %c2_120 = arith.constant 2 : index
    %c0_121 = arith.constant 0 : index
    %c0_122 = arith.constant 0 : index
    %510 = vector.load %arg2[%c3_119, %c2_120, %c0_121, %c0_122] : memref<8x4x1x32xf32, #tpu.memory_space<vmem>>, vector<1x1x1x32xf32>
    %511 = vector.shape_cast %510 : vector<1x1x1x32xf32> to vector<1x32xf32>
    %c3_123 = arith.constant 3 : index
    %c2_124 = arith.constant 2 : index
    %c0_125 = arith.constant 0 : index
    %c0_126 = arith.constant 0 : index
    %512 = vector.load %arg3[%c3_123, %c2_124, %c0_125, %c0_126] : memref<8x4x8x16xf32, #tpu.memory_space<vmem>>, vector<1x1x8x16xf32>
    %513 = vector.shape_cast %512 : vector<1x1x8x16xf32> to vector<8x16xf32>
    %514 = vector.broadcast %511 : vector<1x32xf32> to vector<8x32xf32>
    %515 = arith.addf %514, %0 : vector<8x32xf32>
    %516 = vector.extract_strided_slice %509 {offsets = [0, 0], sizes = [8, 1], strides = [1, 1]} : vector<8x4xf32> to vector<8x1xf32>
    %517 = vector.extract_strided_slice %1 {offsets = [0, 0], sizes = [1, 32], strides = [1, 1]} : vector<4x32xf32> to vector<1x32xf32>
    %518 = vector.broadcast %516 : vector<8x1xf32> to vector<8x32xf32>
    %519 = vector.broadcast %517 : vector<1x32xf32> to vector<8x32xf32>
    %520 = arith.mulf %518, %519 : vector<8x32xf32>
    %521 = arith.addf %515, %520 : vector<8x32xf32>
    %522 = vector.extract_strided_slice %509 {offsets = [0, 1], sizes = [8, 1], strides = [1, 1]} : vector<8x4xf32> to vector<8x1xf32>
    %523 = vector.extract_strided_slice %1 {offsets = [1, 0], sizes = [1, 32], strides = [1, 1]} : vector<4x32xf32> to vector<1x32xf32>
    %524 = vector.broadcast %522 : vector<8x1xf32> to vector<8x32xf32>
    %525 = vector.broadcast %523 : vector<1x32xf32> to vector<8x32xf32>
    %526 = arith.mulf %524, %525 : vector<8x32xf32>
    %527 = arith.addf %521, %526 : vector<8x32xf32>
    %528 = vector.extract_strided_slice %509 {offsets = [0, 2], sizes = [8, 1], strides = [1, 1]} : vector<8x4xf32> to vector<8x1xf32>
    %529 = vector.extract_strided_slice %1 {offsets = [2, 0], sizes = [1, 32], strides = [1, 1]} : vector<4x32xf32> to vector<1x32xf32>
    %530 = vector.broadcast %528 : vector<8x1xf32> to vector<8x32xf32>
    %531 = vector.broadcast %529 : vector<1x32xf32> to vector<8x32xf32>
    %532 = arith.mulf %530, %531 : vector<8x32xf32>
    %533 = arith.addf %527, %532 : vector<8x32xf32>
    %534 = vector.extract_strided_slice %509 {offsets = [0, 3], sizes = [8, 1], strides = [1, 1]} : vector<8x4xf32> to vector<8x1xf32>
    %535 = vector.extract_strided_slice %1 {offsets = [3, 0], sizes = [1, 32], strides = [1, 1]} : vector<4x32xf32> to vector<1x32xf32>
    %536 = vector.broadcast %534 : vector<8x1xf32> to vector<8x32xf32>
    %537 = vector.broadcast %535 : vector<1x32xf32> to vector<8x32xf32>
    %538 = arith.mulf %536, %537 : vector<8x32xf32>
    %539 = arith.addf %533, %538 : vector<8x32xf32>
    %540 = math.tanh %539 : vector<8x32xf32>
    %cst_127 = arith.constant dense<0.000000e+00> : vector<8x32xf32>
    %541 = tpu.matmul %540, %2, %cst_127 {dimension_numbers = #tpu.dot_dimension_numbers<[1], [0], [0], [1], [0, 0, 1, 1], [], []>} : vector<8x32xf32>, vector<32x32xf32>, vector<8x32xf32> -> vector<8x32xf32>
    %542 = vector.broadcast %3 : vector<1x32xf32> to vector<8x32xf32>
    %543 = arith.addf %541, %542 : vector<8x32xf32>
    %544 = math.tanh %543 : vector<8x32xf32>
    %cst_128 = arith.constant dense<0.000000e+00> : vector<8x16xf32>
    %545 = tpu.matmul %544, %4, %cst_128 {dimension_numbers = #tpu.dot_dimension_numbers<[1], [0], [0], [1], [0, 0, 1, 1], [], []>} : vector<8x32xf32>, vector<32x16xf32>, vector<8x16xf32> -> vector<8x16xf32>
    %546 = vector.broadcast %5 : vector<1x16xf32> to vector<8x16xf32>
    %547 = arith.addf %545, %546 : vector<8x16xf32>
    %548 = arith.mulf %547, %513 : vector<8x16xf32>
    %549 = vector.extract_strided_slice %548 {offsets = [0, 0], sizes = [8, 4], strides = [1, 1]} : vector<8x16xf32> to vector<8x4xf32>
    %550 = vector.extract_strided_slice %548 {offsets = [0, 4], sizes = [8, 4], strides = [1, 1]} : vector<8x16xf32> to vector<8x4xf32>
    %551 = arith.addf %549, %550 : vector<8x4xf32>
    %552 = vector.extract_strided_slice %548 {offsets = [0, 8], sizes = [8, 4], strides = [1, 1]} : vector<8x16xf32> to vector<8x4xf32>
    %553 = arith.addf %551, %552 : vector<8x4xf32>
    %554 = vector.extract_strided_slice %548 {offsets = [0, 12], sizes = [8, 4], strides = [1, 1]} : vector<8x16xf32> to vector<8x4xf32>
    %555 = arith.addf %553, %554 : vector<8x4xf32>
    %556 = arith.subf %456, %505 : vector<8x4xf32>
    %557 = arith.addf %556, %555 : vector<8x4xf32>
    %558 = arith.addf %410, %557 : vector<8x4xf32>
    %c3_129 = arith.constant 3 : index
    %c3_130 = arith.constant 3 : index
    %c0_131 = arith.constant 0 : index
    %c0_132 = arith.constant 0 : index
    %559 = vector.load %arg2[%c3_129, %c3_130, %c0_131, %c0_132] : memref<8x4x1x32xf32, #tpu.memory_space<vmem>>, vector<1x1x1x32xf32>
    %560 = vector.shape_cast %559 : vector<1x1x1x32xf32> to vector<1x32xf32>
    %c3_133 = arith.constant 3 : index
    %c3_134 = arith.constant 3 : index
    %c0_135 = arith.constant 0 : index
    %c0_136 = arith.constant 0 : index
    %561 = vector.load %arg3[%c3_133, %c3_134, %c0_135, %c0_136] : memref<8x4x8x16xf32, #tpu.memory_space<vmem>>, vector<1x1x8x16xf32>
    %562 = vector.shape_cast %561 : vector<1x1x8x16xf32> to vector<8x16xf32>
    %563 = vector.broadcast %560 : vector<1x32xf32> to vector<8x32xf32>
    %564 = arith.addf %563, %0 : vector<8x32xf32>
    %565 = vector.extract_strided_slice %558 {offsets = [0, 0], sizes = [8, 1], strides = [1, 1]} : vector<8x4xf32> to vector<8x1xf32>
    %566 = vector.extract_strided_slice %1 {offsets = [0, 0], sizes = [1, 32], strides = [1, 1]} : vector<4x32xf32> to vector<1x32xf32>
    %567 = vector.broadcast %565 : vector<8x1xf32> to vector<8x32xf32>
    %568 = vector.broadcast %566 : vector<1x32xf32> to vector<8x32xf32>
    %569 = arith.mulf %567, %568 : vector<8x32xf32>
    %570 = arith.addf %564, %569 : vector<8x32xf32>
    %571 = vector.extract_strided_slice %558 {offsets = [0, 1], sizes = [8, 1], strides = [1, 1]} : vector<8x4xf32> to vector<8x1xf32>
    %572 = vector.extract_strided_slice %1 {offsets = [1, 0], sizes = [1, 32], strides = [1, 1]} : vector<4x32xf32> to vector<1x32xf32>
    %573 = vector.broadcast %571 : vector<8x1xf32> to vector<8x32xf32>
    %574 = vector.broadcast %572 : vector<1x32xf32> to vector<8x32xf32>
    %575 = arith.mulf %573, %574 : vector<8x32xf32>
    %576 = arith.addf %570, %575 : vector<8x32xf32>
    %577 = vector.extract_strided_slice %558 {offsets = [0, 2], sizes = [8, 1], strides = [1, 1]} : vector<8x4xf32> to vector<8x1xf32>
    %578 = vector.extract_strided_slice %1 {offsets = [2, 0], sizes = [1, 32], strides = [1, 1]} : vector<4x32xf32> to vector<1x32xf32>
    %579 = vector.broadcast %577 : vector<8x1xf32> to vector<8x32xf32>
    %580 = vector.broadcast %578 : vector<1x32xf32> to vector<8x32xf32>
    %581 = arith.mulf %579, %580 : vector<8x32xf32>
    %582 = arith.addf %576, %581 : vector<8x32xf32>
    %583 = vector.extract_strided_slice %558 {offsets = [0, 3], sizes = [8, 1], strides = [1, 1]} : vector<8x4xf32> to vector<8x1xf32>
    %584 = vector.extract_strided_slice %1 {offsets = [3, 0], sizes = [1, 32], strides = [1, 1]} : vector<4x32xf32> to vector<1x32xf32>
    %585 = vector.broadcast %583 : vector<8x1xf32> to vector<8x32xf32>
    %586 = vector.broadcast %584 : vector<1x32xf32> to vector<8x32xf32>
    %587 = arith.mulf %585, %586 : vector<8x32xf32>
    %588 = arith.addf %582, %587 : vector<8x32xf32>
    %589 = math.tanh %588 : vector<8x32xf32>
    %cst_137 = arith.constant dense<0.000000e+00> : vector<8x32xf32>
    %590 = tpu.matmul %589, %2, %cst_137 {dimension_numbers = #tpu.dot_dimension_numbers<[1], [0], [0], [1], [0, 0, 1, 1], [], []>} : vector<8x32xf32>, vector<32x32xf32>, vector<8x32xf32> -> vector<8x32xf32>
    %591 = vector.broadcast %3 : vector<1x32xf32> to vector<8x32xf32>
    %592 = arith.addf %590, %591 : vector<8x32xf32>
    %593 = math.tanh %592 : vector<8x32xf32>
    %cst_138 = arith.constant dense<0.000000e+00> : vector<8x16xf32>
    %594 = tpu.matmul %593, %4, %cst_138 {dimension_numbers = #tpu.dot_dimension_numbers<[1], [0], [0], [1], [0, 0, 1, 1], [], []>} : vector<8x32xf32>, vector<32x16xf32>, vector<8x16xf32> -> vector<8x16xf32>
    %595 = vector.broadcast %5 : vector<1x16xf32> to vector<8x16xf32>
    %596 = arith.addf %594, %595 : vector<8x16xf32>
    %597 = arith.mulf %596, %562 : vector<8x16xf32>
    %598 = vector.extract_strided_slice %597 {offsets = [0, 0], sizes = [8, 4], strides = [1, 1]} : vector<8x16xf32> to vector<8x4xf32>
    %599 = vector.extract_strided_slice %597 {offsets = [0, 4], sizes = [8, 4], strides = [1, 1]} : vector<8x16xf32> to vector<8x4xf32>
    %600 = arith.addf %598, %599 : vector<8x4xf32>
    %601 = vector.extract_strided_slice %597 {offsets = [0, 8], sizes = [8, 4], strides = [1, 1]} : vector<8x16xf32> to vector<8x4xf32>
    %602 = arith.addf %600, %601 : vector<8x4xf32>
    %603 = vector.extract_strided_slice %597 {offsets = [0, 12], sizes = [8, 4], strides = [1, 1]} : vector<8x16xf32> to vector<8x4xf32>
    %604 = arith.addf %602, %603 : vector<8x4xf32>
    %605 = arith.addf %505, %555 : vector<8x4xf32>
    %cst_139 = arith.constant 3.000000e+00 : f32
    %606 = vector.broadcast %cst_139 : f32 to vector<8x4xf32>
    %607 = arith.mulf %606, %605 : vector<8x4xf32>
    %608 = arith.addf %456, %607 : vector<8x4xf32>
    %609 = arith.addf %608, %604 : vector<8x4xf32>
    %cst_140 = arith.constant 1.250000e-01 : f32
    %610 = vector.broadcast %cst_140 : f32 to vector<8x4xf32>
    %611 = arith.mulf %609, %610 : vector<8x4xf32>
    %612 = arith.addf %410, %611 : vector<8x4xf32>
    %c4 = arith.constant 4 : index
    %c0_141 = arith.constant 0 : index
    %c0_142 = arith.constant 0 : index
    %c0_143 = arith.constant 0 : index
    %613 = vector.load %arg2[%c4, %c0_141, %c0_142, %c0_143] : memref<8x4x1x32xf32, #tpu.memory_space<vmem>>, vector<1x1x1x32xf32>
    %614 = vector.shape_cast %613 : vector<1x1x1x32xf32> to vector<1x32xf32>
    %c4_144 = arith.constant 4 : index
    %c0_145 = arith.constant 0 : index
    %c0_146 = arith.constant 0 : index
    %c0_147 = arith.constant 0 : index
    %615 = vector.load %arg3[%c4_144, %c0_145, %c0_146, %c0_147] : memref<8x4x8x16xf32, #tpu.memory_space<vmem>>, vector<1x1x8x16xf32>
    %616 = vector.shape_cast %615 : vector<1x1x8x16xf32> to vector<8x16xf32>
    %617 = vector.broadcast %614 : vector<1x32xf32> to vector<8x32xf32>
    %618 = arith.addf %617, %0 : vector<8x32xf32>
    %619 = vector.extract_strided_slice %612 {offsets = [0, 0], sizes = [8, 1], strides = [1, 1]} : vector<8x4xf32> to vector<8x1xf32>
    %620 = vector.extract_strided_slice %1 {offsets = [0, 0], sizes = [1, 32], strides = [1, 1]} : vector<4x32xf32> to vector<1x32xf32>
    %621 = vector.broadcast %619 : vector<8x1xf32> to vector<8x32xf32>
    %622 = vector.broadcast %620 : vector<1x32xf32> to vector<8x32xf32>
    %623 = arith.mulf %621, %622 : vector<8x32xf32>
    %624 = arith.addf %618, %623 : vector<8x32xf32>
    %625 = vector.extract_strided_slice %612 {offsets = [0, 1], sizes = [8, 1], strides = [1, 1]} : vector<8x4xf32> to vector<8x1xf32>
    %626 = vector.extract_strided_slice %1 {offsets = [1, 0], sizes = [1, 32], strides = [1, 1]} : vector<4x32xf32> to vector<1x32xf32>
    %627 = vector.broadcast %625 : vector<8x1xf32> to vector<8x32xf32>
    %628 = vector.broadcast %626 : vector<1x32xf32> to vector<8x32xf32>
    %629 = arith.mulf %627, %628 : vector<8x32xf32>
    %630 = arith.addf %624, %629 : vector<8x32xf32>
    %631 = vector.extract_strided_slice %612 {offsets = [0, 2], sizes = [8, 1], strides = [1, 1]} : vector<8x4xf32> to vector<8x1xf32>
    %632 = vector.extract_strided_slice %1 {offsets = [2, 0], sizes = [1, 32], strides = [1, 1]} : vector<4x32xf32> to vector<1x32xf32>
    %633 = vector.broadcast %631 : vector<8x1xf32> to vector<8x32xf32>
    %634 = vector.broadcast %632 : vector<1x32xf32> to vector<8x32xf32>
    %635 = arith.mulf %633, %634 : vector<8x32xf32>
    %636 = arith.addf %630, %635 : vector<8x32xf32>
    %637 = vector.extract_strided_slice %612 {offsets = [0, 3], sizes = [8, 1], strides = [1, 1]} : vector<8x4xf32> to vector<8x1xf32>
    %638 = vector.extract_strided_slice %1 {offsets = [3, 0], sizes = [1, 32], strides = [1, 1]} : vector<4x32xf32> to vector<1x32xf32>
    %639 = vector.broadcast %637 : vector<8x1xf32> to vector<8x32xf32>
    %640 = vector.broadcast %638 : vector<1x32xf32> to vector<8x32xf32>
    %641 = arith.mulf %639, %640 : vector<8x32xf32>
    %642 = arith.addf %636, %641 : vector<8x32xf32>
    %643 = math.tanh %642 : vector<8x32xf32>
    %cst_148 = arith.constant dense<0.000000e+00> : vector<8x32xf32>
    %644 = tpu.matmul %643, %2, %cst_148 {dimension_numbers = #tpu.dot_dimension_numbers<[1], [0], [0], [1], [0, 0, 1, 1], [], []>} : vector<8x32xf32>, vector<32x32xf32>, vector<8x32xf32> -> vector<8x32xf32>
    %645 = vector.broadcast %3 : vector<1x32xf32> to vector<8x32xf32>
    %646 = arith.addf %644, %645 : vector<8x32xf32>
    %647 = math.tanh %646 : vector<8x32xf32>
    %cst_149 = arith.constant dense<0.000000e+00> : vector<8x16xf32>
    %648 = tpu.matmul %647, %4, %cst_149 {dimension_numbers = #tpu.dot_dimension_numbers<[1], [0], [0], [1], [0, 0, 1, 1], [], []>} : vector<8x32xf32>, vector<32x16xf32>, vector<8x16xf32> -> vector<8x16xf32>
    %649 = vector.broadcast %5 : vector<1x16xf32> to vector<8x16xf32>
    %650 = arith.addf %648, %649 : vector<8x16xf32>
    %651 = arith.mulf %650, %616 : vector<8x16xf32>
    %652 = vector.extract_strided_slice %651 {offsets = [0, 0], sizes = [8, 4], strides = [1, 1]} : vector<8x16xf32> to vector<8x4xf32>
    %653 = vector.extract_strided_slice %651 {offsets = [0, 4], sizes = [8, 4], strides = [1, 1]} : vector<8x16xf32> to vector<8x4xf32>
    %654 = arith.addf %652, %653 : vector<8x4xf32>
    %655 = vector.extract_strided_slice %651 {offsets = [0, 8], sizes = [8, 4], strides = [1, 1]} : vector<8x16xf32> to vector<8x4xf32>
    %656 = arith.addf %654, %655 : vector<8x4xf32>
    %657 = vector.extract_strided_slice %651 {offsets = [0, 12], sizes = [8, 4], strides = [1, 1]} : vector<8x16xf32> to vector<8x4xf32>
    %658 = arith.addf %656, %657 : vector<8x4xf32>
    %cst_150 = arith.constant 0.333333343 : f32
    %659 = vector.broadcast %cst_150 : f32 to vector<8x4xf32>
    %660 = arith.mulf %658, %659 : vector<8x4xf32>
    %661 = arith.addf %612, %660 : vector<8x4xf32>
    %c4_151 = arith.constant 4 : index
    %c1_152 = arith.constant 1 : index
    %c0_153 = arith.constant 0 : index
    %c0_154 = arith.constant 0 : index
    %662 = vector.load %arg2[%c4_151, %c1_152, %c0_153, %c0_154] : memref<8x4x1x32xf32, #tpu.memory_space<vmem>>, vector<1x1x1x32xf32>
    %663 = vector.shape_cast %662 : vector<1x1x1x32xf32> to vector<1x32xf32>
    %c4_155 = arith.constant 4 : index
    %c1_156 = arith.constant 1 : index
    %c0_157 = arith.constant 0 : index
    %c0_158 = arith.constant 0 : index
    %664 = vector.load %arg3[%c4_155, %c1_156, %c0_157, %c0_158] : memref<8x4x8x16xf32, #tpu.memory_space<vmem>>, vector<1x1x8x16xf32>
    %665 = vector.shape_cast %664 : vector<1x1x8x16xf32> to vector<8x16xf32>
    %666 = vector.broadcast %663 : vector<1x32xf32> to vector<8x32xf32>
    %667 = arith.addf %666, %0 : vector<8x32xf32>
    %668 = vector.extract_strided_slice %661 {offsets = [0, 0], sizes = [8, 1], strides = [1, 1]} : vector<8x4xf32> to vector<8x1xf32>
    %669 = vector.extract_strided_slice %1 {offsets = [0, 0], sizes = [1, 32], strides = [1, 1]} : vector<4x32xf32> to vector<1x32xf32>
    %670 = vector.broadcast %668 : vector<8x1xf32> to vector<8x32xf32>
    %671 = vector.broadcast %669 : vector<1x32xf32> to vector<8x32xf32>
    %672 = arith.mulf %670, %671 : vector<8x32xf32>
    %673 = arith.addf %667, %672 : vector<8x32xf32>
    %674 = vector.extract_strided_slice %661 {offsets = [0, 1], sizes = [8, 1], strides = [1, 1]} : vector<8x4xf32> to vector<8x1xf32>
    %675 = vector.extract_strided_slice %1 {offsets = [1, 0], sizes = [1, 32], strides = [1, 1]} : vector<4x32xf32> to vector<1x32xf32>
    %676 = vector.broadcast %674 : vector<8x1xf32> to vector<8x32xf32>
    %677 = vector.broadcast %675 : vector<1x32xf32> to vector<8x32xf32>
    %678 = arith.mulf %676, %677 : vector<8x32xf32>
    %679 = arith.addf %673, %678 : vector<8x32xf32>
    %680 = vector.extract_strided_slice %661 {offsets = [0, 2], sizes = [8, 1], strides = [1, 1]} : vector<8x4xf32> to vector<8x1xf32>
    %681 = vector.extract_strided_slice %1 {offsets = [2, 0], sizes = [1, 32], strides = [1, 1]} : vector<4x32xf32> to vector<1x32xf32>
    %682 = vector.broadcast %680 : vector<8x1xf32> to vector<8x32xf32>
    %683 = vector.broadcast %681 : vector<1x32xf32> to vector<8x32xf32>
    %684 = arith.mulf %682, %683 : vector<8x32xf32>
    %685 = arith.addf %679, %684 : vector<8x32xf32>
    %686 = vector.extract_strided_slice %661 {offsets = [0, 3], sizes = [8, 1], strides = [1, 1]} : vector<8x4xf32> to vector<8x1xf32>
    %687 = vector.extract_strided_slice %1 {offsets = [3, 0], sizes = [1, 32], strides = [1, 1]} : vector<4x32xf32> to vector<1x32xf32>
    %688 = vector.broadcast %686 : vector<8x1xf32> to vector<8x32xf32>
    %689 = vector.broadcast %687 : vector<1x32xf32> to vector<8x32xf32>
    %690 = arith.mulf %688, %689 : vector<8x32xf32>
    %691 = arith.addf %685, %690 : vector<8x32xf32>
    %692 = math.tanh %691 : vector<8x32xf32>
    %cst_159 = arith.constant dense<0.000000e+00> : vector<8x32xf32>
    %693 = tpu.matmul %692, %2, %cst_159 {dimension_numbers = #tpu.dot_dimension_numbers<[1], [0], [0], [1], [0, 0, 1, 1], [], []>} : vector<8x32xf32>, vector<32x32xf32>, vector<8x32xf32> -> vector<8x32xf32>
    %694 = vector.broadcast %3 : vector<1x32xf32> to vector<8x32xf32>
    %695 = arith.addf %693, %694 : vector<8x32xf32>
    %696 = math.tanh %695 : vector<8x32xf32>
    %cst_160 = arith.constant dense<0.000000e+00> : vector<8x16xf32>
    %697 = tpu.matmul %696, %4, %cst_160 {dimension_numbers = #tpu.dot_dimension_numbers<[1], [0], [0], [1], [0, 0, 1, 1], [], []>} : vector<8x32xf32>, vector<32x16xf32>, vector<8x16xf32> -> vector<8x16xf32>
    %698 = vector.broadcast %5 : vector<1x16xf32> to vector<8x16xf32>
    %699 = arith.addf %697, %698 : vector<8x16xf32>
    %700 = arith.mulf %699, %665 : vector<8x16xf32>
    %701 = vector.extract_strided_slice %700 {offsets = [0, 0], sizes = [8, 4], strides = [1, 1]} : vector<8x16xf32> to vector<8x4xf32>
    %702 = vector.extract_strided_slice %700 {offsets = [0, 4], sizes = [8, 4], strides = [1, 1]} : vector<8x16xf32> to vector<8x4xf32>
    %703 = arith.addf %701, %702 : vector<8x4xf32>
    %704 = vector.extract_strided_slice %700 {offsets = [0, 8], sizes = [8, 4], strides = [1, 1]} : vector<8x16xf32> to vector<8x4xf32>
    %705 = arith.addf %703, %704 : vector<8x4xf32>
    %706 = vector.extract_strided_slice %700 {offsets = [0, 12], sizes = [8, 4], strides = [1, 1]} : vector<8x16xf32> to vector<8x4xf32>
    %707 = arith.addf %705, %706 : vector<8x4xf32>
    %cst_161 = arith.constant 0.333333343 : f32
    %708 = vector.broadcast %cst_161 : f32 to vector<8x4xf32>
    %709 = arith.mulf %658, %708 : vector<8x4xf32>
    %710 = arith.subf %707, %709 : vector<8x4xf32>
    %711 = arith.addf %612, %710 : vector<8x4xf32>
    %c4_162 = arith.constant 4 : index
    %c2_163 = arith.constant 2 : index
    %c0_164 = arith.constant 0 : index
    %c0_165 = arith.constant 0 : index
    %712 = vector.load %arg2[%c4_162, %c2_163, %c0_164, %c0_165] : memref<8x4x1x32xf32, #tpu.memory_space<vmem>>, vector<1x1x1x32xf32>
    %713 = vector.shape_cast %712 : vector<1x1x1x32xf32> to vector<1x32xf32>
    %c4_166 = arith.constant 4 : index
    %c2_167 = arith.constant 2 : index
    %c0_168 = arith.constant 0 : index
    %c0_169 = arith.constant 0 : index
    %714 = vector.load %arg3[%c4_166, %c2_167, %c0_168, %c0_169] : memref<8x4x8x16xf32, #tpu.memory_space<vmem>>, vector<1x1x8x16xf32>
    %715 = vector.shape_cast %714 : vector<1x1x8x16xf32> to vector<8x16xf32>
    %716 = vector.broadcast %713 : vector<1x32xf32> to vector<8x32xf32>
    %717 = arith.addf %716, %0 : vector<8x32xf32>
    %718 = vector.extract_strided_slice %711 {offsets = [0, 0], sizes = [8, 1], strides = [1, 1]} : vector<8x4xf32> to vector<8x1xf32>
    %719 = vector.extract_strided_slice %1 {offsets = [0, 0], sizes = [1, 32], strides = [1, 1]} : vector<4x32xf32> to vector<1x32xf32>
    %720 = vector.broadcast %718 : vector<8x1xf32> to vector<8x32xf32>
    %721 = vector.broadcast %719 : vector<1x32xf32> to vector<8x32xf32>
    %722 = arith.mulf %720, %721 : vector<8x32xf32>
    %723 = arith.addf %717, %722 : vector<8x32xf32>
    %724 = vector.extract_strided_slice %711 {offsets = [0, 1], sizes = [8, 1], strides = [1, 1]} : vector<8x4xf32> to vector<8x1xf32>
    %725 = vector.extract_strided_slice %1 {offsets = [1, 0], sizes = [1, 32], strides = [1, 1]} : vector<4x32xf32> to vector<1x32xf32>
    %726 = vector.broadcast %724 : vector<8x1xf32> to vector<8x32xf32>
    %727 = vector.broadcast %725 : vector<1x32xf32> to vector<8x32xf32>
    %728 = arith.mulf %726, %727 : vector<8x32xf32>
    %729 = arith.addf %723, %728 : vector<8x32xf32>
    %730 = vector.extract_strided_slice %711 {offsets = [0, 2], sizes = [8, 1], strides = [1, 1]} : vector<8x4xf32> to vector<8x1xf32>
    %731 = vector.extract_strided_slice %1 {offsets = [2, 0], sizes = [1, 32], strides = [1, 1]} : vector<4x32xf32> to vector<1x32xf32>
    %732 = vector.broadcast %730 : vector<8x1xf32> to vector<8x32xf32>
    %733 = vector.broadcast %731 : vector<1x32xf32> to vector<8x32xf32>
    %734 = arith.mulf %732, %733 : vector<8x32xf32>
    %735 = arith.addf %729, %734 : vector<8x32xf32>
    %736 = vector.extract_strided_slice %711 {offsets = [0, 3], sizes = [8, 1], strides = [1, 1]} : vector<8x4xf32> to vector<8x1xf32>
    %737 = vector.extract_strided_slice %1 {offsets = [3, 0], sizes = [1, 32], strides = [1, 1]} : vector<4x32xf32> to vector<1x32xf32>
    %738 = vector.broadcast %736 : vector<8x1xf32> to vector<8x32xf32>
    %739 = vector.broadcast %737 : vector<1x32xf32> to vector<8x32xf32>
    %740 = arith.mulf %738, %739 : vector<8x32xf32>
    %741 = arith.addf %735, %740 : vector<8x32xf32>
    %742 = math.tanh %741 : vector<8x32xf32>
    %cst_170 = arith.constant dense<0.000000e+00> : vector<8x32xf32>
    %743 = tpu.matmul %742, %2, %cst_170 {dimension_numbers = #tpu.dot_dimension_numbers<[1], [0], [0], [1], [0, 0, 1, 1], [], []>} : vector<8x32xf32>, vector<32x32xf32>, vector<8x32xf32> -> vector<8x32xf32>
    %744 = vector.broadcast %3 : vector<1x32xf32> to vector<8x32xf32>
    %745 = arith.addf %743, %744 : vector<8x32xf32>
    %746 = math.tanh %745 : vector<8x32xf32>
    %cst_171 = arith.constant dense<0.000000e+00> : vector<8x16xf32>
    %747 = tpu.matmul %746, %4, %cst_171 {dimension_numbers = #tpu.dot_dimension_numbers<[1], [0], [0], [1], [0, 0, 1, 1], [], []>} : vector<8x32xf32>, vector<32x16xf32>, vector<8x16xf32> -> vector<8x16xf32>
    %748 = vector.broadcast %5 : vector<1x16xf32> to vector<8x16xf32>
    %749 = arith.addf %747, %748 : vector<8x16xf32>
    %750 = arith.mulf %749, %715 : vector<8x16xf32>
    %751 = vector.extract_strided_slice %750 {offsets = [0, 0], sizes = [8, 4], strides = [1, 1]} : vector<8x16xf32> to vector<8x4xf32>
    %752 = vector.extract_strided_slice %750 {offsets = [0, 4], sizes = [8, 4], strides = [1, 1]} : vector<8x16xf32> to vector<8x4xf32>
    %753 = arith.addf %751, %752 : vector<8x4xf32>
    %754 = vector.extract_strided_slice %750 {offsets = [0, 8], sizes = [8, 4], strides = [1, 1]} : vector<8x16xf32> to vector<8x4xf32>
    %755 = arith.addf %753, %754 : vector<8x4xf32>
    %756 = vector.extract_strided_slice %750 {offsets = [0, 12], sizes = [8, 4], strides = [1, 1]} : vector<8x16xf32> to vector<8x4xf32>
    %757 = arith.addf %755, %756 : vector<8x4xf32>
    %758 = arith.subf %658, %707 : vector<8x4xf32>
    %759 = arith.addf %758, %757 : vector<8x4xf32>
    %760 = arith.addf %612, %759 : vector<8x4xf32>
    %c4_172 = arith.constant 4 : index
    %c3_173 = arith.constant 3 : index
    %c0_174 = arith.constant 0 : index
    %c0_175 = arith.constant 0 : index
    %761 = vector.load %arg2[%c4_172, %c3_173, %c0_174, %c0_175] : memref<8x4x1x32xf32, #tpu.memory_space<vmem>>, vector<1x1x1x32xf32>
    %762 = vector.shape_cast %761 : vector<1x1x1x32xf32> to vector<1x32xf32>
    %c4_176 = arith.constant 4 : index
    %c3_177 = arith.constant 3 : index
    %c0_178 = arith.constant 0 : index
    %c0_179 = arith.constant 0 : index
    %763 = vector.load %arg3[%c4_176, %c3_177, %c0_178, %c0_179] : memref<8x4x8x16xf32, #tpu.memory_space<vmem>>, vector<1x1x8x16xf32>
    %764 = vector.shape_cast %763 : vector<1x1x8x16xf32> to vector<8x16xf32>
    %765 = vector.broadcast %762 : vector<1x32xf32> to vector<8x32xf32>
    %766 = arith.addf %765, %0 : vector<8x32xf32>
    %767 = vector.extract_strided_slice %760 {offsets = [0, 0], sizes = [8, 1], strides = [1, 1]} : vector<8x4xf32> to vector<8x1xf32>
    %768 = vector.extract_strided_slice %1 {offsets = [0, 0], sizes = [1, 32], strides = [1, 1]} : vector<4x32xf32> to vector<1x32xf32>
    %769 = vector.broadcast %767 : vector<8x1xf32> to vector<8x32xf32>
    %770 = vector.broadcast %768 : vector<1x32xf32> to vector<8x32xf32>
    %771 = arith.mulf %769, %770 : vector<8x32xf32>
    %772 = arith.addf %766, %771 : vector<8x32xf32>
    %773 = vector.extract_strided_slice %760 {offsets = [0, 1], sizes = [8, 1], strides = [1, 1]} : vector<8x4xf32> to vector<8x1xf32>
    %774 = vector.extract_strided_slice %1 {offsets = [1, 0], sizes = [1, 32], strides = [1, 1]} : vector<4x32xf32> to vector<1x32xf32>
    %775 = vector.broadcast %773 : vector<8x1xf32> to vector<8x32xf32>
    %776 = vector.broadcast %774 : vector<1x32xf32> to vector<8x32xf32>
    %777 = arith.mulf %775, %776 : vector<8x32xf32>
    %778 = arith.addf %772, %777 : vector<8x32xf32>
    %779 = vector.extract_strided_slice %760 {offsets = [0, 2], sizes = [8, 1], strides = [1, 1]} : vector<8x4xf32> to vector<8x1xf32>
    %780 = vector.extract_strided_slice %1 {offsets = [2, 0], sizes = [1, 32], strides = [1, 1]} : vector<4x32xf32> to vector<1x32xf32>
    %781 = vector.broadcast %779 : vector<8x1xf32> to vector<8x32xf32>
    %782 = vector.broadcast %780 : vector<1x32xf32> to vector<8x32xf32>
    %783 = arith.mulf %781, %782 : vector<8x32xf32>
    %784 = arith.addf %778, %783 : vector<8x32xf32>
    %785 = vector.extract_strided_slice %760 {offsets = [0, 3], sizes = [8, 1], strides = [1, 1]} : vector<8x4xf32> to vector<8x1xf32>
    %786 = vector.extract_strided_slice %1 {offsets = [3, 0], sizes = [1, 32], strides = [1, 1]} : vector<4x32xf32> to vector<1x32xf32>
    %787 = vector.broadcast %785 : vector<8x1xf32> to vector<8x32xf32>
    %788 = vector.broadcast %786 : vector<1x32xf32> to vector<8x32xf32>
    %789 = arith.mulf %787, %788 : vector<8x32xf32>
    %790 = arith.addf %784, %789 : vector<8x32xf32>
    %791 = math.tanh %790 : vector<8x32xf32>
    %cst_180 = arith.constant dense<0.000000e+00> : vector<8x32xf32>
    %792 = tpu.matmul %791, %2, %cst_180 {dimension_numbers = #tpu.dot_dimension_numbers<[1], [0], [0], [1], [0, 0, 1, 1], [], []>} : vector<8x32xf32>, vector<32x32xf32>, vector<8x32xf32> -> vector<8x32xf32>
    %793 = vector.broadcast %3 : vector<1x32xf32> to vector<8x32xf32>
    %794 = arith.addf %792, %793 : vector<8x32xf32>
    %795 = math.tanh %794 : vector<8x32xf32>
    %cst_181 = arith.constant dense<0.000000e+00> : vector<8x16xf32>
    %796 = tpu.matmul %795, %4, %cst_181 {dimension_numbers = #tpu.dot_dimension_numbers<[1], [0], [0], [1], [0, 0, 1, 1], [], []>} : vector<8x32xf32>, vector<32x16xf32>, vector<8x16xf32> -> vector<8x16xf32>
    %797 = vector.broadcast %5 : vector<1x16xf32> to vector<8x16xf32>
    %798 = arith.addf %796, %797 : vector<8x16xf32>
    %799 = arith.mulf %798, %764 : vector<8x16xf32>
    %800 = vector.extract_strided_slice %799 {offsets = [0, 0], sizes = [8, 4], strides = [1, 1]} : vector<8x16xf32> to vector<8x4xf32>
    %801 = vector.extract_strided_slice %799 {offsets = [0, 4], sizes = [8, 4], strides = [1, 1]} : vector<8x16xf32> to vector<8x4xf32>
    %802 = arith.addf %800, %801 : vector<8x4xf32>
    %803 = vector.extract_strided_slice %799 {offsets = [0, 8], sizes = [8, 4], strides = [1, 1]} : vector<8x16xf32> to vector<8x4xf32>
    %804 = arith.addf %802, %803 : vector<8x4xf32>
    %805 = vector.extract_strided_slice %799 {offsets = [0, 12], sizes = [8, 4], strides = [1, 1]} : vector<8x16xf32> to vector<8x4xf32>
    %806 = arith.addf %804, %805 : vector<8x4xf32>
    %807 = arith.addf %707, %757 : vector<8x4xf32>
    %cst_182 = arith.constant 3.000000e+00 : f32
    %808 = vector.broadcast %cst_182 : f32 to vector<8x4xf32>
    %809 = arith.mulf %808, %807 : vector<8x4xf32>
    %810 = arith.addf %658, %809 : vector<8x4xf32>
    %811 = arith.addf %810, %806 : vector<8x4xf32>
    %cst_183 = arith.constant 1.250000e-01 : f32
    %812 = vector.broadcast %cst_183 : f32 to vector<8x4xf32>
    %813 = arith.mulf %811, %812 : vector<8x4xf32>
    %814 = arith.addf %612, %813 : vector<8x4xf32>
    %c5 = arith.constant 5 : index
    %c0_184 = arith.constant 0 : index
    %c0_185 = arith.constant 0 : index
    %c0_186 = arith.constant 0 : index
    %815 = vector.load %arg2[%c5, %c0_184, %c0_185, %c0_186] : memref<8x4x1x32xf32, #tpu.memory_space<vmem>>, vector<1x1x1x32xf32>
    %816 = vector.shape_cast %815 : vector<1x1x1x32xf32> to vector<1x32xf32>
    %c5_187 = arith.constant 5 : index
    %c0_188 = arith.constant 0 : index
    %c0_189 = arith.constant 0 : index
    %c0_190 = arith.constant 0 : index
    %817 = vector.load %arg3[%c5_187, %c0_188, %c0_189, %c0_190] : memref<8x4x8x16xf32, #tpu.memory_space<vmem>>, vector<1x1x8x16xf32>
    %818 = vector.shape_cast %817 : vector<1x1x8x16xf32> to vector<8x16xf32>
    %819 = vector.broadcast %816 : vector<1x32xf32> to vector<8x32xf32>
    %820 = arith.addf %819, %0 : vector<8x32xf32>
    %821 = vector.extract_strided_slice %814 {offsets = [0, 0], sizes = [8, 1], strides = [1, 1]} : vector<8x4xf32> to vector<8x1xf32>
    %822 = vector.extract_strided_slice %1 {offsets = [0, 0], sizes = [1, 32], strides = [1, 1]} : vector<4x32xf32> to vector<1x32xf32>
    %823 = vector.broadcast %821 : vector<8x1xf32> to vector<8x32xf32>
    %824 = vector.broadcast %822 : vector<1x32xf32> to vector<8x32xf32>
    %825 = arith.mulf %823, %824 : vector<8x32xf32>
    %826 = arith.addf %820, %825 : vector<8x32xf32>
    %827 = vector.extract_strided_slice %814 {offsets = [0, 1], sizes = [8, 1], strides = [1, 1]} : vector<8x4xf32> to vector<8x1xf32>
    %828 = vector.extract_strided_slice %1 {offsets = [1, 0], sizes = [1, 32], strides = [1, 1]} : vector<4x32xf32> to vector<1x32xf32>
    %829 = vector.broadcast %827 : vector<8x1xf32> to vector<8x32xf32>
    %830 = vector.broadcast %828 : vector<1x32xf32> to vector<8x32xf32>
    %831 = arith.mulf %829, %830 : vector<8x32xf32>
    %832 = arith.addf %826, %831 : vector<8x32xf32>
    %833 = vector.extract_strided_slice %814 {offsets = [0, 2], sizes = [8, 1], strides = [1, 1]} : vector<8x4xf32> to vector<8x1xf32>
    %834 = vector.extract_strided_slice %1 {offsets = [2, 0], sizes = [1, 32], strides = [1, 1]} : vector<4x32xf32> to vector<1x32xf32>
    %835 = vector.broadcast %833 : vector<8x1xf32> to vector<8x32xf32>
    %836 = vector.broadcast %834 : vector<1x32xf32> to vector<8x32xf32>
    %837 = arith.mulf %835, %836 : vector<8x32xf32>
    %838 = arith.addf %832, %837 : vector<8x32xf32>
    %839 = vector.extract_strided_slice %814 {offsets = [0, 3], sizes = [8, 1], strides = [1, 1]} : vector<8x4xf32> to vector<8x1xf32>
    %840 = vector.extract_strided_slice %1 {offsets = [3, 0], sizes = [1, 32], strides = [1, 1]} : vector<4x32xf32> to vector<1x32xf32>
    %841 = vector.broadcast %839 : vector<8x1xf32> to vector<8x32xf32>
    %842 = vector.broadcast %840 : vector<1x32xf32> to vector<8x32xf32>
    %843 = arith.mulf %841, %842 : vector<8x32xf32>
    %844 = arith.addf %838, %843 : vector<8x32xf32>
    %845 = math.tanh %844 : vector<8x32xf32>
    %cst_191 = arith.constant dense<0.000000e+00> : vector<8x32xf32>
    %846 = tpu.matmul %845, %2, %cst_191 {dimension_numbers = #tpu.dot_dimension_numbers<[1], [0], [0], [1], [0, 0, 1, 1], [], []>} : vector<8x32xf32>, vector<32x32xf32>, vector<8x32xf32> -> vector<8x32xf32>
    %847 = vector.broadcast %3 : vector<1x32xf32> to vector<8x32xf32>
    %848 = arith.addf %846, %847 : vector<8x32xf32>
    %849 = math.tanh %848 : vector<8x32xf32>
    %cst_192 = arith.constant dense<0.000000e+00> : vector<8x16xf32>
    %850 = tpu.matmul %849, %4, %cst_192 {dimension_numbers = #tpu.dot_dimension_numbers<[1], [0], [0], [1], [0, 0, 1, 1], [], []>} : vector<8x32xf32>, vector<32x16xf32>, vector<8x16xf32> -> vector<8x16xf32>
    %851 = vector.broadcast %5 : vector<1x16xf32> to vector<8x16xf32>
    %852 = arith.addf %850, %851 : vector<8x16xf32>
    %853 = arith.mulf %852, %818 : vector<8x16xf32>
    %854 = vector.extract_strided_slice %853 {offsets = [0, 0], sizes = [8, 4], strides = [1, 1]} : vector<8x16xf32> to vector<8x4xf32>
    %855 = vector.extract_strided_slice %853 {offsets = [0, 4], sizes = [8, 4], strides = [1, 1]} : vector<8x16xf32> to vector<8x4xf32>
    %856 = arith.addf %854, %855 : vector<8x4xf32>
    %857 = vector.extract_strided_slice %853 {offsets = [0, 8], sizes = [8, 4], strides = [1, 1]} : vector<8x16xf32> to vector<8x4xf32>
    %858 = arith.addf %856, %857 : vector<8x4xf32>
    %859 = vector.extract_strided_slice %853 {offsets = [0, 12], sizes = [8, 4], strides = [1, 1]} : vector<8x16xf32> to vector<8x4xf32>
    %860 = arith.addf %858, %859 : vector<8x4xf32>
    %cst_193 = arith.constant 0.333333343 : f32
    %861 = vector.broadcast %cst_193 : f32 to vector<8x4xf32>
    %862 = arith.mulf %860, %861 : vector<8x4xf32>
    %863 = arith.addf %814, %862 : vector<8x4xf32>
    %c5_194 = arith.constant 5 : index
    %c1_195 = arith.constant 1 : index
    %c0_196 = arith.constant 0 : index
    %c0_197 = arith.constant 0 : index
    %864 = vector.load %arg2[%c5_194, %c1_195, %c0_196, %c0_197] : memref<8x4x1x32xf32, #tpu.memory_space<vmem>>, vector<1x1x1x32xf32>
    %865 = vector.shape_cast %864 : vector<1x1x1x32xf32> to vector<1x32xf32>
    %c5_198 = arith.constant 5 : index
    %c1_199 = arith.constant 1 : index
    %c0_200 = arith.constant 0 : index
    %c0_201 = arith.constant 0 : index
    %866 = vector.load %arg3[%c5_198, %c1_199, %c0_200, %c0_201] : memref<8x4x8x16xf32, #tpu.memory_space<vmem>>, vector<1x1x8x16xf32>
    %867 = vector.shape_cast %866 : vector<1x1x8x16xf32> to vector<8x16xf32>
    %868 = vector.broadcast %865 : vector<1x32xf32> to vector<8x32xf32>
    %869 = arith.addf %868, %0 : vector<8x32xf32>
    %870 = vector.extract_strided_slice %863 {offsets = [0, 0], sizes = [8, 1], strides = [1, 1]} : vector<8x4xf32> to vector<8x1xf32>
    %871 = vector.extract_strided_slice %1 {offsets = [0, 0], sizes = [1, 32], strides = [1, 1]} : vector<4x32xf32> to vector<1x32xf32>
    %872 = vector.broadcast %870 : vector<8x1xf32> to vector<8x32xf32>
    %873 = vector.broadcast %871 : vector<1x32xf32> to vector<8x32xf32>
    %874 = arith.mulf %872, %873 : vector<8x32xf32>
    %875 = arith.addf %869, %874 : vector<8x32xf32>
    %876 = vector.extract_strided_slice %863 {offsets = [0, 1], sizes = [8, 1], strides = [1, 1]} : vector<8x4xf32> to vector<8x1xf32>
    %877 = vector.extract_strided_slice %1 {offsets = [1, 0], sizes = [1, 32], strides = [1, 1]} : vector<4x32xf32> to vector<1x32xf32>
    %878 = vector.broadcast %876 : vector<8x1xf32> to vector<8x32xf32>
    %879 = vector.broadcast %877 : vector<1x32xf32> to vector<8x32xf32>
    %880 = arith.mulf %878, %879 : vector<8x32xf32>
    %881 = arith.addf %875, %880 : vector<8x32xf32>
    %882 = vector.extract_strided_slice %863 {offsets = [0, 2], sizes = [8, 1], strides = [1, 1]} : vector<8x4xf32> to vector<8x1xf32>
    %883 = vector.extract_strided_slice %1 {offsets = [2, 0], sizes = [1, 32], strides = [1, 1]} : vector<4x32xf32> to vector<1x32xf32>
    %884 = vector.broadcast %882 : vector<8x1xf32> to vector<8x32xf32>
    %885 = vector.broadcast %883 : vector<1x32xf32> to vector<8x32xf32>
    %886 = arith.mulf %884, %885 : vector<8x32xf32>
    %887 = arith.addf %881, %886 : vector<8x32xf32>
    %888 = vector.extract_strided_slice %863 {offsets = [0, 3], sizes = [8, 1], strides = [1, 1]} : vector<8x4xf32> to vector<8x1xf32>
    %889 = vector.extract_strided_slice %1 {offsets = [3, 0], sizes = [1, 32], strides = [1, 1]} : vector<4x32xf32> to vector<1x32xf32>
    %890 = vector.broadcast %888 : vector<8x1xf32> to vector<8x32xf32>
    %891 = vector.broadcast %889 : vector<1x32xf32> to vector<8x32xf32>
    %892 = arith.mulf %890, %891 : vector<8x32xf32>
    %893 = arith.addf %887, %892 : vector<8x32xf32>
    %894 = math.tanh %893 : vector<8x32xf32>
    %cst_202 = arith.constant dense<0.000000e+00> : vector<8x32xf32>
    %895 = tpu.matmul %894, %2, %cst_202 {dimension_numbers = #tpu.dot_dimension_numbers<[1], [0], [0], [1], [0, 0, 1, 1], [], []>} : vector<8x32xf32>, vector<32x32xf32>, vector<8x32xf32> -> vector<8x32xf32>
    %896 = vector.broadcast %3 : vector<1x32xf32> to vector<8x32xf32>
    %897 = arith.addf %895, %896 : vector<8x32xf32>
    %898 = math.tanh %897 : vector<8x32xf32>
    %cst_203 = arith.constant dense<0.000000e+00> : vector<8x16xf32>
    %899 = tpu.matmul %898, %4, %cst_203 {dimension_numbers = #tpu.dot_dimension_numbers<[1], [0], [0], [1], [0, 0, 1, 1], [], []>} : vector<8x32xf32>, vector<32x16xf32>, vector<8x16xf32> -> vector<8x16xf32>
    %900 = vector.broadcast %5 : vector<1x16xf32> to vector<8x16xf32>
    %901 = arith.addf %899, %900 : vector<8x16xf32>
    %902 = arith.mulf %901, %867 : vector<8x16xf32>
    %903 = vector.extract_strided_slice %902 {offsets = [0, 0], sizes = [8, 4], strides = [1, 1]} : vector<8x16xf32> to vector<8x4xf32>
    %904 = vector.extract_strided_slice %902 {offsets = [0, 4], sizes = [8, 4], strides = [1, 1]} : vector<8x16xf32> to vector<8x4xf32>
    %905 = arith.addf %903, %904 : vector<8x4xf32>
    %906 = vector.extract_strided_slice %902 {offsets = [0, 8], sizes = [8, 4], strides = [1, 1]} : vector<8x16xf32> to vector<8x4xf32>
    %907 = arith.addf %905, %906 : vector<8x4xf32>
    %908 = vector.extract_strided_slice %902 {offsets = [0, 12], sizes = [8, 4], strides = [1, 1]} : vector<8x16xf32> to vector<8x4xf32>
    %909 = arith.addf %907, %908 : vector<8x4xf32>
    %cst_204 = arith.constant 0.333333343 : f32
    %910 = vector.broadcast %cst_204 : f32 to vector<8x4xf32>
    %911 = arith.mulf %860, %910 : vector<8x4xf32>
    %912 = arith.subf %909, %911 : vector<8x4xf32>
    %913 = arith.addf %814, %912 : vector<8x4xf32>
    %c5_205 = arith.constant 5 : index
    %c2_206 = arith.constant 2 : index
    %c0_207 = arith.constant 0 : index
    %c0_208 = arith.constant 0 : index
    %914 = vector.load %arg2[%c5_205, %c2_206, %c0_207, %c0_208] : memref<8x4x1x32xf32, #tpu.memory_space<vmem>>, vector<1x1x1x32xf32>
    %915 = vector.shape_cast %914 : vector<1x1x1x32xf32> to vector<1x32xf32>
    %c5_209 = arith.constant 5 : index
    %c2_210 = arith.constant 2 : index
    %c0_211 = arith.constant 0 : index
    %c0_212 = arith.constant 0 : index
    %916 = vector.load %arg3[%c5_209, %c2_210, %c0_211, %c0_212] : memref<8x4x8x16xf32, #tpu.memory_space<vmem>>, vector<1x1x8x16xf32>
    %917 = vector.shape_cast %916 : vector<1x1x8x16xf32> to vector<8x16xf32>
    %918 = vector.broadcast %915 : vector<1x32xf32> to vector<8x32xf32>
    %919 = arith.addf %918, %0 : vector<8x32xf32>
    %920 = vector.extract_strided_slice %913 {offsets = [0, 0], sizes = [8, 1], strides = [1, 1]} : vector<8x4xf32> to vector<8x1xf32>
    %921 = vector.extract_strided_slice %1 {offsets = [0, 0], sizes = [1, 32], strides = [1, 1]} : vector<4x32xf32> to vector<1x32xf32>
    %922 = vector.broadcast %920 : vector<8x1xf32> to vector<8x32xf32>
    %923 = vector.broadcast %921 : vector<1x32xf32> to vector<8x32xf32>
    %924 = arith.mulf %922, %923 : vector<8x32xf32>
    %925 = arith.addf %919, %924 : vector<8x32xf32>
    %926 = vector.extract_strided_slice %913 {offsets = [0, 1], sizes = [8, 1], strides = [1, 1]} : vector<8x4xf32> to vector<8x1xf32>
    %927 = vector.extract_strided_slice %1 {offsets = [1, 0], sizes = [1, 32], strides = [1, 1]} : vector<4x32xf32> to vector<1x32xf32>
    %928 = vector.broadcast %926 : vector<8x1xf32> to vector<8x32xf32>
    %929 = vector.broadcast %927 : vector<1x32xf32> to vector<8x32xf32>
    %930 = arith.mulf %928, %929 : vector<8x32xf32>
    %931 = arith.addf %925, %930 : vector<8x32xf32>
    %932 = vector.extract_strided_slice %913 {offsets = [0, 2], sizes = [8, 1], strides = [1, 1]} : vector<8x4xf32> to vector<8x1xf32>
    %933 = vector.extract_strided_slice %1 {offsets = [2, 0], sizes = [1, 32], strides = [1, 1]} : vector<4x32xf32> to vector<1x32xf32>
    %934 = vector.broadcast %932 : vector<8x1xf32> to vector<8x32xf32>
    %935 = vector.broadcast %933 : vector<1x32xf32> to vector<8x32xf32>
    %936 = arith.mulf %934, %935 : vector<8x32xf32>
    %937 = arith.addf %931, %936 : vector<8x32xf32>
    %938 = vector.extract_strided_slice %913 {offsets = [0, 3], sizes = [8, 1], strides = [1, 1]} : vector<8x4xf32> to vector<8x1xf32>
    %939 = vector.extract_strided_slice %1 {offsets = [3, 0], sizes = [1, 32], strides = [1, 1]} : vector<4x32xf32> to vector<1x32xf32>
    %940 = vector.broadcast %938 : vector<8x1xf32> to vector<8x32xf32>
    %941 = vector.broadcast %939 : vector<1x32xf32> to vector<8x32xf32>
    %942 = arith.mulf %940, %941 : vector<8x32xf32>
    %943 = arith.addf %937, %942 : vector<8x32xf32>
    %944 = math.tanh %943 : vector<8x32xf32>
    %cst_213 = arith.constant dense<0.000000e+00> : vector<8x32xf32>
    %945 = tpu.matmul %944, %2, %cst_213 {dimension_numbers = #tpu.dot_dimension_numbers<[1], [0], [0], [1], [0, 0, 1, 1], [], []>} : vector<8x32xf32>, vector<32x32xf32>, vector<8x32xf32> -> vector<8x32xf32>
    %946 = vector.broadcast %3 : vector<1x32xf32> to vector<8x32xf32>
    %947 = arith.addf %945, %946 : vector<8x32xf32>
    %948 = math.tanh %947 : vector<8x32xf32>
    %cst_214 = arith.constant dense<0.000000e+00> : vector<8x16xf32>
    %949 = tpu.matmul %948, %4, %cst_214 {dimension_numbers = #tpu.dot_dimension_numbers<[1], [0], [0], [1], [0, 0, 1, 1], [], []>} : vector<8x32xf32>, vector<32x16xf32>, vector<8x16xf32> -> vector<8x16xf32>
    %950 = vector.broadcast %5 : vector<1x16xf32> to vector<8x16xf32>
    %951 = arith.addf %949, %950 : vector<8x16xf32>
    %952 = arith.mulf %951, %917 : vector<8x16xf32>
    %953 = vector.extract_strided_slice %952 {offsets = [0, 0], sizes = [8, 4], strides = [1, 1]} : vector<8x16xf32> to vector<8x4xf32>
    %954 = vector.extract_strided_slice %952 {offsets = [0, 4], sizes = [8, 4], strides = [1, 1]} : vector<8x16xf32> to vector<8x4xf32>
    %955 = arith.addf %953, %954 : vector<8x4xf32>
    %956 = vector.extract_strided_slice %952 {offsets = [0, 8], sizes = [8, 4], strides = [1, 1]} : vector<8x16xf32> to vector<8x4xf32>
    %957 = arith.addf %955, %956 : vector<8x4xf32>
    %958 = vector.extract_strided_slice %952 {offsets = [0, 12], sizes = [8, 4], strides = [1, 1]} : vector<8x16xf32> to vector<8x4xf32>
    %959 = arith.addf %957, %958 : vector<8x4xf32>
    %960 = arith.subf %860, %909 : vector<8x4xf32>
    %961 = arith.addf %960, %959 : vector<8x4xf32>
    %962 = arith.addf %814, %961 : vector<8x4xf32>
    %c5_215 = arith.constant 5 : index
    %c3_216 = arith.constant 3 : index
    %c0_217 = arith.constant 0 : index
    %c0_218 = arith.constant 0 : index
    %963 = vector.load %arg2[%c5_215, %c3_216, %c0_217, %c0_218] : memref<8x4x1x32xf32, #tpu.memory_space<vmem>>, vector<1x1x1x32xf32>
    %964 = vector.shape_cast %963 : vector<1x1x1x32xf32> to vector<1x32xf32>
    %c5_219 = arith.constant 5 : index
    %c3_220 = arith.constant 3 : index
    %c0_221 = arith.constant 0 : index
    %c0_222 = arith.constant 0 : index
    %965 = vector.load %arg3[%c5_219, %c3_220, %c0_221, %c0_222] : memref<8x4x8x16xf32, #tpu.memory_space<vmem>>, vector<1x1x8x16xf32>
    %966 = vector.shape_cast %965 : vector<1x1x8x16xf32> to vector<8x16xf32>
    %967 = vector.broadcast %964 : vector<1x32xf32> to vector<8x32xf32>
    %968 = arith.addf %967, %0 : vector<8x32xf32>
    %969 = vector.extract_strided_slice %962 {offsets = [0, 0], sizes = [8, 1], strides = [1, 1]} : vector<8x4xf32> to vector<8x1xf32>
    %970 = vector.extract_strided_slice %1 {offsets = [0, 0], sizes = [1, 32], strides = [1, 1]} : vector<4x32xf32> to vector<1x32xf32>
    %971 = vector.broadcast %969 : vector<8x1xf32> to vector<8x32xf32>
    %972 = vector.broadcast %970 : vector<1x32xf32> to vector<8x32xf32>
    %973 = arith.mulf %971, %972 : vector<8x32xf32>
    %974 = arith.addf %968, %973 : vector<8x32xf32>
    %975 = vector.extract_strided_slice %962 {offsets = [0, 1], sizes = [8, 1], strides = [1, 1]} : vector<8x4xf32> to vector<8x1xf32>
    %976 = vector.extract_strided_slice %1 {offsets = [1, 0], sizes = [1, 32], strides = [1, 1]} : vector<4x32xf32> to vector<1x32xf32>
    %977 = vector.broadcast %975 : vector<8x1xf32> to vector<8x32xf32>
    %978 = vector.broadcast %976 : vector<1x32xf32> to vector<8x32xf32>
    %979 = arith.mulf %977, %978 : vector<8x32xf32>
    %980 = arith.addf %974, %979 : vector<8x32xf32>
    %981 = vector.extract_strided_slice %962 {offsets = [0, 2], sizes = [8, 1], strides = [1, 1]} : vector<8x4xf32> to vector<8x1xf32>
    %982 = vector.extract_strided_slice %1 {offsets = [2, 0], sizes = [1, 32], strides = [1, 1]} : vector<4x32xf32> to vector<1x32xf32>
    %983 = vector.broadcast %981 : vector<8x1xf32> to vector<8x32xf32>
    %984 = vector.broadcast %982 : vector<1x32xf32> to vector<8x32xf32>
    %985 = arith.mulf %983, %984 : vector<8x32xf32>
    %986 = arith.addf %980, %985 : vector<8x32xf32>
    %987 = vector.extract_strided_slice %962 {offsets = [0, 3], sizes = [8, 1], strides = [1, 1]} : vector<8x4xf32> to vector<8x1xf32>
    %988 = vector.extract_strided_slice %1 {offsets = [3, 0], sizes = [1, 32], strides = [1, 1]} : vector<4x32xf32> to vector<1x32xf32>
    %989 = vector.broadcast %987 : vector<8x1xf32> to vector<8x32xf32>
    %990 = vector.broadcast %988 : vector<1x32xf32> to vector<8x32xf32>
    %991 = arith.mulf %989, %990 : vector<8x32xf32>
    %992 = arith.addf %986, %991 : vector<8x32xf32>
    %993 = math.tanh %992 : vector<8x32xf32>
    %cst_223 = arith.constant dense<0.000000e+00> : vector<8x32xf32>
    %994 = tpu.matmul %993, %2, %cst_223 {dimension_numbers = #tpu.dot_dimension_numbers<[1], [0], [0], [1], [0, 0, 1, 1], [], []>} : vector<8x32xf32>, vector<32x32xf32>, vector<8x32xf32> -> vector<8x32xf32>
    %995 = vector.broadcast %3 : vector<1x32xf32> to vector<8x32xf32>
    %996 = arith.addf %994, %995 : vector<8x32xf32>
    %997 = math.tanh %996 : vector<8x32xf32>
    %cst_224 = arith.constant dense<0.000000e+00> : vector<8x16xf32>
    %998 = tpu.matmul %997, %4, %cst_224 {dimension_numbers = #tpu.dot_dimension_numbers<[1], [0], [0], [1], [0, 0, 1, 1], [], []>} : vector<8x32xf32>, vector<32x16xf32>, vector<8x16xf32> -> vector<8x16xf32>
    %999 = vector.broadcast %5 : vector<1x16xf32> to vector<8x16xf32>
    %1000 = arith.addf %998, %999 : vector<8x16xf32>
    %1001 = arith.mulf %1000, %966 : vector<8x16xf32>
    %1002 = vector.extract_strided_slice %1001 {offsets = [0, 0], sizes = [8, 4], strides = [1, 1]} : vector<8x16xf32> to vector<8x4xf32>
    %1003 = vector.extract_strided_slice %1001 {offsets = [0, 4], sizes = [8, 4], strides = [1, 1]} : vector<8x16xf32> to vector<8x4xf32>
    %1004 = arith.addf %1002, %1003 : vector<8x4xf32>
    %1005 = vector.extract_strided_slice %1001 {offsets = [0, 8], sizes = [8, 4], strides = [1, 1]} : vector<8x16xf32> to vector<8x4xf32>
    %1006 = arith.addf %1004, %1005 : vector<8x4xf32>
    %1007 = vector.extract_strided_slice %1001 {offsets = [0, 12], sizes = [8, 4], strides = [1, 1]} : vector<8x16xf32> to vector<8x4xf32>
    %1008 = arith.addf %1006, %1007 : vector<8x4xf32>
    %1009 = arith.addf %909, %959 : vector<8x4xf32>
    %cst_225 = arith.constant 3.000000e+00 : f32
    %1010 = vector.broadcast %cst_225 : f32 to vector<8x4xf32>
    %1011 = arith.mulf %1010, %1009 : vector<8x4xf32>
    %1012 = arith.addf %860, %1011 : vector<8x4xf32>
    %1013 = arith.addf %1012, %1008 : vector<8x4xf32>
    %cst_226 = arith.constant 1.250000e-01 : f32
    %1014 = vector.broadcast %cst_226 : f32 to vector<8x4xf32>
    %1015 = arith.mulf %1013, %1014 : vector<8x4xf32>
    %1016 = arith.addf %814, %1015 : vector<8x4xf32>
    %c6 = arith.constant 6 : index
    %c0_227 = arith.constant 0 : index
    %c0_228 = arith.constant 0 : index
    %c0_229 = arith.constant 0 : index
    %1017 = vector.load %arg2[%c6, %c0_227, %c0_228, %c0_229] : memref<8x4x1x32xf32, #tpu.memory_space<vmem>>, vector<1x1x1x32xf32>
    %1018 = vector.shape_cast %1017 : vector<1x1x1x32xf32> to vector<1x32xf32>
    %c6_230 = arith.constant 6 : index
    %c0_231 = arith.constant 0 : index
    %c0_232 = arith.constant 0 : index
    %c0_233 = arith.constant 0 : index
    %1019 = vector.load %arg3[%c6_230, %c0_231, %c0_232, %c0_233] : memref<8x4x8x16xf32, #tpu.memory_space<vmem>>, vector<1x1x8x16xf32>
    %1020 = vector.shape_cast %1019 : vector<1x1x8x16xf32> to vector<8x16xf32>
    %1021 = vector.broadcast %1018 : vector<1x32xf32> to vector<8x32xf32>
    %1022 = arith.addf %1021, %0 : vector<8x32xf32>
    %1023 = vector.extract_strided_slice %1016 {offsets = [0, 0], sizes = [8, 1], strides = [1, 1]} : vector<8x4xf32> to vector<8x1xf32>
    %1024 = vector.extract_strided_slice %1 {offsets = [0, 0], sizes = [1, 32], strides = [1, 1]} : vector<4x32xf32> to vector<1x32xf32>
    %1025 = vector.broadcast %1023 : vector<8x1xf32> to vector<8x32xf32>
    %1026 = vector.broadcast %1024 : vector<1x32xf32> to vector<8x32xf32>
    %1027 = arith.mulf %1025, %1026 : vector<8x32xf32>
    %1028 = arith.addf %1022, %1027 : vector<8x32xf32>
    %1029 = vector.extract_strided_slice %1016 {offsets = [0, 1], sizes = [8, 1], strides = [1, 1]} : vector<8x4xf32> to vector<8x1xf32>
    %1030 = vector.extract_strided_slice %1 {offsets = [1, 0], sizes = [1, 32], strides = [1, 1]} : vector<4x32xf32> to vector<1x32xf32>
    %1031 = vector.broadcast %1029 : vector<8x1xf32> to vector<8x32xf32>
    %1032 = vector.broadcast %1030 : vector<1x32xf32> to vector<8x32xf32>
    %1033 = arith.mulf %1031, %1032 : vector<8x32xf32>
    %1034 = arith.addf %1028, %1033 : vector<8x32xf32>
    %1035 = vector.extract_strided_slice %1016 {offsets = [0, 2], sizes = [8, 1], strides = [1, 1]} : vector<8x4xf32> to vector<8x1xf32>
    %1036 = vector.extract_strided_slice %1 {offsets = [2, 0], sizes = [1, 32], strides = [1, 1]} : vector<4x32xf32> to vector<1x32xf32>
    %1037 = vector.broadcast %1035 : vector<8x1xf32> to vector<8x32xf32>
    %1038 = vector.broadcast %1036 : vector<1x32xf32> to vector<8x32xf32>
    %1039 = arith.mulf %1037, %1038 : vector<8x32xf32>
    %1040 = arith.addf %1034, %1039 : vector<8x32xf32>
    %1041 = vector.extract_strided_slice %1016 {offsets = [0, 3], sizes = [8, 1], strides = [1, 1]} : vector<8x4xf32> to vector<8x1xf32>
    %1042 = vector.extract_strided_slice %1 {offsets = [3, 0], sizes = [1, 32], strides = [1, 1]} : vector<4x32xf32> to vector<1x32xf32>
    %1043 = vector.broadcast %1041 : vector<8x1xf32> to vector<8x32xf32>
    %1044 = vector.broadcast %1042 : vector<1x32xf32> to vector<8x32xf32>
    %1045 = arith.mulf %1043, %1044 : vector<8x32xf32>
    %1046 = arith.addf %1040, %1045 : vector<8x32xf32>
    %1047 = math.tanh %1046 : vector<8x32xf32>
    %cst_234 = arith.constant dense<0.000000e+00> : vector<8x32xf32>
    %1048 = tpu.matmul %1047, %2, %cst_234 {dimension_numbers = #tpu.dot_dimension_numbers<[1], [0], [0], [1], [0, 0, 1, 1], [], []>} : vector<8x32xf32>, vector<32x32xf32>, vector<8x32xf32> -> vector<8x32xf32>
    %1049 = vector.broadcast %3 : vector<1x32xf32> to vector<8x32xf32>
    %1050 = arith.addf %1048, %1049 : vector<8x32xf32>
    %1051 = math.tanh %1050 : vector<8x32xf32>
    %cst_235 = arith.constant dense<0.000000e+00> : vector<8x16xf32>
    %1052 = tpu.matmul %1051, %4, %cst_235 {dimension_numbers = #tpu.dot_dimension_numbers<[1], [0], [0], [1], [0, 0, 1, 1], [], []>} : vector<8x32xf32>, vector<32x16xf32>, vector<8x16xf32> -> vector<8x16xf32>
    %1053 = vector.broadcast %5 : vector<1x16xf32> to vector<8x16xf32>
    %1054 = arith.addf %1052, %1053 : vector<8x16xf32>
    %1055 = arith.mulf %1054, %1020 : vector<8x16xf32>
    %1056 = vector.extract_strided_slice %1055 {offsets = [0, 0], sizes = [8, 4], strides = [1, 1]} : vector<8x16xf32> to vector<8x4xf32>
    %1057 = vector.extract_strided_slice %1055 {offsets = [0, 4], sizes = [8, 4], strides = [1, 1]} : vector<8x16xf32> to vector<8x4xf32>
    %1058 = arith.addf %1056, %1057 : vector<8x4xf32>
    %1059 = vector.extract_strided_slice %1055 {offsets = [0, 8], sizes = [8, 4], strides = [1, 1]} : vector<8x16xf32> to vector<8x4xf32>
    %1060 = arith.addf %1058, %1059 : vector<8x4xf32>
    %1061 = vector.extract_strided_slice %1055 {offsets = [0, 12], sizes = [8, 4], strides = [1, 1]} : vector<8x16xf32> to vector<8x4xf32>
    %1062 = arith.addf %1060, %1061 : vector<8x4xf32>
    %cst_236 = arith.constant 0.333333343 : f32
    %1063 = vector.broadcast %cst_236 : f32 to vector<8x4xf32>
    %1064 = arith.mulf %1062, %1063 : vector<8x4xf32>
    %1065 = arith.addf %1016, %1064 : vector<8x4xf32>
    %c6_237 = arith.constant 6 : index
    %c1_238 = arith.constant 1 : index
    %c0_239 = arith.constant 0 : index
    %c0_240 = arith.constant 0 : index
    %1066 = vector.load %arg2[%c6_237, %c1_238, %c0_239, %c0_240] : memref<8x4x1x32xf32, #tpu.memory_space<vmem>>, vector<1x1x1x32xf32>
    %1067 = vector.shape_cast %1066 : vector<1x1x1x32xf32> to vector<1x32xf32>
    %c6_241 = arith.constant 6 : index
    %c1_242 = arith.constant 1 : index
    %c0_243 = arith.constant 0 : index
    %c0_244 = arith.constant 0 : index
    %1068 = vector.load %arg3[%c6_241, %c1_242, %c0_243, %c0_244] : memref<8x4x8x16xf32, #tpu.memory_space<vmem>>, vector<1x1x8x16xf32>
    %1069 = vector.shape_cast %1068 : vector<1x1x8x16xf32> to vector<8x16xf32>
    %1070 = vector.broadcast %1067 : vector<1x32xf32> to vector<8x32xf32>
    %1071 = arith.addf %1070, %0 : vector<8x32xf32>
    %1072 = vector.extract_strided_slice %1065 {offsets = [0, 0], sizes = [8, 1], strides = [1, 1]} : vector<8x4xf32> to vector<8x1xf32>
    %1073 = vector.extract_strided_slice %1 {offsets = [0, 0], sizes = [1, 32], strides = [1, 1]} : vector<4x32xf32> to vector<1x32xf32>
    %1074 = vector.broadcast %1072 : vector<8x1xf32> to vector<8x32xf32>
    %1075 = vector.broadcast %1073 : vector<1x32xf32> to vector<8x32xf32>
    %1076 = arith.mulf %1074, %1075 : vector<8x32xf32>
    %1077 = arith.addf %1071, %1076 : vector<8x32xf32>
    %1078 = vector.extract_strided_slice %1065 {offsets = [0, 1], sizes = [8, 1], strides = [1, 1]} : vector<8x4xf32> to vector<8x1xf32>
    %1079 = vector.extract_strided_slice %1 {offsets = [1, 0], sizes = [1, 32], strides = [1, 1]} : vector<4x32xf32> to vector<1x32xf32>
    %1080 = vector.broadcast %1078 : vector<8x1xf32> to vector<8x32xf32>
    %1081 = vector.broadcast %1079 : vector<1x32xf32> to vector<8x32xf32>
    %1082 = arith.mulf %1080, %1081 : vector<8x32xf32>
    %1083 = arith.addf %1077, %1082 : vector<8x32xf32>
    %1084 = vector.extract_strided_slice %1065 {offsets = [0, 2], sizes = [8, 1], strides = [1, 1]} : vector<8x4xf32> to vector<8x1xf32>
    %1085 = vector.extract_strided_slice %1 {offsets = [2, 0], sizes = [1, 32], strides = [1, 1]} : vector<4x32xf32> to vector<1x32xf32>
    %1086 = vector.broadcast %1084 : vector<8x1xf32> to vector<8x32xf32>
    %1087 = vector.broadcast %1085 : vector<1x32xf32> to vector<8x32xf32>
    %1088 = arith.mulf %1086, %1087 : vector<8x32xf32>
    %1089 = arith.addf %1083, %1088 : vector<8x32xf32>
    %1090 = vector.extract_strided_slice %1065 {offsets = [0, 3], sizes = [8, 1], strides = [1, 1]} : vector<8x4xf32> to vector<8x1xf32>
    %1091 = vector.extract_strided_slice %1 {offsets = [3, 0], sizes = [1, 32], strides = [1, 1]} : vector<4x32xf32> to vector<1x32xf32>
    %1092 = vector.broadcast %1090 : vector<8x1xf32> to vector<8x32xf32>
    %1093 = vector.broadcast %1091 : vector<1x32xf32> to vector<8x32xf32>
    %1094 = arith.mulf %1092, %1093 : vector<8x32xf32>
    %1095 = arith.addf %1089, %1094 : vector<8x32xf32>
    %1096 = math.tanh %1095 : vector<8x32xf32>
    %cst_245 = arith.constant dense<0.000000e+00> : vector<8x32xf32>
    %1097 = tpu.matmul %1096, %2, %cst_245 {dimension_numbers = #tpu.dot_dimension_numbers<[1], [0], [0], [1], [0, 0, 1, 1], [], []>} : vector<8x32xf32>, vector<32x32xf32>, vector<8x32xf32> -> vector<8x32xf32>
    %1098 = vector.broadcast %3 : vector<1x32xf32> to vector<8x32xf32>
    %1099 = arith.addf %1097, %1098 : vector<8x32xf32>
    %1100 = math.tanh %1099 : vector<8x32xf32>
    %cst_246 = arith.constant dense<0.000000e+00> : vector<8x16xf32>
    %1101 = tpu.matmul %1100, %4, %cst_246 {dimension_numbers = #tpu.dot_dimension_numbers<[1], [0], [0], [1], [0, 0, 1, 1], [], []>} : vector<8x32xf32>, vector<32x16xf32>, vector<8x16xf32> -> vector<8x16xf32>
    %1102 = vector.broadcast %5 : vector<1x16xf32> to vector<8x16xf32>
    %1103 = arith.addf %1101, %1102 : vector<8x16xf32>
    %1104 = arith.mulf %1103, %1069 : vector<8x16xf32>
    %1105 = vector.extract_strided_slice %1104 {offsets = [0, 0], sizes = [8, 4], strides = [1, 1]} : vector<8x16xf32> to vector<8x4xf32>
    %1106 = vector.extract_strided_slice %1104 {offsets = [0, 4], sizes = [8, 4], strides = [1, 1]} : vector<8x16xf32> to vector<8x4xf32>
    %1107 = arith.addf %1105, %1106 : vector<8x4xf32>
    %1108 = vector.extract_strided_slice %1104 {offsets = [0, 8], sizes = [8, 4], strides = [1, 1]} : vector<8x16xf32> to vector<8x4xf32>
    %1109 = arith.addf %1107, %1108 : vector<8x4xf32>
    %1110 = vector.extract_strided_slice %1104 {offsets = [0, 12], sizes = [8, 4], strides = [1, 1]} : vector<8x16xf32> to vector<8x4xf32>
    %1111 = arith.addf %1109, %1110 : vector<8x4xf32>
    %cst_247 = arith.constant 0.333333343 : f32
    %1112 = vector.broadcast %cst_247 : f32 to vector<8x4xf32>
    %1113 = arith.mulf %1062, %1112 : vector<8x4xf32>
    %1114 = arith.subf %1111, %1113 : vector<8x4xf32>
    %1115 = arith.addf %1016, %1114 : vector<8x4xf32>
    %c6_248 = arith.constant 6 : index
    %c2_249 = arith.constant 2 : index
    %c0_250 = arith.constant 0 : index
    %c0_251 = arith.constant 0 : index
    %1116 = vector.load %arg2[%c6_248, %c2_249, %c0_250, %c0_251] : memref<8x4x1x32xf32, #tpu.memory_space<vmem>>, vector<1x1x1x32xf32>
    %1117 = vector.shape_cast %1116 : vector<1x1x1x32xf32> to vector<1x32xf32>
    %c6_252 = arith.constant 6 : index
    %c2_253 = arith.constant 2 : index
    %c0_254 = arith.constant 0 : index
    %c0_255 = arith.constant 0 : index
    %1118 = vector.load %arg3[%c6_252, %c2_253, %c0_254, %c0_255] : memref<8x4x8x16xf32, #tpu.memory_space<vmem>>, vector<1x1x8x16xf32>
    %1119 = vector.shape_cast %1118 : vector<1x1x8x16xf32> to vector<8x16xf32>
    %1120 = vector.broadcast %1117 : vector<1x32xf32> to vector<8x32xf32>
    %1121 = arith.addf %1120, %0 : vector<8x32xf32>
    %1122 = vector.extract_strided_slice %1115 {offsets = [0, 0], sizes = [8, 1], strides = [1, 1]} : vector<8x4xf32> to vector<8x1xf32>
    %1123 = vector.extract_strided_slice %1 {offsets = [0, 0], sizes = [1, 32], strides = [1, 1]} : vector<4x32xf32> to vector<1x32xf32>
    %1124 = vector.broadcast %1122 : vector<8x1xf32> to vector<8x32xf32>
    %1125 = vector.broadcast %1123 : vector<1x32xf32> to vector<8x32xf32>
    %1126 = arith.mulf %1124, %1125 : vector<8x32xf32>
    %1127 = arith.addf %1121, %1126 : vector<8x32xf32>
    %1128 = vector.extract_strided_slice %1115 {offsets = [0, 1], sizes = [8, 1], strides = [1, 1]} : vector<8x4xf32> to vector<8x1xf32>
    %1129 = vector.extract_strided_slice %1 {offsets = [1, 0], sizes = [1, 32], strides = [1, 1]} : vector<4x32xf32> to vector<1x32xf32>
    %1130 = vector.broadcast %1128 : vector<8x1xf32> to vector<8x32xf32>
    %1131 = vector.broadcast %1129 : vector<1x32xf32> to vector<8x32xf32>
    %1132 = arith.mulf %1130, %1131 : vector<8x32xf32>
    %1133 = arith.addf %1127, %1132 : vector<8x32xf32>
    %1134 = vector.extract_strided_slice %1115 {offsets = [0, 2], sizes = [8, 1], strides = [1, 1]} : vector<8x4xf32> to vector<8x1xf32>
    %1135 = vector.extract_strided_slice %1 {offsets = [2, 0], sizes = [1, 32], strides = [1, 1]} : vector<4x32xf32> to vector<1x32xf32>
    %1136 = vector.broadcast %1134 : vector<8x1xf32> to vector<8x32xf32>
    %1137 = vector.broadcast %1135 : vector<1x32xf32> to vector<8x32xf32>
    %1138 = arith.mulf %1136, %1137 : vector<8x32xf32>
    %1139 = arith.addf %1133, %1138 : vector<8x32xf32>
    %1140 = vector.extract_strided_slice %1115 {offsets = [0, 3], sizes = [8, 1], strides = [1, 1]} : vector<8x4xf32> to vector<8x1xf32>
    %1141 = vector.extract_strided_slice %1 {offsets = [3, 0], sizes = [1, 32], strides = [1, 1]} : vector<4x32xf32> to vector<1x32xf32>
    %1142 = vector.broadcast %1140 : vector<8x1xf32> to vector<8x32xf32>
    %1143 = vector.broadcast %1141 : vector<1x32xf32> to vector<8x32xf32>
    %1144 = arith.mulf %1142, %1143 : vector<8x32xf32>
    %1145 = arith.addf %1139, %1144 : vector<8x32xf32>
    %1146 = math.tanh %1145 : vector<8x32xf32>
    %cst_256 = arith.constant dense<0.000000e+00> : vector<8x32xf32>
    %1147 = tpu.matmul %1146, %2, %cst_256 {dimension_numbers = #tpu.dot_dimension_numbers<[1], [0], [0], [1], [0, 0, 1, 1], [], []>} : vector<8x32xf32>, vector<32x32xf32>, vector<8x32xf32> -> vector<8x32xf32>
    %1148 = vector.broadcast %3 : vector<1x32xf32> to vector<8x32xf32>
    %1149 = arith.addf %1147, %1148 : vector<8x32xf32>
    %1150 = math.tanh %1149 : vector<8x32xf32>
    %cst_257 = arith.constant dense<0.000000e+00> : vector<8x16xf32>
    %1151 = tpu.matmul %1150, %4, %cst_257 {dimension_numbers = #tpu.dot_dimension_numbers<[1], [0], [0], [1], [0, 0, 1, 1], [], []>} : vector<8x32xf32>, vector<32x16xf32>, vector<8x16xf32> -> vector<8x16xf32>
    %1152 = vector.broadcast %5 : vector<1x16xf32> to vector<8x16xf32>
    %1153 = arith.addf %1151, %1152 : vector<8x16xf32>
    %1154 = arith.mulf %1153, %1119 : vector<8x16xf32>
    %1155 = vector.extract_strided_slice %1154 {offsets = [0, 0], sizes = [8, 4], strides = [1, 1]} : vector<8x16xf32> to vector<8x4xf32>
    %1156 = vector.extract_strided_slice %1154 {offsets = [0, 4], sizes = [8, 4], strides = [1, 1]} : vector<8x16xf32> to vector<8x4xf32>
    %1157 = arith.addf %1155, %1156 : vector<8x4xf32>
    %1158 = vector.extract_strided_slice %1154 {offsets = [0, 8], sizes = [8, 4], strides = [1, 1]} : vector<8x16xf32> to vector<8x4xf32>
    %1159 = arith.addf %1157, %1158 : vector<8x4xf32>
    %1160 = vector.extract_strided_slice %1154 {offsets = [0, 12], sizes = [8, 4], strides = [1, 1]} : vector<8x16xf32> to vector<8x4xf32>
    %1161 = arith.addf %1159, %1160 : vector<8x4xf32>
    %1162 = arith.subf %1062, %1111 : vector<8x4xf32>
    %1163 = arith.addf %1162, %1161 : vector<8x4xf32>
    %1164 = arith.addf %1016, %1163 : vector<8x4xf32>
    %c6_258 = arith.constant 6 : index
    %c3_259 = arith.constant 3 : index
    %c0_260 = arith.constant 0 : index
    %c0_261 = arith.constant 0 : index
    %1165 = vector.load %arg2[%c6_258, %c3_259, %c0_260, %c0_261] : memref<8x4x1x32xf32, #tpu.memory_space<vmem>>, vector<1x1x1x32xf32>
    %1166 = vector.shape_cast %1165 : vector<1x1x1x32xf32> to vector<1x32xf32>
    %c6_262 = arith.constant 6 : index
    %c3_263 = arith.constant 3 : index
    %c0_264 = arith.constant 0 : index
    %c0_265 = arith.constant 0 : index
    %1167 = vector.load %arg3[%c6_262, %c3_263, %c0_264, %c0_265] : memref<8x4x8x16xf32, #tpu.memory_space<vmem>>, vector<1x1x8x16xf32>
    %1168 = vector.shape_cast %1167 : vector<1x1x8x16xf32> to vector<8x16xf32>
    %1169 = vector.broadcast %1166 : vector<1x32xf32> to vector<8x32xf32>
    %1170 = arith.addf %1169, %0 : vector<8x32xf32>
    %1171 = vector.extract_strided_slice %1164 {offsets = [0, 0], sizes = [8, 1], strides = [1, 1]} : vector<8x4xf32> to vector<8x1xf32>
    %1172 = vector.extract_strided_slice %1 {offsets = [0, 0], sizes = [1, 32], strides = [1, 1]} : vector<4x32xf32> to vector<1x32xf32>
    %1173 = vector.broadcast %1171 : vector<8x1xf32> to vector<8x32xf32>
    %1174 = vector.broadcast %1172 : vector<1x32xf32> to vector<8x32xf32>
    %1175 = arith.mulf %1173, %1174 : vector<8x32xf32>
    %1176 = arith.addf %1170, %1175 : vector<8x32xf32>
    %1177 = vector.extract_strided_slice %1164 {offsets = [0, 1], sizes = [8, 1], strides = [1, 1]} : vector<8x4xf32> to vector<8x1xf32>
    %1178 = vector.extract_strided_slice %1 {offsets = [1, 0], sizes = [1, 32], strides = [1, 1]} : vector<4x32xf32> to vector<1x32xf32>
    %1179 = vector.broadcast %1177 : vector<8x1xf32> to vector<8x32xf32>
    %1180 = vector.broadcast %1178 : vector<1x32xf32> to vector<8x32xf32>
    %1181 = arith.mulf %1179, %1180 : vector<8x32xf32>
    %1182 = arith.addf %1176, %1181 : vector<8x32xf32>
    %1183 = vector.extract_strided_slice %1164 {offsets = [0, 2], sizes = [8, 1], strides = [1, 1]} : vector<8x4xf32> to vector<8x1xf32>
    %1184 = vector.extract_strided_slice %1 {offsets = [2, 0], sizes = [1, 32], strides = [1, 1]} : vector<4x32xf32> to vector<1x32xf32>
    %1185 = vector.broadcast %1183 : vector<8x1xf32> to vector<8x32xf32>
    %1186 = vector.broadcast %1184 : vector<1x32xf32> to vector<8x32xf32>
    %1187 = arith.mulf %1185, %1186 : vector<8x32xf32>
    %1188 = arith.addf %1182, %1187 : vector<8x32xf32>
    %1189 = vector.extract_strided_slice %1164 {offsets = [0, 3], sizes = [8, 1], strides = [1, 1]} : vector<8x4xf32> to vector<8x1xf32>
    %1190 = vector.extract_strided_slice %1 {offsets = [3, 0], sizes = [1, 32], strides = [1, 1]} : vector<4x32xf32> to vector<1x32xf32>
    %1191 = vector.broadcast %1189 : vector<8x1xf32> to vector<8x32xf32>
    %1192 = vector.broadcast %1190 : vector<1x32xf32> to vector<8x32xf32>
    %1193 = arith.mulf %1191, %1192 : vector<8x32xf32>
    %1194 = arith.addf %1188, %1193 : vector<8x32xf32>
    %1195 = math.tanh %1194 : vector<8x32xf32>
    %cst_266 = arith.constant dense<0.000000e+00> : vector<8x32xf32>
    %1196 = tpu.matmul %1195, %2, %cst_266 {dimension_numbers = #tpu.dot_dimension_numbers<[1], [0], [0], [1], [0, 0, 1, 1], [], []>} : vector<8x32xf32>, vector<32x32xf32>, vector<8x32xf32> -> vector<8x32xf32>
    %1197 = vector.broadcast %3 : vector<1x32xf32> to vector<8x32xf32>
    %1198 = arith.addf %1196, %1197 : vector<8x32xf32>
    %1199 = math.tanh %1198 : vector<8x32xf32>
    %cst_267 = arith.constant dense<0.000000e+00> : vector<8x16xf32>
    %1200 = tpu.matmul %1199, %4, %cst_267 {dimension_numbers = #tpu.dot_dimension_numbers<[1], [0], [0], [1], [0, 0, 1, 1], [], []>} : vector<8x32xf32>, vector<32x16xf32>, vector<8x16xf32> -> vector<8x16xf32>
    %1201 = vector.broadcast %5 : vector<1x16xf32> to vector<8x16xf32>
    %1202 = arith.addf %1200, %1201 : vector<8x16xf32>
    %1203 = arith.mulf %1202, %1168 : vector<8x16xf32>
    %1204 = vector.extract_strided_slice %1203 {offsets = [0, 0], sizes = [8, 4], strides = [1, 1]} : vector<8x16xf32> to vector<8x4xf32>
    %1205 = vector.extract_strided_slice %1203 {offsets = [0, 4], sizes = [8, 4], strides = [1, 1]} : vector<8x16xf32> to vector<8x4xf32>
    %1206 = arith.addf %1204, %1205 : vector<8x4xf32>
    %1207 = vector.extract_strided_slice %1203 {offsets = [0, 8], sizes = [8, 4], strides = [1, 1]} : vector<8x16xf32> to vector<8x4xf32>
    %1208 = arith.addf %1206, %1207 : vector<8x4xf32>
    %1209 = vector.extract_strided_slice %1203 {offsets = [0, 12], sizes = [8, 4], strides = [1, 1]} : vector<8x16xf32> to vector<8x4xf32>
    %1210 = arith.addf %1208, %1209 : vector<8x4xf32>
    %1211 = arith.addf %1111, %1161 : vector<8x4xf32>
    %cst_268 = arith.constant 3.000000e+00 : f32
    %1212 = vector.broadcast %cst_268 : f32 to vector<8x4xf32>
    %1213 = arith.mulf %1212, %1211 : vector<8x4xf32>
    %1214 = arith.addf %1062, %1213 : vector<8x4xf32>
    %1215 = arith.addf %1214, %1210 : vector<8x4xf32>
    %cst_269 = arith.constant 1.250000e-01 : f32
    %1216 = vector.broadcast %cst_269 : f32 to vector<8x4xf32>
    %1217 = arith.mulf %1215, %1216 : vector<8x4xf32>
    %1218 = arith.addf %1016, %1217 : vector<8x4xf32>
    %c7 = arith.constant 7 : index
    %c0_270 = arith.constant 0 : index
    %c0_271 = arith.constant 0 : index
    %c0_272 = arith.constant 0 : index
    %1219 = vector.load %arg2[%c7, %c0_270, %c0_271, %c0_272] : memref<8x4x1x32xf32, #tpu.memory_space<vmem>>, vector<1x1x1x32xf32>
    %1220 = vector.shape_cast %1219 : vector<1x1x1x32xf32> to vector<1x32xf32>
    %c7_273 = arith.constant 7 : index
    %c0_274 = arith.constant 0 : index
    %c0_275 = arith.constant 0 : index
    %c0_276 = arith.constant 0 : index
    %1221 = vector.load %arg3[%c7_273, %c0_274, %c0_275, %c0_276] : memref<8x4x8x16xf32, #tpu.memory_space<vmem>>, vector<1x1x8x16xf32>
    %1222 = vector.shape_cast %1221 : vector<1x1x8x16xf32> to vector<8x16xf32>
    %1223 = vector.broadcast %1220 : vector<1x32xf32> to vector<8x32xf32>
    %1224 = arith.addf %1223, %0 : vector<8x32xf32>
    %1225 = vector.extract_strided_slice %1218 {offsets = [0, 0], sizes = [8, 1], strides = [1, 1]} : vector<8x4xf32> to vector<8x1xf32>
    %1226 = vector.extract_strided_slice %1 {offsets = [0, 0], sizes = [1, 32], strides = [1, 1]} : vector<4x32xf32> to vector<1x32xf32>
    %1227 = vector.broadcast %1225 : vector<8x1xf32> to vector<8x32xf32>
    %1228 = vector.broadcast %1226 : vector<1x32xf32> to vector<8x32xf32>
    %1229 = arith.mulf %1227, %1228 : vector<8x32xf32>
    %1230 = arith.addf %1224, %1229 : vector<8x32xf32>
    %1231 = vector.extract_strided_slice %1218 {offsets = [0, 1], sizes = [8, 1], strides = [1, 1]} : vector<8x4xf32> to vector<8x1xf32>
    %1232 = vector.extract_strided_slice %1 {offsets = [1, 0], sizes = [1, 32], strides = [1, 1]} : vector<4x32xf32> to vector<1x32xf32>
    %1233 = vector.broadcast %1231 : vector<8x1xf32> to vector<8x32xf32>
    %1234 = vector.broadcast %1232 : vector<1x32xf32> to vector<8x32xf32>
    %1235 = arith.mulf %1233, %1234 : vector<8x32xf32>
    %1236 = arith.addf %1230, %1235 : vector<8x32xf32>
    %1237 = vector.extract_strided_slice %1218 {offsets = [0, 2], sizes = [8, 1], strides = [1, 1]} : vector<8x4xf32> to vector<8x1xf32>
    %1238 = vector.extract_strided_slice %1 {offsets = [2, 0], sizes = [1, 32], strides = [1, 1]} : vector<4x32xf32> to vector<1x32xf32>
    %1239 = vector.broadcast %1237 : vector<8x1xf32> to vector<8x32xf32>
    %1240 = vector.broadcast %1238 : vector<1x32xf32> to vector<8x32xf32>
    %1241 = arith.mulf %1239, %1240 : vector<8x32xf32>
    %1242 = arith.addf %1236, %1241 : vector<8x32xf32>
    %1243 = vector.extract_strided_slice %1218 {offsets = [0, 3], sizes = [8, 1], strides = [1, 1]} : vector<8x4xf32> to vector<8x1xf32>
    %1244 = vector.extract_strided_slice %1 {offsets = [3, 0], sizes = [1, 32], strides = [1, 1]} : vector<4x32xf32> to vector<1x32xf32>
    %1245 = vector.broadcast %1243 : vector<8x1xf32> to vector<8x32xf32>
    %1246 = vector.broadcast %1244 : vector<1x32xf32> to vector<8x32xf32>
    %1247 = arith.mulf %1245, %1246 : vector<8x32xf32>
    %1248 = arith.addf %1242, %1247 : vector<8x32xf32>
    %1249 = math.tanh %1248 : vector<8x32xf32>
    %cst_277 = arith.constant dense<0.000000e+00> : vector<8x32xf32>
    %1250 = tpu.matmul %1249, %2, %cst_277 {dimension_numbers = #tpu.dot_dimension_numbers<[1], [0], [0], [1], [0, 0, 1, 1], [], []>} : vector<8x32xf32>, vector<32x32xf32>, vector<8x32xf32> -> vector<8x32xf32>
    %1251 = vector.broadcast %3 : vector<1x32xf32> to vector<8x32xf32>
    %1252 = arith.addf %1250, %1251 : vector<8x32xf32>
    %1253 = math.tanh %1252 : vector<8x32xf32>
    %cst_278 = arith.constant dense<0.000000e+00> : vector<8x16xf32>
    %1254 = tpu.matmul %1253, %4, %cst_278 {dimension_numbers = #tpu.dot_dimension_numbers<[1], [0], [0], [1], [0, 0, 1, 1], [], []>} : vector<8x32xf32>, vector<32x16xf32>, vector<8x16xf32> -> vector<8x16xf32>
    %1255 = vector.broadcast %5 : vector<1x16xf32> to vector<8x16xf32>
    %1256 = arith.addf %1254, %1255 : vector<8x16xf32>
    %1257 = arith.mulf %1256, %1222 : vector<8x16xf32>
    %1258 = vector.extract_strided_slice %1257 {offsets = [0, 0], sizes = [8, 4], strides = [1, 1]} : vector<8x16xf32> to vector<8x4xf32>
    %1259 = vector.extract_strided_slice %1257 {offsets = [0, 4], sizes = [8, 4], strides = [1, 1]} : vector<8x16xf32> to vector<8x4xf32>
    %1260 = arith.addf %1258, %1259 : vector<8x4xf32>
    %1261 = vector.extract_strided_slice %1257 {offsets = [0, 8], sizes = [8, 4], strides = [1, 1]} : vector<8x16xf32> to vector<8x4xf32>
    %1262 = arith.addf %1260, %1261 : vector<8x4xf32>
    %1263 = vector.extract_strided_slice %1257 {offsets = [0, 12], sizes = [8, 4], strides = [1, 1]} : vector<8x16xf32> to vector<8x4xf32>
    %1264 = arith.addf %1262, %1263 : vector<8x4xf32>
    %cst_279 = arith.constant 0.333333343 : f32
    %1265 = vector.broadcast %cst_279 : f32 to vector<8x4xf32>
    %1266 = arith.mulf %1264, %1265 : vector<8x4xf32>
    %1267 = arith.addf %1218, %1266 : vector<8x4xf32>
    %c7_280 = arith.constant 7 : index
    %c1_281 = arith.constant 1 : index
    %c0_282 = arith.constant 0 : index
    %c0_283 = arith.constant 0 : index
    %1268 = vector.load %arg2[%c7_280, %c1_281, %c0_282, %c0_283] : memref<8x4x1x32xf32, #tpu.memory_space<vmem>>, vector<1x1x1x32xf32>
    %1269 = vector.shape_cast %1268 : vector<1x1x1x32xf32> to vector<1x32xf32>
    %c7_284 = arith.constant 7 : index
    %c1_285 = arith.constant 1 : index
    %c0_286 = arith.constant 0 : index
    %c0_287 = arith.constant 0 : index
    %1270 = vector.load %arg3[%c7_284, %c1_285, %c0_286, %c0_287] : memref<8x4x8x16xf32, #tpu.memory_space<vmem>>, vector<1x1x8x16xf32>
    %1271 = vector.shape_cast %1270 : vector<1x1x8x16xf32> to vector<8x16xf32>
    %1272 = vector.broadcast %1269 : vector<1x32xf32> to vector<8x32xf32>
    %1273 = arith.addf %1272, %0 : vector<8x32xf32>
    %1274 = vector.extract_strided_slice %1267 {offsets = [0, 0], sizes = [8, 1], strides = [1, 1]} : vector<8x4xf32> to vector<8x1xf32>
    %1275 = vector.extract_strided_slice %1 {offsets = [0, 0], sizes = [1, 32], strides = [1, 1]} : vector<4x32xf32> to vector<1x32xf32>
    %1276 = vector.broadcast %1274 : vector<8x1xf32> to vector<8x32xf32>
    %1277 = vector.broadcast %1275 : vector<1x32xf32> to vector<8x32xf32>
    %1278 = arith.mulf %1276, %1277 : vector<8x32xf32>
    %1279 = arith.addf %1273, %1278 : vector<8x32xf32>
    %1280 = vector.extract_strided_slice %1267 {offsets = [0, 1], sizes = [8, 1], strides = [1, 1]} : vector<8x4xf32> to vector<8x1xf32>
    %1281 = vector.extract_strided_slice %1 {offsets = [1, 0], sizes = [1, 32], strides = [1, 1]} : vector<4x32xf32> to vector<1x32xf32>
    %1282 = vector.broadcast %1280 : vector<8x1xf32> to vector<8x32xf32>
    %1283 = vector.broadcast %1281 : vector<1x32xf32> to vector<8x32xf32>
    %1284 = arith.mulf %1282, %1283 : vector<8x32xf32>
    %1285 = arith.addf %1279, %1284 : vector<8x32xf32>
    %1286 = vector.extract_strided_slice %1267 {offsets = [0, 2], sizes = [8, 1], strides = [1, 1]} : vector<8x4xf32> to vector<8x1xf32>
    %1287 = vector.extract_strided_slice %1 {offsets = [2, 0], sizes = [1, 32], strides = [1, 1]} : vector<4x32xf32> to vector<1x32xf32>
    %1288 = vector.broadcast %1286 : vector<8x1xf32> to vector<8x32xf32>
    %1289 = vector.broadcast %1287 : vector<1x32xf32> to vector<8x32xf32>
    %1290 = arith.mulf %1288, %1289 : vector<8x32xf32>
    %1291 = arith.addf %1285, %1290 : vector<8x32xf32>
    %1292 = vector.extract_strided_slice %1267 {offsets = [0, 3], sizes = [8, 1], strides = [1, 1]} : vector<8x4xf32> to vector<8x1xf32>
    %1293 = vector.extract_strided_slice %1 {offsets = [3, 0], sizes = [1, 32], strides = [1, 1]} : vector<4x32xf32> to vector<1x32xf32>
    %1294 = vector.broadcast %1292 : vector<8x1xf32> to vector<8x32xf32>
    %1295 = vector.broadcast %1293 : vector<1x32xf32> to vector<8x32xf32>
    %1296 = arith.mulf %1294, %1295 : vector<8x32xf32>
    %1297 = arith.addf %1291, %1296 : vector<8x32xf32>
    %1298 = math.tanh %1297 : vector<8x32xf32>
    %cst_288 = arith.constant dense<0.000000e+00> : vector<8x32xf32>
    %1299 = tpu.matmul %1298, %2, %cst_288 {dimension_numbers = #tpu.dot_dimension_numbers<[1], [0], [0], [1], [0, 0, 1, 1], [], []>} : vector<8x32xf32>, vector<32x32xf32>, vector<8x32xf32> -> vector<8x32xf32>
    %1300 = vector.broadcast %3 : vector<1x32xf32> to vector<8x32xf32>
    %1301 = arith.addf %1299, %1300 : vector<8x32xf32>
    %1302 = math.tanh %1301 : vector<8x32xf32>
    %cst_289 = arith.constant dense<0.000000e+00> : vector<8x16xf32>
    %1303 = tpu.matmul %1302, %4, %cst_289 {dimension_numbers = #tpu.dot_dimension_numbers<[1], [0], [0], [1], [0, 0, 1, 1], [], []>} : vector<8x32xf32>, vector<32x16xf32>, vector<8x16xf32> -> vector<8x16xf32>
    %1304 = vector.broadcast %5 : vector<1x16xf32> to vector<8x16xf32>
    %1305 = arith.addf %1303, %1304 : vector<8x16xf32>
    %1306 = arith.mulf %1305, %1271 : vector<8x16xf32>
    %1307 = vector.extract_strided_slice %1306 {offsets = [0, 0], sizes = [8, 4], strides = [1, 1]} : vector<8x16xf32> to vector<8x4xf32>
    %1308 = vector.extract_strided_slice %1306 {offsets = [0, 4], sizes = [8, 4], strides = [1, 1]} : vector<8x16xf32> to vector<8x4xf32>
    %1309 = arith.addf %1307, %1308 : vector<8x4xf32>
    %1310 = vector.extract_strided_slice %1306 {offsets = [0, 8], sizes = [8, 4], strides = [1, 1]} : vector<8x16xf32> to vector<8x4xf32>
    %1311 = arith.addf %1309, %1310 : vector<8x4xf32>
    %1312 = vector.extract_strided_slice %1306 {offsets = [0, 12], sizes = [8, 4], strides = [1, 1]} : vector<8x16xf32> to vector<8x4xf32>
    %1313 = arith.addf %1311, %1312 : vector<8x4xf32>
    %cst_290 = arith.constant 0.333333343 : f32
    %1314 = vector.broadcast %cst_290 : f32 to vector<8x4xf32>
    %1315 = arith.mulf %1264, %1314 : vector<8x4xf32>
    %1316 = arith.subf %1313, %1315 : vector<8x4xf32>
    %1317 = arith.addf %1218, %1316 : vector<8x4xf32>
    %c7_291 = arith.constant 7 : index
    %c2_292 = arith.constant 2 : index
    %c0_293 = arith.constant 0 : index
    %c0_294 = arith.constant 0 : index
    %1318 = vector.load %arg2[%c7_291, %c2_292, %c0_293, %c0_294] : memref<8x4x1x32xf32, #tpu.memory_space<vmem>>, vector<1x1x1x32xf32>
    %1319 = vector.shape_cast %1318 : vector<1x1x1x32xf32> to vector<1x32xf32>
    %c7_295 = arith.constant 7 : index
    %c2_296 = arith.constant 2 : index
    %c0_297 = arith.constant 0 : index
    %c0_298 = arith.constant 0 : index
    %1320 = vector.load %arg3[%c7_295, %c2_296, %c0_297, %c0_298] : memref<8x4x8x16xf32, #tpu.memory_space<vmem>>, vector<1x1x8x16xf32>
    %1321 = vector.shape_cast %1320 : vector<1x1x8x16xf32> to vector<8x16xf32>
    %1322 = vector.broadcast %1319 : vector<1x32xf32> to vector<8x32xf32>
    %1323 = arith.addf %1322, %0 : vector<8x32xf32>
    %1324 = vector.extract_strided_slice %1317 {offsets = [0, 0], sizes = [8, 1], strides = [1, 1]} : vector<8x4xf32> to vector<8x1xf32>
    %1325 = vector.extract_strided_slice %1 {offsets = [0, 0], sizes = [1, 32], strides = [1, 1]} : vector<4x32xf32> to vector<1x32xf32>
    %1326 = vector.broadcast %1324 : vector<8x1xf32> to vector<8x32xf32>
    %1327 = vector.broadcast %1325 : vector<1x32xf32> to vector<8x32xf32>
    %1328 = arith.mulf %1326, %1327 : vector<8x32xf32>
    %1329 = arith.addf %1323, %1328 : vector<8x32xf32>
    %1330 = vector.extract_strided_slice %1317 {offsets = [0, 1], sizes = [8, 1], strides = [1, 1]} : vector<8x4xf32> to vector<8x1xf32>
    %1331 = vector.extract_strided_slice %1 {offsets = [1, 0], sizes = [1, 32], strides = [1, 1]} : vector<4x32xf32> to vector<1x32xf32>
    %1332 = vector.broadcast %1330 : vector<8x1xf32> to vector<8x32xf32>
    %1333 = vector.broadcast %1331 : vector<1x32xf32> to vector<8x32xf32>
    %1334 = arith.mulf %1332, %1333 : vector<8x32xf32>
    %1335 = arith.addf %1329, %1334 : vector<8x32xf32>
    %1336 = vector.extract_strided_slice %1317 {offsets = [0, 2], sizes = [8, 1], strides = [1, 1]} : vector<8x4xf32> to vector<8x1xf32>
    %1337 = vector.extract_strided_slice %1 {offsets = [2, 0], sizes = [1, 32], strides = [1, 1]} : vector<4x32xf32> to vector<1x32xf32>
    %1338 = vector.broadcast %1336 : vector<8x1xf32> to vector<8x32xf32>
    %1339 = vector.broadcast %1337 : vector<1x32xf32> to vector<8x32xf32>
    %1340 = arith.mulf %1338, %1339 : vector<8x32xf32>
    %1341 = arith.addf %1335, %1340 : vector<8x32xf32>
    %1342 = vector.extract_strided_slice %1317 {offsets = [0, 3], sizes = [8, 1], strides = [1, 1]} : vector<8x4xf32> to vector<8x1xf32>
    %1343 = vector.extract_strided_slice %1 {offsets = [3, 0], sizes = [1, 32], strides = [1, 1]} : vector<4x32xf32> to vector<1x32xf32>
    %1344 = vector.broadcast %1342 : vector<8x1xf32> to vector<8x32xf32>
    %1345 = vector.broadcast %1343 : vector<1x32xf32> to vector<8x32xf32>
    %1346 = arith.mulf %1344, %1345 : vector<8x32xf32>
    %1347 = arith.addf %1341, %1346 : vector<8x32xf32>
    %1348 = math.tanh %1347 : vector<8x32xf32>
    %cst_299 = arith.constant dense<0.000000e+00> : vector<8x32xf32>
    %1349 = tpu.matmul %1348, %2, %cst_299 {dimension_numbers = #tpu.dot_dimension_numbers<[1], [0], [0], [1], [0, 0, 1, 1], [], []>} : vector<8x32xf32>, vector<32x32xf32>, vector<8x32xf32> -> vector<8x32xf32>
    %1350 = vector.broadcast %3 : vector<1x32xf32> to vector<8x32xf32>
    %1351 = arith.addf %1349, %1350 : vector<8x32xf32>
    %1352 = math.tanh %1351 : vector<8x32xf32>
    %cst_300 = arith.constant dense<0.000000e+00> : vector<8x16xf32>
    %1353 = tpu.matmul %1352, %4, %cst_300 {dimension_numbers = #tpu.dot_dimension_numbers<[1], [0], [0], [1], [0, 0, 1, 1], [], []>} : vector<8x32xf32>, vector<32x16xf32>, vector<8x16xf32> -> vector<8x16xf32>
    %1354 = vector.broadcast %5 : vector<1x16xf32> to vector<8x16xf32>
    %1355 = arith.addf %1353, %1354 : vector<8x16xf32>
    %1356 = arith.mulf %1355, %1321 : vector<8x16xf32>
    %1357 = vector.extract_strided_slice %1356 {offsets = [0, 0], sizes = [8, 4], strides = [1, 1]} : vector<8x16xf32> to vector<8x4xf32>
    %1358 = vector.extract_strided_slice %1356 {offsets = [0, 4], sizes = [8, 4], strides = [1, 1]} : vector<8x16xf32> to vector<8x4xf32>
    %1359 = arith.addf %1357, %1358 : vector<8x4xf32>
    %1360 = vector.extract_strided_slice %1356 {offsets = [0, 8], sizes = [8, 4], strides = [1, 1]} : vector<8x16xf32> to vector<8x4xf32>
    %1361 = arith.addf %1359, %1360 : vector<8x4xf32>
    %1362 = vector.extract_strided_slice %1356 {offsets = [0, 12], sizes = [8, 4], strides = [1, 1]} : vector<8x16xf32> to vector<8x4xf32>
    %1363 = arith.addf %1361, %1362 : vector<8x4xf32>
    %1364 = arith.subf %1264, %1313 : vector<8x4xf32>
    %1365 = arith.addf %1364, %1363 : vector<8x4xf32>
    %1366 = arith.addf %1218, %1365 : vector<8x4xf32>
    %c7_301 = arith.constant 7 : index
    %c3_302 = arith.constant 3 : index
    %c0_303 = arith.constant 0 : index
    %c0_304 = arith.constant 0 : index
    %1367 = vector.load %arg2[%c7_301, %c3_302, %c0_303, %c0_304] : memref<8x4x1x32xf32, #tpu.memory_space<vmem>>, vector<1x1x1x32xf32>
    %1368 = vector.shape_cast %1367 : vector<1x1x1x32xf32> to vector<1x32xf32>
    %c7_305 = arith.constant 7 : index
    %c3_306 = arith.constant 3 : index
    %c0_307 = arith.constant 0 : index
    %c0_308 = arith.constant 0 : index
    %1369 = vector.load %arg3[%c7_305, %c3_306, %c0_307, %c0_308] : memref<8x4x8x16xf32, #tpu.memory_space<vmem>>, vector<1x1x8x16xf32>
    %1370 = vector.shape_cast %1369 : vector<1x1x8x16xf32> to vector<8x16xf32>
    %1371 = vector.broadcast %1368 : vector<1x32xf32> to vector<8x32xf32>
    %1372 = arith.addf %1371, %0 : vector<8x32xf32>
    %1373 = vector.extract_strided_slice %1366 {offsets = [0, 0], sizes = [8, 1], strides = [1, 1]} : vector<8x4xf32> to vector<8x1xf32>
    %1374 = vector.extract_strided_slice %1 {offsets = [0, 0], sizes = [1, 32], strides = [1, 1]} : vector<4x32xf32> to vector<1x32xf32>
    %1375 = vector.broadcast %1373 : vector<8x1xf32> to vector<8x32xf32>
    %1376 = vector.broadcast %1374 : vector<1x32xf32> to vector<8x32xf32>
    %1377 = arith.mulf %1375, %1376 : vector<8x32xf32>
    %1378 = arith.addf %1372, %1377 : vector<8x32xf32>
    %1379 = vector.extract_strided_slice %1366 {offsets = [0, 1], sizes = [8, 1], strides = [1, 1]} : vector<8x4xf32> to vector<8x1xf32>
    %1380 = vector.extract_strided_slice %1 {offsets = [1, 0], sizes = [1, 32], strides = [1, 1]} : vector<4x32xf32> to vector<1x32xf32>
    %1381 = vector.broadcast %1379 : vector<8x1xf32> to vector<8x32xf32>
    %1382 = vector.broadcast %1380 : vector<1x32xf32> to vector<8x32xf32>
    %1383 = arith.mulf %1381, %1382 : vector<8x32xf32>
    %1384 = arith.addf %1378, %1383 : vector<8x32xf32>
    %1385 = vector.extract_strided_slice %1366 {offsets = [0, 2], sizes = [8, 1], strides = [1, 1]} : vector<8x4xf32> to vector<8x1xf32>
    %1386 = vector.extract_strided_slice %1 {offsets = [2, 0], sizes = [1, 32], strides = [1, 1]} : vector<4x32xf32> to vector<1x32xf32>
    %1387 = vector.broadcast %1385 : vector<8x1xf32> to vector<8x32xf32>
    %1388 = vector.broadcast %1386 : vector<1x32xf32> to vector<8x32xf32>
    %1389 = arith.mulf %1387, %1388 : vector<8x32xf32>
    %1390 = arith.addf %1384, %1389 : vector<8x32xf32>
    %1391 = vector.extract_strided_slice %1366 {offsets = [0, 3], sizes = [8, 1], strides = [1, 1]} : vector<8x4xf32> to vector<8x1xf32>
    %1392 = vector.extract_strided_slice %1 {offsets = [3, 0], sizes = [1, 32], strides = [1, 1]} : vector<4x32xf32> to vector<1x32xf32>
    %1393 = vector.broadcast %1391 : vector<8x1xf32> to vector<8x32xf32>
    %1394 = vector.broadcast %1392 : vector<1x32xf32> to vector<8x32xf32>
    %1395 = arith.mulf %1393, %1394 : vector<8x32xf32>
    %1396 = arith.addf %1390, %1395 : vector<8x32xf32>
    %1397 = math.tanh %1396 : vector<8x32xf32>
    %cst_309 = arith.constant dense<0.000000e+00> : vector<8x32xf32>
    %1398 = tpu.matmul %1397, %2, %cst_309 {dimension_numbers = #tpu.dot_dimension_numbers<[1], [0], [0], [1], [0, 0, 1, 1], [], []>} : vector<8x32xf32>, vector<32x32xf32>, vector<8x32xf32> -> vector<8x32xf32>
    %1399 = vector.broadcast %3 : vector<1x32xf32> to vector<8x32xf32>
    %1400 = arith.addf %1398, %1399 : vector<8x32xf32>
    %1401 = math.tanh %1400 : vector<8x32xf32>
    %cst_310 = arith.constant dense<0.000000e+00> : vector<8x16xf32>
    %1402 = tpu.matmul %1401, %4, %cst_310 {dimension_numbers = #tpu.dot_dimension_numbers<[1], [0], [0], [1], [0, 0, 1, 1], [], []>} : vector<8x32xf32>, vector<32x16xf32>, vector<8x16xf32> -> vector<8x16xf32>
    %1403 = vector.broadcast %5 : vector<1x16xf32> to vector<8x16xf32>
    %1404 = arith.addf %1402, %1403 : vector<8x16xf32>
    %1405 = arith.mulf %1404, %1370 : vector<8x16xf32>
    %1406 = vector.extract_strided_slice %1405 {offsets = [0, 0], sizes = [8, 4], strides = [1, 1]} : vector<8x16xf32> to vector<8x4xf32>
    %1407 = vector.extract_strided_slice %1405 {offsets = [0, 4], sizes = [8, 4], strides = [1, 1]} : vector<8x16xf32> to vector<8x4xf32>
    %1408 = arith.addf %1406, %1407 : vector<8x4xf32>
    %1409 = vector.extract_strided_slice %1405 {offsets = [0, 8], sizes = [8, 4], strides = [1, 1]} : vector<8x16xf32> to vector<8x4xf32>
    %1410 = arith.addf %1408, %1409 : vector<8x4xf32>
    %1411 = vector.extract_strided_slice %1405 {offsets = [0, 12], sizes = [8, 4], strides = [1, 1]} : vector<8x16xf32> to vector<8x4xf32>
    %1412 = arith.addf %1410, %1411 : vector<8x4xf32>
    %1413 = arith.addf %1313, %1363 : vector<8x4xf32>
    %cst_311 = arith.constant 3.000000e+00 : f32
    %1414 = vector.broadcast %cst_311 : f32 to vector<8x4xf32>
    %1415 = arith.mulf %1414, %1413 : vector<8x4xf32>
    %1416 = arith.addf %1264, %1415 : vector<8x4xf32>
    %1417 = arith.addf %1416, %1412 : vector<8x4xf32>
    %cst_312 = arith.constant 1.250000e-01 : f32
    %1418 = vector.broadcast %cst_312 : f32 to vector<8x4xf32>
    %1419 = arith.mulf %1417, %1418 : vector<8x4xf32>
    %1420 = arith.addf %1218, %1419 : vector<8x4xf32>
    %1421 = tpu.concatenate %6, %208, %410, %612, %814, %1016, %1218, %1420 in 1 : vector<8x4xf32>, vector<8x4xf32>, vector<8x4xf32>, vector<8x4xf32>, vector<8x4xf32>, vector<8x4xf32>, vector<8x4xf32>, vector<8x4xf32> -> vector<8x32xf32>
    %c0_313 = arith.constant 0 : index
    %c0_314 = arith.constant 0 : index
    %1422 = vector.load %arg9[%c0_313, %c0_314] : memref<8x32xf32, #tpu.memory_space<vmem>>, vector<8x32xf32>
    tpu.vector_store %arg9[%c0_313, %c0_314], %1421 {strides = array<i32>} : memref<8x32xf32, #tpu.memory_space<vmem>>, vector<8x32xf32>,
    return
  }
}

</mosaic_0001>

<bundles_post_ra>
// kernel: tpu_custom_call.1
= control target key start
LH: loop header
LB: loop body
LE: loop exit
PB: predicated region body
PF: predicated region fallthrough
CT: control target
= control target key end

     0   :  { %14 = vsyncpa [#allocation3], 0  ;;  %s8735_s0 = inlined_call_operand.vmem [shape: f32[8,4], index: 0, kind: input, shape index: {}]   ;;  %s8736_s1 = inlined_call_operand.hbm [shape: f32[8,32], index: 1, kind: input, shape index: {}]   ;;  %s8737_s2 = inlined_call_operand.vmem [shape: f32[8,4,1,32], index: 2, kind: input, shape index: {}]   ;;  %s8738_s3 = inlined_call_operand.hbm [shape: f32[8,4,8,16], index: 3, kind: input, shape index: {}]   ;;  %s8739_s4 = inlined_call_operand.hbm [shape: f32[4,32], index: 4, kind: input, shape index: {}]   ;;  %s8740_s5 = inlined_call_operand.vmem [shape: f32[32,32], index: 5, kind: input, shape index: {}]   ;;  %s8741_s6 = inlined_call_operand.vmem [shape: f32[1,32], index: 6, kind: input, shape index: {}]   ;;  %s8742_s7 = inlined_call_operand.vmem [shape: f32[32,16], index: 7, kind: input, shape index: {}]   ;;  %s8743_s8 = inlined_call_operand.vmem [shape: f32[1,16], index: 8, kind: input, shape index: {}]   ;;  %s8744_s9 = inlined_call_operand.hbm [shape: f32[8,32], index: 9, kind: output, shape index: {}]  }
   0x1   :  { %15 = vsyncpa [#allocation6], 0 }
   0x2   :  { %16 = vsyncpa [#allocation4], 0  ;;  %s7162_s30 = smov [#allocation5]  }
   0x3   :  { %s36_s10 = sshll.u32 %s7162_s30, 4  ;;  %s37_s10 = int_to_ptr.vmem [resolvable:$true] %s36_s10 }
   0x4   :  { %s7084_s11 = scalar_lea.vmem %s37_s10, 4096  ;;  %p7089_p1 = scmp.lt.s32.totalorder %s37_s10, %s37_s10 }
   0x5   :  { %p7085_p0 = scmp.ne.s32.totalorder %s37_s10, %s7084_s11  ;;  %p7090_p2 = scmp.lt.s32.totalorder %s7084_s11, %s7084_s11 }
   0x7   :  { %p7091_p3 = por %p7090_p2, %p7089_p1 }
   0x9   :  { %p7092_p4 = pnand %p7091_p3, %p7085_p0 }
   0xb   :  { %7095 = shalt.err (!%p7092_p4)
}
   0xc   :  { %s7163_s12 = smov 128   ;;  %s7164_s13 = smov 8  }
   0xd   :  { %42 = dma.hbm_to_vmem [thread:$0]  %s8738_s3, 4096, %s37_s10, [#allocation6], %s7163_s12, %s7163_s12, %s7164_s13  }
   0xe   :  { %s7165_s16 = smov [#allocation2]   ;;  %s7166_s18 = smov [#allocation7]  }
   0xf   :  { %s25_s17 = sshll.u32 %s7165_s16, 4  ;;  %s49_s19 = sshll.u32 %s7166_s18, 4  ;;  %s26_s17 = int_to_ptr.vmem [resolvable:$true] %s25_s17  ;;  %s50_s19 = int_to_ptr.vmem [resolvable:$true] %s49_s19 }
  0x10   :  { %s7104_s20 = scalar_lea.vmem %s26_s17, 128  ;;  %p7109_p6 = scmp.lt.s32.totalorder %s26_s17, %s26_s17 }
  0x11   :  { %p7105_p5 = scmp.ne.s32.totalorder %s26_s17, %s7104_s20  ;;  %p7110_p7 = scmp.lt.s32.totalorder %s7104_s20, %s7104_s20 }
  0x13   :  { %p7111_p8 = por %p7110_p7, %p7109_p6 }
  0x15   :  { %p7112_p9 = pnand %p7111_p8, %p7105_p5 }
  0x17   :  { %7115 = shalt.err (!%p7112_p9)
}
  0x18   :  { %28 = dma.hbm_to_vmem [thread:$0]  %s8736_s1, 128, %s26_s17, [#allocation3]  }
  0x19   :  { %s7124_s23 = scalar_lea.vmem %s50_s19, 64  ;;  %p7129_p11 = scmp.lt.s32.totalorder %s50_s19, %s50_s19 }
  0x1a   :  { %p7125_p10 = scmp.ne.s32.totalorder %s50_s19, %s7124_s23  ;;  %p7130_p12 = scmp.lt.s32.totalorder %s7124_s23, %s7124_s23 }
  0x1c   :  { %p7131_p13 = por %p7130_p12, %p7129_p11 }
  0x1e   :  { %p7132_p0 = pnand %p7131_p13, %p7125_p10 }
  0x20   :  { %7135 = shalt.err (!%p7132_p0)
}
  0x21   :  { %52 = dma.hbm_to_vmem [thread:$0]  %s8739_s4, 64, %s50_s19, [#allocation6]  }
  0x22   :  { %7156 = dma.done.wait [#allocation3], 128  }
  0x23   :  { %7157 = vsyncadd [#allocation3], 4294967168 }
  0x24   :  { %7158 = dma.done.wait [#allocation6], 4160  }
  0x25   :  { %7159 = vsyncadd [#allocation6], 4294963136  ;;  %v7167_v0 = vmov 0   ;;  %v7168_v1 = vmov 2   ;;  %v7248_v2 = vld [vmem:[%s8735_s0] sm:$0xff]  ;;  %v7169_v3 = vmov 1   ;;  %v99_v10 = vlaneseq }
  0x26   :  { %6831 = vset.pattern.permute.xlu0 %v7167_v0  ;;  %6833 = vset.pattern.permute.xlu1 %v7168_v1  ;;  %v7170_v4 = vmov 3   ;;  %v7259_v5 = vld [vmem:[%s8740_s5 + $0x18] sm:$0xff]  ;;  %v7171_v6 = vmov 0.0   ;;  %v7267_v7 = vld [vmem:[%s8740_s5 + $0x10] sm:$0xff]  ;;  %vm7172_vm0 = vmmov 0   ;;  %v7277_v8 = vld [vmem:[%s8740_s5 + $0x8] sm:$0xff] }
  0x27   :  { %96 = vperm.xlu0 %6831, %v7248_v2   ;;  %116 = vperm.xlu1 %6833, %v7248_v2   ;;  %v7286_v9 = vld [vmem:[%s8740_s5] sm:$0xff]  ;;  %v100_v11 = vshrl.u32 %v99_v10, 7  ;;  %v71_v13 = vld [vmem:[#allocation7] sm:$0xf]  ;;  %vm142_vm1 = vcmask 261120   ;;  %v7324_v37 = vld [vmem:[%s8742_s7 + $0x18] sm:$0xff] }
  0x28   :  { %6194 = vmatprep.subr.mxu0 %v7171_v6  ;;  %6202 = vmatprep.mubr.msk.f32.mxu0 %vm7172_vm0, %v7171_v6  ;;  %v5801_v16 = vld [vmem:[%s8737_s2 + $0x4] ss:$0 sm:$0xff]  ;;  %v7329_v38 = vld [vmem:[%s8742_s7 + $0x10] sm:$0xff]  ;;  %v7336_v39 = vld [vmem:[%s8742_s7 + $0x8] sm:$0xff]  ;;  %s7173_s25 = smov 120   ;;  %s7174_s4 = smov 124  }
  0x29   :  { %6195 = vmatpush3.msra.mxu0 %v7259_v5  ;;  %6205 = vmatprep.subr.mxu1 %v7171_v6  ;;  %v101_v12 = vsub.s32 0, %v100_v11  ;;  %v111_v15 = vsub.s32 1, %v100_v11  ;;  %v7297_v17 = vld [vmem:[#allocation2] sm:$0xff]  ;;  %v121_v19 = vsub.s32 2, %v100_v11  ;;  %v131_v21 = vsub.s32 3, %v100_v11  ;;  %v86_v47 = vld [vmem:[#allocation5 + $0x20] sm:$0xff] }
  0x2a   :  { %6196 = vmatprep.subr.mxu0 %v7171_v6  ;;  %6213 = vmatprep.mubr.msk.f32.mxu1 %vm7172_vm0, %v7171_v6  ;;  %v93_v22 = vadd.f32 %v5801_v16, %v7297_v17  ;;  %v7343_v40 = vld [vmem:[%s8742_s7] sm:$0xff]  ;;  %s7175_s26 = smov 116   ;;  %s7177_s17 = smov 4   ;;  %vm5769_vm2 = vcmask 31744   ;;  %vm5771_vm3 = vcmask 64512   ;;  %vm5773_vm4 = vcmask 97280  }
  0x2b   :  { %6832 = vset.pattern.permute.xlu0 %v7169_v3  ;;  %6834 = vset.pattern.permute.xlu1 %v7170_v4  ;;  %v7292_v14 = vrot.slane %v71_v13, %v101_v12  ;;  %v7301_v24 = vrot.slane %v71_v13, %v111_v15  ;;  %v7303_v25 = vrot.slane %v71_v13, %v121_v19  ;;  %v7352_v41 = vld [vmem:[%s8741_s6] ss:$0 sm:$0xff]  ;;  %v5807_v60 = vld [vmem:[%s8737_s2 + $0x5] ss:$0 sm:$0xff]  ;;  %s7178_s18 = smov 24   ;;  %s7179_s19 = smov 12  }
  0x2c   :  { %106 = vperm.xlu0 %6832, %v7248_v2   ;;  %126 = vperm.xlu1 %6834, %v7248_v2   ;;  %v7305_v26 = vrot.slane %v71_v13, %v131_v21  ;;  %v7369_v46 = vld [vmem:[%s8743_s8] ss:$0 sm:$0xff]  ;;  %v322_v61 = vadd.f32 %v5807_v60, %v7297_v17  ;;  %vm5775_vm5 = vcmask 130048   ;;  %vm5777_vm6 = vcmask 162816   ;;  %s7182_s20 = smov [#allocation8]  }
  0x2d   :  { %6197 = vmatpush3.msra.mxu0 %v7267_v7  ;;  %6206 = vmatpush3.msra.mxu1 %v7324_v37  ;;  %vm5779_vm7 = vcmask 195584   ;;  %vm5781_vm8 = vcmask 228352  }
  0x2e   :  { %6198 = vmatprep.subr.mxu0 %v7171_v6  ;;  %6207 = vmatprep.subr.mxu1 %v7171_v6 }
  0x2f   :  { %6199 = vmatpush3.msra.mxu0 %v7277_v8  ;;  %6208 = vmatpush3.msra.mxu1 %v7329_v38 }
  0x30   :  { %6836 = vset.pattern.permute.xlu1 %v7169_v3  ;;  %6835 = vset.pattern.permute.xlu0 %v7167_v0 }
  0x31   :  { %6200 = vmatprep.subr.mxu0 %v7171_v6  ;;  %6209 = vmatprep.subr.mxu1 %v7171_v6 }
  0x32   :  { %6201 = vmatpush3.msra.mxu0 %v7286_v9  ;;  %6210 = vmatpush3.msra.mxu1 %v7336_v39 }
  0x33   :  { %6216 = vmatprep.subr.mxu0 %v7171_v6  ;;  %6211 = vmatprep.subr.mxu1 %v7171_v6 }
  0x34   :  { %6212 = vmatpush3.msra.mxu1 %v7343_v40 }
  0x35   :  { %6227 = vmatprep.subr.mxu1 %v7171_v6 }
  0xa2   :  { %v97_v18 = vpop.permute.xlu0 %96  ;;  %v117_v20 = vpop.permute.xlu1 %116 }
  0xa3   :  { %v103_v23 = vmul.f32 %v7292_v14, %v97_v18  ;;  %v123_v31 = vmul.f32 %v7303_v25, %v117_v20 }
  0xa5   :  { %v104_v29 = vadd.f32 %v103_v23, %v93_v22 }
  0xa7   :  { %v107_v27 = vpop.permute.xlu0 %106  ;;  %v127_v28 = vpop.permute.xlu1 %126 }
  0xa8   :  { %v113_v30 = vmul.f32 %v7301_v24, %v107_v27  ;;  %v133_v33 = vmul.f32 %v7305_v26, %v127_v28 }
  0xaa   :  { %v114_v32 = vadd.f32 %v113_v30, %v104_v29  ;;  %v315_v30 = vld [vmem:[#allocation5 + $0x28] sm:$0xff] }
  0xac   :  { %v124_v34 = vadd.f32 %v123_v31, %v114_v32 }
  0xae   :  { %v134_v35 = vadd.f32 %v133_v33, %v124_v34 }
  0xb0   :  { %6930 = vtanh.f32 %v134_v35 }
  0xbd   :  { %v6931_v36 = vpop.eup %6930 }
  0xbe   :  { %6203 = vmatmul.mubr.msk.f32.vlgmr.msra.gmra.mxu0 %vm142_vm1, %v6931_v36 }
  0xbf   :  { %6217 = vmatpush3.msra.mxu0 %v7259_v5  ;;  %6224 = vmatprep.mubr.msk.f32.mxu0 %vm7172_vm0, %v7171_v6 }
  0xc0   :  { %6218 = vmatprep.subr.mxu0 %v7171_v6 }
  0xc1   :  { %6219 = vmatpush3.msra.mxu0 %v7267_v7 }
  0xc2   :  { %6220 = vmatprep.subr.mxu0 %v7171_v6 }
  0xc3   :  { %6221 = vmatpush3.msra.mxu0 %v7277_v8 }
  0xc4   :  { %6222 = vmatprep.subr.mxu0 %v7171_v6 }
  0xc5   :  { %6223 = vmatpush3.msra.mxu0 %v7286_v9 }
  0xc6   :  { %6238 = vmatprep.subr.mxu0 %v7171_v6 }
 0x17e   :  { %v212_v42 = vpop.f32.mrf.mxu0 }
 0x17f   :  { %v213_v43 = vadd.f32 %v7352_v41, %v212_v42 }
 0x180   :  { %v6204_v44 = vpop.f32.mrf.mxu0 }
 0x181   :  { %6932 = vtanh.f32 %v213_v43 }
 0x18e   :  { %v6933_v45 = vpop.eup %6932 }
 0x18f   :  { %6214 = vmatmul.mubr.msk.f32.vlgmr.msra.gmra.mxu1 %vm142_vm1, %v6933_v45 }
 0x190   :  { %6228 = vmatpush3.msra.mxu1 %v7324_v37  ;;  %6235 = vmatprep.mubr.msk.f32.mxu1 %vm7172_vm0, %v7171_v6 }
 0x191   :  { %6229 = vmatprep.subr.mxu1 %v7171_v6 }
 0x192   :  { %6230 = vmatpush3.msra.mxu1 %v7329_v38 }
 0x193   :  { %6231 = vmatprep.subr.mxu1 %v7171_v6 }
 0x194   :  { %6232 = vmatpush3.msra.mxu1 %v7336_v39 }
 0x195   :  { %6233 = vmatprep.subr.mxu1 %v7171_v6 }
 0x196   :  { %6234 = vmatpush3.msra.mxu1 %v7343_v40 }
 0x197   :  { %6249 = vmatprep.subr.mxu1 %v7171_v6 }
 0x24f   :  { %v292_v48 = vpop.f32.mrf.mxu1 }
 0x250   :  { %v293_v49 = vadd.f32 %v7369_v46, %v292_v48 }
 0x251   :  { %v6215_v50 = vpop.f32.mrf.mxu1 }
 0x252   :  { %v296_v51 = vmul.f32 %v293_v49, %v86_v47  ;;  %v5811_v49 = vld [vmem:[%s8737_s2 + $0x6] ss:$0 sm:$0xff] }
 0x253   :  { %v522_v50 = vadd.f32 %v5811_v49, %v7297_v17 }
 0x254   :  { %302 = vrot.lane.b32.xlu0 %v296_v51, %s7173_s25  ;;  %298 = vrot.lane.b32.xlu1 %v296_v51, %s7174_s4 }
 0x258   :  { %306 = vrot.lane.b32.xlu1 %v296_v51, %s7175_s26 }
 0x2c6   :  { %v299_v52 = vpop.permute.xlu1 %298  ;;  %v303_v54 = vpop.permute.xlu0 %302 }
 0x2c7   :  { %v301_v53 = vadd.f32 %v299_v52, %v296_v51 }
 0x2c9   :  { %v305_v55 = vadd.f32 %v303_v54, %v301_v53 }
 0x2ca   :  { %v307_v56 = vpop.permute.xlu1 %306 }
 0x2cb   :  { %v7375_v57 = vadd.f32 %v307_v56, %v305_v55 }
 0x2cd   :  { %v7378_v58 = vmul.f32 0.33333334, %v7375_v57 }
 0x2cf   :  { %v311_v59 = vadd.f32 %v7378_v58, %v7248_v2 }
 0x2d1   :  { %331 = vperm.xlu1 %6836, %v311_v59   ;;  %325 = vperm.xlu0 %6835, %v311_v59  }
 0x2d5   :  { %6837 = vset.pattern.permute.xlu1 %v7168_v1  ;;  %6838 = vset.pattern.permute.xlu0 %v7170_v4 }
 0x2d6   :  { %337 = vperm.xlu1 %6837, %v311_v59   ;;  %343 = vperm.xlu0 %6838, %v311_v59  }
 0x2da   :  { %6839 = vset.pattern.permute.xlu1 %v7167_v0  ;;  %6840 = vset.pattern.permute.xlu0 %v7169_v3 }
 0x34c   :  { %v332_v62 = vpop.permute.xlu1 %331  ;;  %v326_v63 = vpop.permute.xlu0 %325 }
 0x34d   :  { %v328_v10 = vmul.f32 %v326_v63, %v7292_v14  ;;  %v334_v11 = vmul.f32 %v332_v62, %v7301_v24 }
 0x34f   :  { %v329_v12 = vadd.f32 %v328_v10, %v322_v61 }
 0x351   :  { %v338_v13 = vpop.permute.xlu1 %337  ;;  %v335_v15 = vadd.f32 %v334_v11, %v329_v12  ;;  %v344_v16 = vpop.permute.xlu0 %343 }
 0x352   :  { %v340_v18 = vmul.f32 %v338_v13, %v7303_v25  ;;  %v346_v20 = vmul.f32 %v344_v16, %v7305_v26  ;;  %v515_v16 = vld [vmem:[#allocation5 + $0x30] sm:$0xff] }
 0x354   :  { %v341_v19 = vadd.f32 %v340_v18, %v335_v15 }
 0x356   :  { %v347_v21 = vadd.f32 %v346_v20, %v341_v19 }
 0x358   :  { %6934 = vtanh.f32 %v347_v21 }
 0x365   :  { %v6935_v22 = vpop.eup %6934 }
 0x366   :  { %6225 = vmatmul.mubr.msk.f32.vlgmr.msra.gmra.mxu0 %vm142_vm1, %v6935_v22 }
 0x367   :  { %6239 = vmatpush3.msra.mxu0 %v7259_v5  ;;  %6246 = vmatprep.mubr.msk.f32.mxu0 %vm7172_vm0, %v7171_v6 }
 0x368   :  { %6240 = vmatprep.subr.mxu0 %v7171_v6 }
 0x369   :  { %6241 = vmatpush3.msra.mxu0 %v7267_v7 }
 0x36a   :  { %6242 = vmatprep.subr.mxu0 %v7171_v6 }
 0x36b   :  { %6243 = vmatpush3.msra.mxu0 %v7277_v8 }
 0x36c   :  { %6244 = vmatprep.subr.mxu0 %v7171_v6 }
 0x36d   :  { %6245 = vmatpush3.msra.mxu0 %v7286_v9 }
 0x36e   :  { %6260 = vmatprep.subr.mxu0 %v7171_v6 }
 0x426   :  { %v418_v23 = vpop.f32.mrf.mxu0 }
 0x427   :  { %v419_v27 = vadd.f32 %v7352_v41, %v418_v23 }
 0x428   :  { %v6226_v28 = vpop.f32.mrf.mxu0 }
 0x429   :  { %6936 = vtanh.f32 %v419_v27 }
 0x436   :  { %v6937_v29 = vpop.eup %6936 }
 0x437   :  { %6236 = vmatmul.mubr.msk.f32.vlgmr.msra.gmra.mxu1 %vm142_vm1, %v6937_v29 }
 0x438   :  { %6250 = vmatpush3.msra.mxu1 %v7324_v37  ;;  %6257 = vmatprep.mubr.msk.f32.mxu1 %vm7172_vm0, %v7171_v6 }
 0x439   :  { %6251 = vmatprep.subr.mxu1 %v7171_v6 }
 0x43a   :  { %6252 = vmatpush3.msra.mxu1 %v7329_v38 }
 0x43b   :  { %6253 = vmatprep.subr.mxu1 %v7171_v6 }
 0x43c   :  { %6254 = vmatpush3.msra.mxu1 %v7336_v39 }
 0x43d   :  { %6255 = vmatprep.subr.mxu1 %v7171_v6 }
 0x43e   :  { %6256 = vmatpush3.msra.mxu1 %v7343_v40 }
 0x43f   :  { %6271 = vmatprep.subr.mxu1 %v7171_v6 }
 0x4f7   :  { %v492_v31 = vpop.f32.mrf.mxu1 }
 0x4f8   :  { %v493_v32 = vadd.f32 %v7369_v46, %v492_v31 }
 0x4f9   :  { %v6237_v33 = vpop.f32.mrf.mxu1 }
 0x4fa   :  { %v496_v34 = vmul.f32 %v493_v32, %v315_v30 }
 0x4fc   :  { %506 = vrot.lane.b32.xlu0 %v496_v34, %s7175_s26  ;;  %498 = vrot.lane.b32.xlu1 %v496_v34, %s7174_s4 }
 0x500   :  { %502 = vrot.lane.b32.xlu1 %v496_v34, %s7173_s25 }
 0x56e   :  { %v499_v35 = vpop.permute.xlu1 %498  ;;  %v507_v44 = vpop.permute.xlu0 %506 }
 0x56f   :  { %v501_v36 = vadd.f32 %v499_v35, %v496_v34  ;;  %v5815_v34 = vld [vmem:[%s8737_s2 + $0x7] ss:$0 sm:$0xff] }
 0x570   :  { %v723_v35 = vadd.f32 %v5815_v34, %v7297_v17 }
 0x572   :  { %v503_v42 = vpop.permute.xlu1 %502 }
 0x573   :  { %v505_v43 = vadd.f32 %v503_v42, %v501_v36 }
 0x575   :  { %v7421_v45 = vadd.f32 %v507_v44, %v505_v43 }
 0x577   :  { %v510_v47 = vsub.f32 %v7421_v45, %v7378_v58  ;;  %v710_v30 = vsub.f32 %v7375_v57, %v7421_v45 }
 0x579   :  { %v511_v48 = vadd.f32 %v510_v47, %v7248_v2 }
 0x57b   :  { %531 = vperm.xlu0 %6840, %v511_v48   ;;  %525 = vperm.xlu1 %6839, %v511_v48  }
 0x57f   :  { %6841 = vset.pattern.permute.xlu1 %v7168_v1 }
 0x580   :  { %537 = vperm.xlu1 %6841, %v511_v48  }
 0x584   :  { %6842 = vset.pattern.permute.xlu1 %v7170_v4 }
 0x585   :  { %543 = vperm.xlu1 %6842, %v511_v48  }
 0x589   :  { %6843 = vset.pattern.permute.xlu1 %v7167_v0 }
 0x5f6   :  { %v526_v51 = vpop.permute.xlu1 %525  ;;  %v532_v53 = vpop.permute.xlu0 %531 }
 0x5f7   :  { %v528_v52 = vmul.f32 %v526_v51, %v7292_v14  ;;  %v534_v55 = vmul.f32 %v532_v53, %v7301_v24 }
 0x5f9   :  { %v529_v54 = vadd.f32 %v528_v52, %v522_v50 }
 0x5fb   :  { %v538_v56 = vpop.permute.xlu1 %537  ;;  %v535_v58 = vadd.f32 %v534_v55, %v529_v54 }
 0x5fc   :  { %v540_v59 = vmul.f32 %v538_v56, %v7303_v25 }
 0x5fe   :  { %v541_v61 = vadd.f32 %v540_v59, %v535_v58 }
 0x600   :  { %v544_v60 = vpop.permute.xlu1 %543 }
 0x601   :  { %v546_v62 = vmul.f32 %v544_v60, %v7305_v26 }
 0x603   :  { %v547_v63 = vadd.f32 %v546_v62, %v541_v61  ;;  %v716_v61 = vld [vmem:[#allocation5 + $0x38] sm:$0xff] }
 0x605   :  { %6938 = vtanh.f32 %v547_v63 }
 0x612   :  { %v6939_v10 = vpop.eup %6938 }
 0x613   :  { %6247 = vmatmul.mubr.msk.f32.vlgmr.msra.gmra.mxu0 %vm142_vm1, %v6939_v10 }
 0x614   :  { %6261 = vmatpush3.msra.mxu0 %v7259_v5  ;;  %6268 = vmatprep.mubr.msk.f32.mxu0 %vm7172_vm0, %v7171_v6 }
 0x615   :  { %6262 = vmatprep.subr.mxu0 %v7171_v6 }
 0x616   :  { %6263 = vmatpush3.msra.mxu0 %v7267_v7 }
 0x617   :  { %6264 = vmatprep.subr.mxu0 %v7171_v6 }
 0x618   :  { %6265 = vmatpush3.msra.mxu0 %v7277_v8 }
 0x619   :  { %6266 = vmatprep.subr.mxu0 %v7171_v6 }
 0x61a   :  { %6267 = vmatpush3.msra.mxu0 %v7286_v9 }
 0x61b   :  { %6282 = vmatprep.subr.mxu0 %v7171_v6 }
 0x6d3   :  { %v618_v11 = vpop.f32.mrf.mxu0 }
 0x6d4   :  { %v619_v12 = vadd.f32 %v7352_v41, %v618_v11 }
 0x6d5   :  { %v6248_v13 = vpop.f32.mrf.mxu0 }
 0x6d6   :  { %6940 = vtanh.f32 %v619_v12 }
 0x6e3   :  { %v6941_v15 = vpop.eup %6940 }
 0x6e4   :  { %6258 = vmatmul.mubr.msk.f32.vlgmr.msra.gmra.mxu1 %vm142_vm1, %v6941_v15 }
 0x6e5   :  { %6272 = vmatpush3.msra.mxu1 %v7324_v37  ;;  %6279 = vmatprep.mubr.msk.f32.mxu1 %vm7172_vm0, %v7171_v6 }
 0x6e6   :  { %6273 = vmatprep.subr.mxu1 %v7171_v6 }
 0x6e7   :  { %6274 = vmatpush3.msra.mxu1 %v7329_v38 }
 0x6e8   :  { %6275 = vmatprep.subr.mxu1 %v7171_v6 }
 0x6e9   :  { %6276 = vmatpush3.msra.mxu1 %v7336_v39 }
 0x6ea   :  { %6277 = vmatprep.subr.mxu1 %v7171_v6 }
 0x6eb   :  { %6278 = vmatpush3.msra.mxu1 %v7343_v40 }
 0x6ec   :  { %6293 = vmatprep.subr.mxu1 %v7171_v6 }
 0x7a4   :  { %v692_v18 = vpop.f32.mrf.mxu1 }
 0x7a5   :  { %v693_v19 = vadd.f32 %v7369_v46, %v692_v18 }
 0x7a6   :  { %v6259_v20 = vpop.f32.mrf.mxu1 }
 0x7a7   :  { %v696_v21 = vmul.f32 %v693_v19, %v515_v16 }
 0x7a9   :  { %702 = vrot.lane.b32.xlu1 %v696_v21, %s7173_s25  ;;  %698 = vrot.lane.b32.xlu0 %v696_v21, %s7174_s4 }
 0x7ad   :  { %706 = vrot.lane.b32.xlu0 %v696_v21, %s7175_s26 }
 0x81b   :  { %v699_v22 = vpop.permute.xlu0 %698  ;;  %v703_v27 = vpop.permute.xlu1 %702 }
 0x81c   :  { %v701_v23 = vadd.f32 %v699_v22, %v696_v21 }
 0x81e   :  { %v705_v28 = vadd.f32 %v703_v27, %v701_v23 }
 0x81f   :  { %v707_v29 = vpop.permute.xlu0 %706 }
 0x820   :  { %v709_v31 = vadd.f32 %v707_v29, %v705_v28 }
 0x822   :  { %v711_v32 = vadd.f32 %v710_v30, %v709_v31  ;;  %v911_v12 = vadd.f32 %v709_v31, %v7421_v45 }
 0x824   :  { %v712_v33 = vadd.f32 %v711_v32, %v7248_v2  ;;  %v912_v15 = vmul.f32 3.0, %v911_v12  ;;  %v5823_v12 = vld [vmem:[%s8737_s2 + $0x9] ss:$0 sm:$0xff] }
 0x826   :  { %732 = vperm.xlu0 %6840, %v712_v33   ;;  %726 = vperm.xlu1 %6843, %v712_v33   ;;  %v913_v21 = vadd.f32 %v912_v15, %v7375_v57  ;;  %v5819_v57 = vld [vmem:[%s8737_s2 + $0x8] ss:$0 sm:$0xff] }
 0x82a   :  { %6845 = vset.pattern.permute.xlu0 %v7170_v4  ;;  %6844 = vset.pattern.permute.xlu1 %v7168_v1 }
 0x82b   :  { %744 = vperm.xlu0 %6845, %v712_v33   ;;  %738 = vperm.xlu1 %6844, %v712_v33  }
 0x82f   :  { %6847 = vset.pattern.permute.xlu0 %v7169_v3  ;;  %6846 = vset.pattern.permute.xlu1 %v7167_v0 }
 0x8a1   :  { %v733_v36 = vpop.permute.xlu0 %732  ;;  %v727_v42 = vpop.permute.xlu1 %726 }
 0x8a2   :  { %v729_v43 = vmul.f32 %v727_v42, %v7292_v14  ;;  %v735_v44 = vmul.f32 %v733_v36, %v7301_v24 }
 0x8a4   :  { %v730_v47 = vadd.f32 %v729_v43, %v723_v35 }
 0x8a6   :  { %v745_v48 = vpop.permute.xlu0 %744  ;;  %v736_v49 = vadd.f32 %v735_v44, %v730_v47  ;;  %v739_v50 = vpop.permute.xlu1 %738 }
 0x8a7   :  { %v741_v51 = vmul.f32 %v739_v50, %v7303_v25  ;;  %v747_v52 = vmul.f32 %v745_v48, %v7305_v26 }
 0x8a9   :  { %v742_v53 = vadd.f32 %v741_v51, %v736_v49 }
 0x8ab   :  { %v748_v54 = vadd.f32 %v747_v52, %v742_v53  ;;  %v920_v52 = vld [vmem:[#allocation5 + $0x40] sm:$0xff] }
 0x8ad   :  { %6942 = vtanh.f32 %v748_v54 }
 0x8ba   :  { %v6943_v55 = vpop.eup %6942 }
 0x8bb   :  { %6269 = vmatmul.mubr.msk.f32.vlgmr.msra.gmra.mxu0 %vm142_vm1, %v6943_v55 }
 0x8bc   :  { %6283 = vmatpush3.msra.mxu0 %v7259_v5  ;;  %6290 = vmatprep.mubr.msk.f32.mxu0 %vm7172_vm0, %v7171_v6 }
 0x8bd   :  { %6284 = vmatprep.subr.mxu0 %v7171_v6 }
 0x8be   :  { %6285 = vmatpush3.msra.mxu0 %v7267_v7 }
 0x8bf   :  { %6286 = vmatprep.subr.mxu0 %v7171_v6 }
 0x8c0   :  { %6287 = vmatpush3.msra.mxu0 %v7277_v8 }
 0x8c1   :  { %6288 = vmatprep.subr.mxu0 %v7171_v6 }
 0x8c2   :  { %6289 = vmatpush3.msra.mxu0 %v7286_v9 }
 0x8c3   :  { %6304 = vmatprep.subr.mxu0 %v7171_v6 }
 0x97b   :  { %v819_v56 = vpop.f32.mrf.mxu0 }
 0x97c   :  { %v820_v58 = vadd.f32 %v7352_v41, %v819_v56 }
 0x97d   :  { %v6270_v59 = vpop.f32.mrf.mxu0 }
 0x97e   :  { %6944 = vtanh.f32 %v820_v58 }
 0x98b   :  { %v6945_v60 = vpop.eup %6944 }
 0x98c   :  { %6280 = vmatmul.mubr.msk.f32.vlgmr.msra.gmra.mxu1 %vm142_vm1, %v6945_v60 }
 0x98d   :  { %6294 = vmatpush3.msra.mxu1 %v7324_v37  ;;  %6301 = vmatprep.mubr.msk.f32.mxu1 %vm7172_vm0, %v7171_v6 }
 0x98e   :  { %6295 = vmatprep.subr.mxu1 %v7171_v6 }
 0x98f   :  { %6296 = vmatpush3.msra.mxu1 %v7329_v38 }
 0x990   :  { %6297 = vmatprep.subr.mxu1 %v7171_v6 }
 0x991   :  { %6298 = vmatpush3.msra.mxu1 %v7336_v39 }
 0x992   :  { %6299 = vmatprep.subr.mxu1 %v7171_v6 }
 0x993   :  { %6300 = vmatpush3.msra.mxu1 %v7343_v40 }
 0x994   :  { %6315 = vmatprep.subr.mxu1 %v7171_v6 }
 0xa4c   :  { %v893_v62 = vpop.f32.mrf.mxu1 }
 0xa4d   :  { %v894_v63 = vadd.f32 %v7369_v46, %v893_v62 }
 0xa4e   :  { %v6281_v10 = vpop.f32.mrf.mxu1 }
 0xa4f   :  { %v897_v11 = vmul.f32 %v894_v63, %v716_v61 }
 0xa51   :  { %907 = vrot.lane.b32.xlu0 %v897_v11, %s7175_s26  ;;  %899 = vrot.lane.b32.xlu1 %v897_v11, %s7174_s4 }
 0xa55   :  { %903 = vrot.lane.b32.xlu1 %v897_v11, %s7173_s25 }
 0xac3   :  { %v900_v13 = vpop.permute.xlu1 %899  ;;  %v908_v20 = vpop.permute.xlu0 %907 }
 0xac4   :  { %v902_v16 = vadd.f32 %v900_v13, %v897_v11  ;;  %v1127_v13 = vadd.f32 %v5823_v12, %v7297_v17 }
 0xac7   :  { %v904_v18 = vpop.permute.xlu1 %903 }
 0xac8   :  { %v906_v19 = vadd.f32 %v904_v18, %v902_v16 }
 0xaca   :  { %v910_v22 = vadd.f32 %v908_v20, %v906_v19 }
 0xacc   :  { %v914_v23 = vadd.f32 %v913_v21, %v910_v22 }
 0xace   :  { %v915_v27 = vmul.f32 0.125, %v914_v23 }
 0xad0   :  { %v7509_v28 = vadd.f32 %v915_v27, %v7248_v2  ;;  %v927_v2 = vadd.f32 %v5819_v57, %v7297_v17 }
 0xad2   :  { %936 = vperm.xlu0 %6847, %v7509_v28   ;;  %930 = vperm.xlu1 %6846, %v7509_v28  }
 0xad6   :  { %6848 = vset.pattern.permute.xlu1 %v7168_v1 }
 0xad7   :  { %942 = vperm.xlu1 %6848, %v7509_v28  }
 0xadb   :  { %6849 = vset.pattern.permute.xlu1 %v7170_v4 }
 0xadc   :  { %948 = vperm.xlu1 %6849, %v7509_v28  }
 0xae0   :  { %6850 = vset.pattern.permute.xlu1 %v7167_v0 }
 0xb4d   :  { %v931_v45 = vpop.permute.xlu1 %930  ;;  %v937_v30 = vpop.permute.xlu0 %936 }
 0xb4e   :  { %v933_v29 = vmul.f32 %v931_v45, %v7292_v14  ;;  %v939_v32 = vmul.f32 %v937_v30, %v7301_v24 }
 0xb50   :  { %v934_v31 = vadd.f32 %v933_v29, %v927_v2 }
 0xb52   :  { %v943_v33 = vpop.permute.xlu1 %942  ;;  %v940_v34 = vadd.f32 %v939_v32, %v934_v31 }
 0xb53   :  { %v945_v35 = vmul.f32 %v943_v33, %v7303_v25 }
 0xb55   :  { %v946_v42 = vadd.f32 %v945_v35, %v940_v34  ;;  %v1120_v34 = vld [vmem:[#allocation5 + $0x48] sm:$0xff] }
 0xb57   :  { %v949_v36 = vpop.permute.xlu1 %948 }
 0xb58   :  { %v951_v43 = vmul.f32 %v949_v36, %v7305_v26 }
 0xb5a   :  { %v952_v44 = vadd.f32 %v951_v43, %v946_v42 }
 0xb5c   :  { %6946 = vtanh.f32 %v952_v44 }
 0xb69   :  { %v6947_v47 = vpop.eup %6946 }
 0xb6a   :  { %6291 = vmatmul.mubr.msk.f32.vlgmr.msra.gmra.mxu0 %vm142_vm1, %v6947_v47 }
 0xb6b   :  { %6305 = vmatpush3.msra.mxu0 %v7259_v5  ;;  %6312 = vmatprep.mubr.msk.f32.mxu0 %vm7172_vm0, %v7171_v6 }
 0xb6c   :  { %6306 = vmatprep.subr.mxu0 %v7171_v6 }
 0xb6d   :  { %6307 = vmatpush3.msra.mxu0 %v7267_v7 }
 0xb6e   :  { %6308 = vmatprep.subr.mxu0 %v7171_v6 }
 0xb6f   :  { %6309 = vmatpush3.msra.mxu0 %v7277_v8 }
 0xb70   :  { %6310 = vmatprep.subr.mxu0 %v7171_v6 }
 0xb71   :  { %6311 = vmatpush3.msra.mxu0 %v7286_v9 }
 0xb72   :  { %6326 = vmatprep.subr.mxu0 %v7171_v6 }
 0xc2a   :  { %v1023_v48 = vpop.f32.mrf.mxu0 }
 0xc2b   :  { %v1024_v49 = vadd.f32 %v7352_v41, %v1023_v48 }
 0xc2c   :  { %v6292_v50 = vpop.f32.mrf.mxu0 }
 0xc2d   :  { %6948 = vtanh.f32 %v1024_v49 }
 0xc3a   :  { %v6949_v51 = vpop.eup %6948 }
 0xc3b   :  { %6302 = vmatmul.mubr.msk.f32.vlgmr.msra.gmra.mxu1 %vm142_vm1, %v6949_v51 }
 0xc3c   :  { %6316 = vmatpush3.msra.mxu1 %v7324_v37  ;;  %6323 = vmatprep.mubr.msk.f32.mxu1 %vm7172_vm0, %v7171_v6 }
 0xc3d   :  { %6317 = vmatprep.subr.mxu1 %v7171_v6 }
 0xc3e   :  { %6318 = vmatpush3.msra.mxu1 %v7329_v38 }
 0xc3f   :  { %6319 = vmatprep.subr.mxu1 %v7171_v6 }
 0xc40   :  { %6320 = vmatpush3.msra.mxu1 %v7336_v39 }
 0xc41   :  { %6321 = vmatprep.subr.mxu1 %v7171_v6 }
 0xc42   :  { %6322 = vmatpush3.msra.mxu1 %v7343_v40 }
 0xc43   :  { %6337 = vmatprep.subr.mxu1 %v7171_v6 }
 0xcfb   :  { %v1097_v53 = vpop.f32.mrf.mxu1 }
 0xcfc   :  { %v1098_v54 = vadd.f32 %v7369_v46, %v1097_v53 }
 0xcfd   :  { %v6303_v55 = vpop.f32.mrf.mxu1 }
 0xcfe   :  { %v1101_v56 = vmul.f32 %v1098_v54, %v920_v52  ;;  %v5827_v54 = vld [vmem:[%s8737_s2 + $0xa] ss:$0 sm:$0xff] }
 0xcff   :  { %v1327_v55 = vadd.f32 %v5827_v54, %v7297_v17 }
 0xd00   :  { %1107 = vrot.lane.b32.xlu1 %v1101_v56, %s7173_s25  ;;  %1103 = vrot.lane.b32.xlu0 %v1101_v56, %s7174_s4 }
 0xd04   :  { %1111 = vrot.lane.b32.xlu0 %v1101_v56, %s7175_s26 }
 0xd72   :  { %v1104_v58 = vpop.permute.xlu0 %1103  ;;  %v1108_v60 = vpop.permute.xlu1 %1107 }
 0xd73   :  { %v1106_v59 = vadd.f32 %v1104_v58, %v1101_v56 }
 0xd75   :  { %v1110_v61 = vadd.f32 %v1108_v60, %v1106_v59 }
 0xd76   :  { %v1112_v62 = vpop.permute.xlu0 %1111 }
 0xd77   :  { %v7553_v63 = vadd.f32 %v1112_v62, %v1110_v61 }
 0xd79   :  { %v7556_v10 = vmul.f32 0.33333334, %v7553_v63 }
 0xd7b   :  { %v1116_v11 = vadd.f32 %v7556_v10, %v7509_v28 }
 0xd7d   :  { %1136 = vperm.xlu0 %6847, %v1116_v11   ;;  %1130 = vperm.xlu1 %6850, %v1116_v11  }
 0xd81   :  { %6852 = vset.pattern.permute.xlu0 %v7170_v4  ;;  %6851 = vset.pattern.permute.xlu1 %v7168_v1 }
 0xd82   :  { %1148 = vperm.xlu0 %6852, %v1116_v11   ;;  %1142 = vperm.xlu1 %6851, %v1116_v11  }
 0xd86   :  { %6854 = vset.pattern.permute.xlu0 %v7169_v3  ;;  %6853 = vset.pattern.permute.xlu1 %v7167_v0 }
 0xdf8   :  { %v1137_v15 = vpop.permute.xlu0 %1136  ;;  %v1131_v16 = vpop.permute.xlu1 %1130 }
 0xdf9   :  { %v1133_v18 = vmul.f32 %v1131_v16, %v7292_v14  ;;  %v1139_v19 = vmul.f32 %v1137_v15, %v7301_v24 }
 0xdfb   :  { %v1134_v20 = vadd.f32 %v1133_v18, %v1127_v13 }
 0xdfd   :  { %v1149_v21 = vpop.permute.xlu0 %1148  ;;  %v1140_v22 = vadd.f32 %v1139_v19, %v1134_v20  ;;  %v1143_v23 = vpop.permute.xlu1 %1142 }
 0xdfe   :  { %v1145_v27 = vmul.f32 %v1143_v23, %v7303_v25  ;;  %v1151_v57 = vmul.f32 %v1149_v21, %v7305_v26 }
 0xe00   :  { %v1146_v2 = vadd.f32 %v1145_v27, %v1140_v22 }
 0xe02   :  { %v1152_v45 = vadd.f32 %v1151_v57, %v1146_v2 }
 0xe04   :  { %6950 = vtanh.f32 %v1152_v45 }
 0xe11   :  { %v6951_v29 = vpop.eup %6950 }
 0xe12   :  { %6313 = vmatmul.mubr.msk.f32.vlgmr.msra.gmra.mxu0 %vm142_vm1, %v6951_v29 }
 0xe13   :  { %6327 = vmatpush3.msra.mxu0 %v7259_v5  ;;  %6334 = vmatprep.mubr.msk.f32.mxu0 %vm7172_vm0, %v7171_v6 }
 0xe14   :  { %6328 = vmatprep.subr.mxu0 %v7171_v6 }
 0xe15   :  { %6329 = vmatpush3.msra.mxu0 %v7267_v7 }
 0xe16   :  { %6330 = vmatprep.subr.mxu0 %v7171_v6 }
 0xe17   :  { %6331 = vmatpush3.msra.mxu0 %v7277_v8 }
 0xe18   :  { %6332 = vmatprep.subr.mxu0 %v7171_v6 }
 0xe19   :  { %6333 = vmatpush3.msra.mxu0 %v7286_v9 }
 0xe1a   :  { %6348 = vmatprep.subr.mxu0 %v7171_v6 }
 0xed2   :  { %v1223_v30 = vpop.f32.mrf.mxu0 }
 0xed3   :  { %v1224_v31 = vadd.f32 %v7352_v41, %v1223_v30 }
 0xed4   :  { %v6314_v32 = vpop.f32.mrf.mxu0 }
 0xed5   :  { %6952 = vtanh.f32 %v1224_v31 }
 0xee2   :  { %v6953_v33 = vpop.eup %6952 }
 0xee3   :  { %6324 = vmatmul.mubr.msk.f32.vlgmr.msra.gmra.mxu1 %vm142_vm1, %v6953_v33 }
 0xee4   :  { %6338 = vmatpush3.msra.mxu1 %v7324_v37  ;;  %6345 = vmatprep.mubr.msk.f32.mxu1 %vm7172_vm0, %v7171_v6 }
 0xee5   :  { %6339 = vmatprep.subr.mxu1 %v7171_v6 }
 0xee6   :  { %6340 = vmatpush3.msra.mxu1 %v7329_v38 }
 0xee7   :  { %6341 = vmatprep.subr.mxu1 %v7171_v6 }
 0xee8   :  { %6342 = vmatpush3.msra.mxu1 %v7336_v39 }
 0xee9   :  { %6343 = vmatprep.subr.mxu1 %v7171_v6 }
 0xeea   :  { %6344 = vmatpush3.msra.mxu1 %v7343_v40 }
 0xeeb   :  { %6359 = vmatprep.subr.mxu1 %v7171_v6 }
 0xfa3   :  { %v1297_v35 = vpop.f32.mrf.mxu1 }
 0xfa4   :  { %v1298_v36 = vadd.f32 %v7369_v46, %v1297_v35 }
 0xfa5   :  { %v6325_v42 = vpop.f32.mrf.mxu1 }
 0xfa6   :  { %v1301_v43 = vmul.f32 %v1298_v36, %v1120_v34  ;;  %v5831_v34 = vld [vmem:[%s8737_s2 + $0xb] ss:$0 sm:$0xff] }
 0xfa7   :  { %v1528_v35 = vadd.f32 %v5831_v34, %v7297_v17  ;;  %v7664_v17 = vld [vmem:[%s8740_s5 + $0x18] sm:$0xff] }
 0xfa8   :  { %1311 = vrot.lane.b32.xlu0 %v1301_v43, %s7175_s26  ;;  %1303 = vrot.lane.b32.xlu1 %v1301_v43, %s7174_s4 }
 0xfac   :  { %1307 = vrot.lane.b32.xlu1 %v1301_v43, %s7173_s25 }
0x101a   :  { %v1304_v44 = vpop.permute.xlu1 %1303  ;;  %v1312_v50 = vpop.permute.xlu0 %1311 }
0x101b   :  { %v1306_v47 = vadd.f32 %v1304_v44, %v1301_v43 }
0x101e   :  { %v1308_v48 = vpop.permute.xlu1 %1307 }
0x101f   :  { %v1310_v49 = vadd.f32 %v1308_v48, %v1306_v47 }
0x1021   :  { %v7599_v51 = vadd.f32 %v1312_v50, %v1310_v49 }
0x1023   :  { %v1315_v52 = vsub.f32 %v7599_v51, %v7556_v10  ;;  %v1515_v30 = vsub.f32 %v7553_v63, %v7599_v51 }
0x1025   :  { %v1316_v53 = vadd.f32 %v1315_v52, %v7509_v28 }
0x1027   :  { %1336 = vperm.xlu0 %6854, %v1316_v53   ;;  %1330 = vperm.xlu1 %6853, %v1316_v53  }
0x102b   :  { %6855 = vset.pattern.permute.xlu1 %v7168_v1 }
0x102c   :  { %1342 = vperm.xlu1 %6855, %v1316_v53  }
0x1030   :  { %6856 = vset.pattern.permute.xlu1 %v7170_v4 }
0x1031   :  { %1348 = vperm.xlu1 %6856, %v1316_v53  }
0x1035   :  { %6857 = vset.pattern.permute.xlu1 %v7167_v0 }
0x10a2   :  { %v1331_v56 = vpop.permute.xlu1 %1330  ;;  %v1337_v59 = vpop.permute.xlu0 %1336 }
0x10a3   :  { %v1333_v58 = vmul.f32 %v1331_v56, %v7292_v14  ;;  %v1339_v61 = vmul.f32 %v1337_v59, %v7301_v24  ;;  %v7680_v59 = vld [vmem:[%s8740_s5 + $0x8] sm:$0xff] }
0x10a5   :  { %v1334_v60 = vadd.f32 %v1333_v58, %v1327_v55  ;;  %v7673_v58 = vld [vmem:[%s8740_s5 + $0x10] sm:$0xff] }
0x10a7   :  { %v1343_v62 = vpop.permute.xlu1 %1342  ;;  %v1340_v10 = vadd.f32 %v1339_v61, %v1334_v60  ;;  %v7687_v60 = vld [vmem:[%s8740_s5] sm:$0xff] }
0x10a8   :  { %v1345_v11 = vmul.f32 %v1343_v62, %v7303_v25 }
0x10aa   :  { %v1346_v13 = vadd.f32 %v1345_v11, %v1340_v10 }
0x10ac   :  { %v1349_v12 = vpop.permute.xlu1 %1348 }
0x10ad   :  { %v1351_v15 = vmul.f32 %v1349_v12, %v7305_v26 }
0x10af   :  { %v1352_v16 = vadd.f32 %v1351_v15, %v1346_v13 }
0x10b1   :  { %6954 = vtanh.f32 %v1352_v16 }
0x10be   :  { %v6955_v18 = vpop.eup %6954 }
0x10bf   :  { %6335 = vmatmul.mubr.msk.f32.vlgmr.msra.gmra.mxu0 %vm142_vm1, %v6955_v18 }
0x10c0   :  { %6349 = vmatpush3.msra.mxu0 %v7259_v5  ;;  %6356 = vmatprep.mubr.msk.f32.mxu0 %vm7172_vm0, %v7171_v6 }
0x10c1   :  { %6350 = vmatprep.subr.mxu0 %v7171_v6 }
0x10c2   :  { %6351 = vmatpush3.msra.mxu0 %v7267_v7  ;;  %v1320_v7 = vld [vmem:[#allocation5 + $0x50] sm:$0xff] }
0x10c3   :  { %6352 = vmatprep.subr.mxu0 %v7171_v6 }
0x10c4   :  { %6353 = vmatpush3.msra.mxu0 %v7277_v8 }
0x10c5   :  { %6354 = vmatprep.subr.mxu0 %v7171_v6 }
0x10c6   :  { %6355 = vmatpush3.msra.mxu0 %v7286_v9 }
0x10c7   :  { %6370 = vmatprep.subr.mxu0 %v7171_v6 }
0x117f   :  { %v1423_v19 = vpop.f32.mrf.mxu0 }
0x1180   :  { %v1424_v5 = vadd.f32 %v7352_v41, %v1423_v19 }
0x1181   :  { %v6336_v20 = vpop.f32.mrf.mxu0 }
0x1182   :  { %6956 = vtanh.f32 %v1424_v5 }
0x118f   :  { %v6957_v21 = vpop.eup %6956 }
0x1190   :  { %6346 = vmatmul.mubr.msk.f32.vlgmr.msra.gmra.mxu1 %vm142_vm1, %v6957_v21 }
0x1191   :  { %6360 = vmatpush3.msra.mxu1 %v7324_v37  ;;  %6367 = vmatprep.mubr.msk.f32.mxu1 %vm7172_vm0, %v7171_v6 }
0x1192   :  { %6361 = vmatprep.subr.mxu1 %v7171_v6 }
0x1193   :  { %6362 = vmatpush3.msra.mxu1 %v7329_v38 }
0x1194   :  { %6363 = vmatprep.subr.mxu1 %v7171_v6 }
0x1195   :  { %6364 = vmatpush3.msra.mxu1 %v7336_v39 }
0x1196   :  { %6365 = vmatprep.subr.mxu1 %v7171_v6 }
0x1197   :  { %6366 = vmatpush3.msra.mxu1 %v7343_v40 }
0x1198   :  { %6381 = vmatprep.subr.mxu1 %v7171_v6 }
0x1250   :  { %v1497_v8 = vpop.f32.mrf.mxu1 }
0x1251   :  { %v1498_v9 = vadd.f32 %v7369_v46, %v1497_v8 }
0x1252   :  { %v6347_v22 = vpop.f32.mrf.mxu1 }
0x1253   :  { %v1501_v23 = vmul.f32 %v1498_v9, %v1320_v7 }
0x1255   :  { %1507 = vrot.lane.b32.xlu1 %v1501_v23, %s7173_s25  ;;  %1503 = vrot.lane.b32.xlu0 %v1501_v23, %s7174_s4 }
0x1259   :  { %1511 = vrot.lane.b32.xlu0 %v1501_v23, %s7175_s26 }
0x12c7   :  { %v1504_v27 = vpop.permute.xlu0 %1503  ;;  %v1508_v2 = vpop.permute.xlu1 %1507 }
0x12c8   :  { %v1506_v57 = vadd.f32 %v1504_v27, %v1501_v23 }
0x12ca   :  { %v1510_v45 = vadd.f32 %v1508_v2, %v1506_v57 }
0x12cb   :  { %v1512_v29 = vpop.permute.xlu0 %1511 }
0x12cc   :  { %v7644_v31 = vadd.f32 %v1512_v29, %v1510_v45 }
0x12ce   :  { %v1516_v32 = vadd.f32 %v1515_v30, %v7644_v31 }
0x12d0   :  { %v1517_v33 = vadd.f32 %v1516_v32, %v7509_v28 }
0x12d2   :  { %1537 = vperm.xlu0 %6854, %v1517_v33   ;;  %1531 = vperm.xlu1 %6857, %v1517_v33  }
0x12d6   :  { %6859 = vset.pattern.permute.xlu0 %v7170_v4  ;;  %6858 = vset.pattern.permute.xlu1 %v7168_v1 }
0x12d7   :  { %1549 = vperm.xlu0 %6859, %v1517_v33   ;;  %1543 = vperm.xlu1 %6858, %v1517_v33  }
0x12db   :  { %6861 = vset.pattern.permute.xlu0 %v7169_v3  ;;  %6860 = vset.pattern.permute.xlu1 %v7167_v0 }
0x134d   :  { %v1538_v36 = vpop.permute.xlu0 %1537  ;;  %v1532_v42 = vpop.permute.xlu1 %1531 }
0x134e   :  { %v1534_v43 = vmul.f32 %v1532_v42, %v7292_v14  ;;  %v1540_v44 = vmul.f32 %v1538_v36, %v7301_v24  ;;  %v7744_v42 = vld [vmem:[%s8741_s6] ss:$0 sm:$0xff] }
0x1350   :  { %v1535_v47 = vadd.f32 %v1534_v43, %v1528_v35 }
0x1352   :  { %v1550_v48 = vpop.permute.xlu0 %1549  ;;  %v1541_v49 = vadd.f32 %v1540_v44, %v1535_v47  ;;  %v1544_v50 = vpop.permute.xlu1 %1543 }
0x1353   :  { %v1546_v52 = vmul.f32 %v1544_v50, %v7303_v25  ;;  %v1552_v53 = vmul.f32 %v1550_v48, %v7305_v26  ;;  %v7751_v48 = vld [vmem:[%s8742_s7 + $0x18] sm:$0xff]  ;;  %v7767_v50 = vld [vmem:[%s8742_s7 + $0x8] sm:$0xff] }
0x1355   :  { %v1547_v54 = vadd.f32 %v1546_v52, %v1541_v49  ;;  %v7760_v49 = vld [vmem:[%s8742_s7 + $0x10] sm:$0xff]  ;;  %v7774_v52 = vld [vmem:[%s8742_s7] sm:$0xff] }
0x1357   :  { %v1553_v55 = vadd.f32 %v1552_v53, %v1547_v54  ;;  %v1725_v53 = vld [vmem:[#allocation5 + $0x60] sm:$0xff] }
0x1359   :  { %6958 = vtanh.f32 %v1553_v55  ;;  %v7781_v55 = vld [vmem:[%s8743_s8] ss:$0 sm:$0xff] }
0x1366   :  { %v6959_v56 = vpop.eup %6958 }
0x1367   :  { %6357 = vmatmul.mubr.msk.f32.vlgmr.msra.gmra.mxu0 %vm142_vm1, %v6959_v56 }
0x1368   :  { %6371 = vmatpush3.msra.mxu0 %v7664_v17  ;;  %6378 = vmatprep.mubr.msk.f32.mxu0 %vm7172_vm0, %v7171_v6 }
0x1369   :  { %6372 = vmatprep.subr.mxu0 %v7171_v6 }
0x136a   :  { %6373 = vmatpush3.msra.mxu0 %v7673_v58 }
0x136b   :  { %6374 = vmatprep.subr.mxu0 %v7171_v6 }
0x136c   :  { %6375 = vmatpush3.msra.mxu0 %v7680_v59 }
0x136d   :  { %6376 = vmatprep.subr.mxu0 %v7171_v6 }
0x136e   :  { %6377 = vmatpush3.msra.mxu0 %v7687_v60 }
0x136f   :  { %6392 = vmatprep.subr.mxu0 %v7171_v6 }
0x1427   :  { %v1624_v61 = vpop.f32.mrf.mxu0 }
0x1428   :  { %v1625_v62 = vadd.f32 %v7352_v41, %v1624_v61  ;;  %v1521_v41 = vld [vmem:[#allocation5 + $0x58] sm:$0xff] }
0x1429   :  { %v6358_v10 = vpop.f32.mrf.mxu0 }
0x142a   :  { %6960 = vtanh.f32 %v1625_v62 }
0x1437   :  { %v6961_v11 = vpop.eup %6960 }
0x1438   :  { %6368 = vmatmul.mubr.msk.f32.vlgmr.msra.gmra.mxu1 %vm142_vm1, %v6961_v11 }
0x1439   :  { %6382 = vmatpush3.msra.mxu1 %v7324_v37  ;;  %6389 = vmatprep.mubr.msk.f32.mxu1 %vm7172_vm0, %v7171_v6 }
0x143a   :  { %6383 = vmatprep.subr.mxu1 %v7171_v6 }
0x143b   :  { %6384 = vmatpush3.msra.mxu1 %v7329_v38  ;;  %v1716_v38 = vadd.f32 %v7644_v31, %v7599_v51  ;;  %v7723_v51 = vld [vmem:[#allocation2] sm:$0xff] }
0x143c   :  { %6385 = vmatprep.subr.mxu1 %v7171_v6 }
0x143d   :  { %6386 = vmatpush3.msra.mxu1 %v7336_v39  ;;  %v1717_v16 = vmul.f32 3.0, %v1716_v38 }
0x143e   :  { %6387 = vmatprep.subr.mxu1 %v7171_v6 }
0x143f   :  { %6388 = vmatpush3.msra.mxu1 %v7343_v40  ;;  %v1718_v20 = vadd.f32 %v1717_v16, %v7553_v63  ;;  %v5835_v63 = vld [vmem:[%s8737_s2 + $0xc] ss:$0 sm:$0xff] }
0x1440   :  { %6403 = vmatprep.subr.mxu1 %v7171_v6  ;;  %v1732_v9 = vadd.f32 %v7723_v51, %v5835_v63 }
0x14f8   :  { %v1698_v12 = vpop.f32.mrf.mxu1 }
0x14f9   :  { %v1699_v37 = vadd.f32 %v7369_v46, %v1698_v12 }
0x14fa   :  { %v6369_v13 = vpop.f32.mrf.mxu1 }
0x14fb   :  { %v1702_v15 = vmul.f32 %v1699_v37, %v1521_v41 }
0x14fd   :  { %1712 = vrot.lane.b32.xlu0 %v1702_v15, %s7175_s26  ;;  %1704 = vrot.lane.b32.xlu1 %v1702_v15, %s7174_s4 }
0x1501   :  { %1708 = vrot.lane.b32.xlu1 %v1702_v15, %s7173_s25 }
0x156f   :  { %v1705_v39 = vpop.permute.xlu1 %1704  ;;  %v1713_v5 = vpop.permute.xlu0 %1712 }
0x1570   :  { %v1707_v40 = vadd.f32 %v1705_v39, %v1702_v15  ;;  %v5839_v39 = vld [vmem:[%s8737_s2 + $0xd] ss:$0 sm:$0xff] }
0x1571   :  { %v1932_v16 = vadd.f32 %v7723_v51, %v5839_v39 }
0x1573   :  { %v1709_v18 = vpop.permute.xlu1 %1708 }
0x1574   :  { %v1711_v19 = vadd.f32 %v1709_v18, %v1707_v40 }
0x1576   :  { %v1715_v46 = vadd.f32 %v1713_v5, %v1711_v19 }
0x1578   :  { %v1719_v21 = vadd.f32 %v1718_v20, %v1715_v46 }
0x157a   :  { %v1720_v7 = vmul.f32 0.125, %v1719_v21 }
0x157c   :  { %v7711_v8 = vadd.f32 %v1720_v7, %v7509_v28 }
0x157e   :  { %1741 = vperm.xlu0 %6861, %v7711_v8   ;;  %1735 = vperm.xlu1 %6860, %v7711_v8  }
0x1582   :  { %6862 = vset.pattern.permute.xlu1 %v7168_v1 }
0x1583   :  { %1747 = vperm.xlu1 %6862, %v7711_v8  }
0x1587   :  { %6863 = vset.pattern.permute.xlu1 %v7170_v4 }
0x1588   :  { %1753 = vperm.xlu1 %6863, %v7711_v8  }
0x158c   :  { %6864 = vset.pattern.permute.xlu1 %v7167_v0 }
0x15f9   :  { %v1736_v22 = vpop.permute.xlu1 %1735  ;;  %v1742_v27 = vpop.permute.xlu0 %1741 }
0x15fa   :  { %v1738_v23 = vmul.f32 %v1736_v22, %v7292_v14  ;;  %v1744_v2 = vmul.f32 %v1742_v27, %v7301_v24 }
0x15fc   :  { %v1739_v57 = vadd.f32 %v1738_v23, %v1732_v9 }
0x15fe   :  { %v1748_v45 = vpop.permute.xlu1 %1747  ;;  %v1745_v29 = vadd.f32 %v1744_v2, %v1739_v57 }
0x15ff   :  { %v1750_v30 = vmul.f32 %v1748_v45, %v7303_v25 }
0x1601   :  { %v1751_v32 = vadd.f32 %v1750_v30, %v1745_v29  ;;  %v1925_v30 = vld [vmem:[#allocation5 + $0x68] sm:$0xff] }
0x1603   :  { %v1754_v31 = vpop.permute.xlu1 %1753 }
0x1604   :  { %v1756_v33 = vmul.f32 %v1754_v31, %v7305_v26 }
0x1606   :  { %v1757_v34 = vadd.f32 %v1756_v33, %v1751_v32 }
0x1608   :  { %6962 = vtanh.f32 %v1757_v34 }
0x1615   :  { %v6963_v35 = vpop.eup %6962 }
0x1616   :  { %6379 = vmatmul.mubr.msk.f32.vlgmr.msra.gmra.mxu0 %vm142_vm1, %v6963_v35 }
0x1617   :  { %6393 = vmatpush3.msra.mxu0 %v7664_v17  ;;  %6400 = vmatprep.mubr.msk.f32.mxu0 %vm7172_vm0, %v7171_v6 }
0x1618   :  { %6394 = vmatprep.subr.mxu0 %v7171_v6 }
0x1619   :  { %6395 = vmatpush3.msra.mxu0 %v7673_v58 }
0x161a   :  { %6396 = vmatprep.subr.mxu0 %v7171_v6 }
0x161b   :  { %6397 = vmatpush3.msra.mxu0 %v7680_v59 }
0x161c   :  { %6398 = vmatprep.subr.mxu0 %v7171_v6 }
0x161d   :  { %6399 = vmatpush3.msra.mxu0 %v7687_v60 }
0x161e   :  { %6414 = vmatprep.subr.mxu0 %v7171_v6 }
0x16d6   :  { %v1828_v36 = vpop.f32.mrf.mxu0 }
0x16d7   :  { %v1829_v43 = vadd.f32 %v7744_v42, %v1828_v36 }
0x16d8   :  { %v6380_v44 = vpop.f32.mrf.mxu0 }
0x16d9   :  { %6964 = vtanh.f32 %v1829_v43 }
0x16e6   :  { %v6965_v47 = vpop.eup %6964 }
0x16e7   :  { %6390 = vmatmul.mubr.msk.f32.vlgmr.msra.gmra.mxu1 %vm142_vm1, %v6965_v47 }
0x16e8   :  { %6404 = vmatpush3.msra.mxu1 %v7751_v48  ;;  %6411 = vmatprep.mubr.msk.f32.mxu1 %vm7172_vm0, %v7171_v6 }
0x16e9   :  { %6405 = vmatprep.subr.mxu1 %v7171_v6 }
0x16ea   :  { %6406 = vmatpush3.msra.mxu1 %v7760_v49 }
0x16eb   :  { %6407 = vmatprep.subr.mxu1 %v7171_v6 }
0x16ec   :  { %6408 = vmatpush3.msra.mxu1 %v7767_v50 }
0x16ed   :  { %6409 = vmatprep.subr.mxu1 %v7171_v6 }
0x16ee   :  { %6410 = vmatpush3.msra.mxu1 %v7774_v52 }
0x16ef   :  { %6425 = vmatprep.subr.mxu1 %v7171_v6 }
0x17a7   :  { %v1902_v54 = vpop.f32.mrf.mxu1 }
0x17a8   :  { %v1903_v56 = vadd.f32 %v7781_v55, %v1902_v54 }
0x17a9   :  { %v6391_v61 = vpop.f32.mrf.mxu1 }
0x17aa   :  { %v1906_v62 = vmul.f32 %v1903_v56, %v1725_v53  ;;  %v5843_v61 = vld [vmem:[%s8737_s2 + $0xe] ss:$0 sm:$0xff] }
0x17ac   :  { %1912 = vrot.lane.b32.xlu1 %v1906_v62, %s7173_s25  ;;  %1908 = vrot.lane.b32.xlu0 %v1906_v62, %s7174_s4 }
0x17b0   :  { %1916 = vrot.lane.b32.xlu0 %v1906_v62, %s7175_s26 }
0x181e   :  { %v1909_v10 = vpop.permute.xlu0 %1908  ;;  %v1913_v41 = vpop.permute.xlu1 %1912 }
0x181f   :  { %v1911_v11 = vadd.f32 %v1909_v10, %v1906_v62  ;;  %v2132_v62 = vadd.f32 %v7723_v51, %v5843_v61 }
0x1821   :  { %v1915_v12 = vadd.f32 %v1913_v41, %v1911_v11 }
0x1822   :  { %v1917_v37 = vpop.permute.xlu0 %1916 }
0x1823   :  { %v7787_v13 = vadd.f32 %v1917_v37, %v1915_v12 }
0x1825   :  { %v7790_v15 = vmul.f32 0.33333334, %v7787_v13 }
0x1827   :  { %v1921_v38 = vadd.f32 %v7790_v15, %v7711_v8 }
0x1829   :  { %1941 = vperm.xlu0 %6861, %v1921_v38   ;;  %1935 = vperm.xlu1 %6864, %v1921_v38  }
0x182d   :  { %6866 = vset.pattern.permute.xlu0 %v7170_v4  ;;  %6865 = vset.pattern.permute.xlu1 %v7168_v1 }
0x182e   :  { %1953 = vperm.xlu0 %6866, %v1921_v38   ;;  %1947 = vperm.xlu1 %6865, %v1921_v38  }
0x1832   :  { %6868 = vset.pattern.permute.xlu0 %v7169_v3  ;;  %6867 = vset.pattern.permute.xlu1 %v7167_v0 }
0x18a4   :  { %v1942_v40 = vpop.permute.xlu0 %1941  ;;  %v1936_v18 = vpop.permute.xlu1 %1935 }
0x18a5   :  { %v1938_v19 = vmul.f32 %v1936_v18, %v7292_v14  ;;  %v1944_v5 = vmul.f32 %v1942_v40, %v7301_v24 }
0x18a7   :  { %v1939_v20 = vadd.f32 %v1938_v19, %v1932_v16 }
0x18a9   :  { %v1954_v46 = vpop.permute.xlu0 %1953  ;;  %v1945_v21 = vadd.f32 %v1944_v5, %v1939_v20  ;;  %v1948_v7 = vpop.permute.xlu1 %1947 }
0x18aa   :  { %v1950_v63 = vmul.f32 %v1948_v7, %v7303_v25  ;;  %v1956_v9 = vmul.f32 %v1954_v46, %v7305_v26 }
0x18ac   :  { %v1951_v22 = vadd.f32 %v1950_v63, %v1945_v21  ;;  %v2125_v63 = vld [vmem:[#allocation5 + $0x70] sm:$0xff] }
0x18ae   :  { %v1957_v23 = vadd.f32 %v1956_v9, %v1951_v22 }
0x18b0   :  { %6966 = vtanh.f32 %v1957_v23 }
0x18bd   :  { %v6967_v27 = vpop.eup %6966 }
0x18be   :  { %6401 = vmatmul.mubr.msk.f32.vlgmr.msra.gmra.mxu0 %vm142_vm1, %v6967_v27 }
0x18bf   :  { %6415 = vmatpush3.msra.mxu0 %v7664_v17  ;;  %6422 = vmatprep.mubr.msk.f32.mxu0 %vm7172_vm0, %v7171_v6 }
0x18c0   :  { %6416 = vmatprep.subr.mxu0 %v7171_v6 }
0x18c1   :  { %6417 = vmatpush3.msra.mxu0 %v7673_v58 }
0x18c2   :  { %6418 = vmatprep.subr.mxu0 %v7171_v6 }
0x18c3   :  { %6419 = vmatpush3.msra.mxu0 %v7680_v59 }
0x18c4   :  { %6420 = vmatprep.subr.mxu0 %v7171_v6 }
0x18c5   :  { %6421 = vmatpush3.msra.mxu0 %v7687_v60 }
0x18c6   :  { %6436 = vmatprep.subr.mxu0 %v7171_v6 }
0x197e   :  { %v2028_v57 = vpop.f32.mrf.mxu0 }
0x197f   :  { %v2029_v2 = vadd.f32 %v7744_v42, %v2028_v57 }
0x1980   :  { %v6402_v45 = vpop.f32.mrf.mxu0 }
0x1981   :  { %6968 = vtanh.f32 %v2029_v2 }
0x198e   :  { %v6969_v29 = vpop.eup %6968 }
0x198f   :  { %6412 = vmatmul.mubr.msk.f32.vlgmr.msra.gmra.mxu1 %vm142_vm1, %v6969_v29 }
0x1990   :  { %6426 = vmatpush3.msra.mxu1 %v7751_v48  ;;  %6433 = vmatprep.mubr.msk.f32.mxu1 %vm7172_vm0, %v7171_v6 }
0x1991   :  { %6427 = vmatprep.subr.mxu1 %v7171_v6 }
0x1992   :  { %6428 = vmatpush3.msra.mxu1 %v7760_v49 }
0x1993   :  { %6429 = vmatprep.subr.mxu1 %v7171_v6 }
0x1994   :  { %6430 = vmatpush3.msra.mxu1 %v7767_v50 }
0x1995   :  { %6431 = vmatprep.subr.mxu1 %v7171_v6 }
0x1996   :  { %6432 = vmatpush3.msra.mxu1 %v7774_v52 }
0x1997   :  { %6447 = vmatprep.subr.mxu1 %v7171_v6 }
0x1a4f   :  { %v2102_v31 = vpop.f32.mrf.mxu1 }
0x1a50   :  { %v2103_v32 = vadd.f32 %v7781_v55, %v2102_v31 }
0x1a51   :  { %v6413_v33 = vpop.f32.mrf.mxu1 }
0x1a52   :  { %v2106_v34 = vmul.f32 %v2103_v32, %v1925_v30 }
0x1a54   :  { %2116 = vrot.lane.b32.xlu0 %v2106_v34, %s7175_s26  ;;  %2108 = vrot.lane.b32.xlu1 %v2106_v34, %s7174_s4 }
0x1a58   :  { %2112 = vrot.lane.b32.xlu1 %v2106_v34, %s7173_s25 }
0x1ac6   :  { %v2109_v35 = vpop.permute.xlu1 %2108  ;;  %v2117_v47 = vpop.permute.xlu0 %2116 }
0x1ac7   :  { %v2111_v36 = vadd.f32 %v2109_v35, %v2106_v34  ;;  %v5847_v35 = vld [vmem:[%s8737_s2 + $0xf] ss:$0 sm:$0xff] }
0x1aca   :  { %v2113_v43 = vpop.permute.xlu1 %2112 }
0x1acb   :  { %v2115_v44 = vadd.f32 %v2113_v43, %v2111_v36  ;;  %v2333_v36 = vadd.f32 %v7723_v51, %v5847_v35 }
0x1acd   :  { %v7833_v53 = vadd.f32 %v2117_v47, %v2115_v44 }
0x1acf   :  { %v2120_v54 = vsub.f32 %v7833_v53, %v7790_v15  ;;  %v2320_v31 = vsub.f32 %v7787_v13, %v7833_v53 }
0x1ad1   :  { %v2121_v56 = vadd.f32 %v2120_v54, %v7711_v8 }
0x1ad3   :  { %2141 = vperm.xlu0 %6868, %v2121_v56   ;;  %2135 = vperm.xlu1 %6867, %v2121_v56  }
0x1ad7   :  { %6869 = vset.pattern.permute.xlu1 %v7168_v1 }
0x1ad8   :  { %2147 = vperm.xlu1 %6869, %v2121_v56  }
0x1adc   :  { %6870 = vset.pattern.permute.xlu1 %v7170_v4 }
0x1add   :  { %2153 = vperm.xlu1 %6870, %v2121_v56  }
0x1ae1   :  { %6871 = vset.pattern.permute.xlu1 %v7167_v0 }
0x1b4e   :  { %v2136_v10 = vpop.permute.xlu1 %2135  ;;  %v2142_v41 = vpop.permute.xlu0 %2141 }
0x1b4f   :  { %v2138_v11 = vmul.f32 %v2136_v10, %v7292_v14  ;;  %v2144_v37 = vmul.f32 %v2142_v41, %v7301_v24 }
0x1b51   :  { %v2139_v12 = vadd.f32 %v2138_v11, %v2132_v62 }
0x1b53   :  { %v2148_v15 = vpop.permute.xlu1 %2147  ;;  %v2145_v38 = vadd.f32 %v2144_v37, %v2139_v12 }
0x1b54   :  { %v2150_v39 = vmul.f32 %v2148_v15, %v7303_v25 }
0x1b56   :  { %v2151_v40 = vadd.f32 %v2150_v39, %v2145_v38 }
0x1b58   :  { %v2154_v16 = vpop.permute.xlu1 %2153 }
0x1b59   :  { %v2156_v18 = vmul.f32 %v2154_v16, %v7305_v26 }
0x1b5b   :  { %v2157_v19 = vadd.f32 %v2156_v18, %v2151_v40  ;;  %v2326_v18 = vld [vmem:[#allocation5 + $0x78] sm:$0xff] }
0x1b5d   :  { %6970 = vtanh.f32 %v2157_v19 }
0x1b6a   :  { %v6971_v5 = vpop.eup %6970 }
0x1b6b   :  { %6423 = vmatmul.mubr.msk.f32.vlgmr.msra.gmra.mxu0 %vm142_vm1, %v6971_v5 }
0x1b6c   :  { %6437 = vmatpush3.msra.mxu0 %v7664_v17  ;;  %6444 = vmatprep.mubr.msk.f32.mxu0 %vm7172_vm0, %v7171_v6 }
0x1b6d   :  { %6438 = vmatprep.subr.mxu0 %v7171_v6 }
0x1b6e   :  { %6439 = vmatpush3.msra.mxu0 %v7673_v58 }
0x1b6f   :  { %6440 = vmatprep.subr.mxu0 %v7171_v6 }
0x1b70   :  { %6441 = vmatpush3.msra.mxu0 %v7680_v59 }
0x1b71   :  { %6442 = vmatprep.subr.mxu0 %v7171_v6 }
0x1b72   :  { %6443 = vmatpush3.msra.mxu0 %v7687_v60 }
0x1b73   :  { %6458 = vmatprep.subr.mxu0 %v7171_v6 }
0x1c2b   :  { %v2228_v20 = vpop.f32.mrf.mxu0 }
0x1c2c   :  { %v2229_v46 = vadd.f32 %v7744_v42, %v2228_v20 }
0x1c2d   :  { %v6424_v21 = vpop.f32.mrf.mxu0 }
0x1c2e   :  { %6972 = vtanh.f32 %v2229_v46 }
0x1c3b   :  { %v6973_v7 = vpop.eup %6972 }
0x1c3c   :  { %6434 = vmatmul.mubr.msk.f32.vlgmr.msra.gmra.mxu1 %vm142_vm1, %v6973_v7 }
0x1c3d   :  { %6448 = vmatpush3.msra.mxu1 %v7751_v48  ;;  %6455 = vmatprep.mubr.msk.f32.mxu1 %vm7172_vm0, %v7171_v6 }
0x1c3e   :  { %6449 = vmatprep.subr.mxu1 %v7171_v6 }
0x1c3f   :  { %6450 = vmatpush3.msra.mxu1 %v7760_v49 }
0x1c40   :  { %6451 = vmatprep.subr.mxu1 %v7171_v6 }
0x1c41   :  { %6452 = vmatpush3.msra.mxu1 %v7767_v50 }
0x1c42   :  { %6453 = vmatprep.subr.mxu1 %v7171_v6 }
0x1c43   :  { %6454 = vmatpush3.msra.mxu1 %v7774_v52 }
0x1c44   :  { %6469 = vmatprep.subr.mxu1 %v7171_v6 }
0x1cfc   :  { %v2302_v9 = vpop.f32.mrf.mxu1 }
0x1cfd   :  { %v2303_v22 = vadd.f32 %v7781_v55, %v2302_v9 }
0x1cfe   :  { %v6435_v23 = vpop.f32.mrf.mxu1 }
0x1cff   :  { %v2306_v27 = vmul.f32 %v2303_v22, %v2125_v63 }
0x1d01   :  { %2312 = vrot.lane.b32.xlu1 %v2306_v27, %s7173_s25  ;;  %2308 = vrot.lane.b32.xlu0 %v2306_v27, %s7174_s4 }
0x1d05   :  { %2316 = vrot.lane.b32.xlu0 %v2306_v27, %s7175_s26 }
0x1d73   :  { %v2309_v57 = vpop.permute.xlu0 %2308  ;;  %v2313_v45 = vpop.permute.xlu1 %2312 }
0x1d74   :  { %v2311_v2 = vadd.f32 %v2309_v57, %v2306_v27 }
0x1d76   :  { %v2315_v29 = vadd.f32 %v2313_v45, %v2311_v2 }
0x1d77   :  { %v2317_v30 = vpop.permute.xlu0 %2316 }
0x1d78   :  { %v2319_v32 = vadd.f32 %v2317_v30, %v2315_v29 }
0x1d7a   :  { %v2321_v33 = vadd.f32 %v2320_v31, %v2319_v32  ;;  %v2521_v21 = vadd.f32 %v2319_v32, %v7833_v53 }
0x1d7c   :  { %v2322_v34 = vadd.f32 %v2321_v33, %v7711_v8  ;;  %v2522_v63 = vmul.f32 3.0, %v2521_v21 }
0x1d7e   :  { %2342 = vperm.xlu0 %6868, %v2322_v34   ;;  %2336 = vperm.xlu1 %6871, %v2322_v34   ;;  %v2523_v57 = vadd.f32 %v2522_v63, %v7787_v13  ;;  %v5851_v13 = vld [vmem:[%s8737_s2 + $0x10] ss:$0 sm:$0xff]  ;;  %v5855_v63 = vld [vmem:[%s8737_s2 + $0x11] ss:$0 sm:$0xff] }
0x1d7f   :  { %v2537_v53 = vadd.f32 %v7723_v51, %v5851_v13 }
0x1d82   :  { %6873 = vset.pattern.permute.xlu0 %v7170_v4  ;;  %6872 = vset.pattern.permute.xlu1 %v7168_v1 }
0x1d83   :  { %2354 = vperm.xlu0 %6873, %v2322_v34   ;;  %2348 = vperm.xlu1 %6872, %v2322_v34  }
0x1d87   :  { %6875 = vset.pattern.permute.xlu0 %v7169_v3  ;;  %6874 = vset.pattern.permute.xlu1 %v7167_v0 }
0x1df9   :  { %v2343_v43 = vpop.permute.xlu0 %2342  ;;  %v2337_v44 = vpop.permute.xlu1 %2336 }
0x1dfa   :  { %v2339_v47 = vmul.f32 %v2337_v44, %v7292_v14  ;;  %v2345_v54 = vmul.f32 %v2343_v43, %v7301_v24 }
0x1dfc   :  { %v2340_v56 = vadd.f32 %v2339_v47, %v2333_v36 }
0x1dfe   :  { %v2355_v61 = vpop.permute.xlu0 %2354  ;;  %v2346_v62 = vadd.f32 %v2345_v54, %v2340_v56  ;;  %v2349_v10 = vpop.permute.xlu1 %2348 }
0x1dff   :  { %v2351_v11 = vmul.f32 %v2349_v10, %v7303_v25  ;;  %v2357_v41 = vmul.f32 %v2355_v61, %v7305_v26 }
0x1e01   :  { %v2352_v12 = vadd.f32 %v2351_v11, %v2346_v62 }
0x1e03   :  { %v2358_v37 = vadd.f32 %v2357_v41, %v2352_v12 }
0x1e05   :  { %6974 = vtanh.f32 %v2358_v37  ;;  %v2530_v37 = vld [vmem:[#allocation5 + $0x80] sm:$0xff] }
0x1e12   :  { %v6975_v15 = vpop.eup %6974 }
0x1e13   :  { %6445 = vmatmul.mubr.msk.f32.vlgmr.msra.gmra.mxu0 %vm142_vm1, %v6975_v15 }
0x1e14   :  { %6459 = vmatpush3.msra.mxu0 %v7664_v17  ;;  %6466 = vmatprep.mubr.msk.f32.mxu0 %vm7172_vm0, %v7171_v6 }
0x1e15   :  { %6460 = vmatprep.subr.mxu0 %v7171_v6 }
0x1e16   :  { %6461 = vmatpush3.msra.mxu0 %v7673_v58 }
0x1e17   :  { %6462 = vmatprep.subr.mxu0 %v7171_v6 }
0x1e18   :  { %6463 = vmatpush3.msra.mxu0 %v7680_v59 }
0x1e19   :  { %6464 = vmatprep.subr.mxu0 %v7171_v6 }
0x1e1a   :  { %6465 = vmatpush3.msra.mxu0 %v7687_v60 }
0x1e1b   :  { %6480 = vmatprep.subr.mxu0 %v7171_v6 }
0x1ed3   :  { %v2429_v38 = vpop.f32.mrf.mxu0 }
0x1ed4   :  { %v2430_v39 = vadd.f32 %v7744_v42, %v2429_v38 }
0x1ed5   :  { %v6446_v16 = vpop.f32.mrf.mxu0 }
0x1ed6   :  { %6976 = vtanh.f32 %v2430_v39 }
0x1ee3   :  { %v6977_v40 = vpop.eup %6976 }
0x1ee4   :  { %6456 = vmatmul.mubr.msk.f32.vlgmr.msra.gmra.mxu1 %vm142_vm1, %v6977_v40 }
0x1ee5   :  { %6470 = vmatpush3.msra.mxu1 %v7751_v48  ;;  %6477 = vmatprep.mubr.msk.f32.mxu1 %vm7172_vm0, %v7171_v6 }
0x1ee6   :  { %6471 = vmatprep.subr.mxu1 %v7171_v6 }
0x1ee7   :  { %6472 = vmatpush3.msra.mxu1 %v7760_v49 }
0x1ee8   :  { %6473 = vmatprep.subr.mxu1 %v7171_v6 }
0x1ee9   :  { %6474 = vmatpush3.msra.mxu1 %v7767_v50 }
0x1eea   :  { %6475 = vmatprep.subr.mxu1 %v7171_v6 }
0x1eeb   :  { %6476 = vmatpush3.msra.mxu1 %v7774_v52 }
0x1eec   :  { %6491 = vmatprep.subr.mxu1 %v7171_v6 }
0x1fa4   :  { %v2503_v19 = vpop.f32.mrf.mxu1 }
0x1fa5   :  { %v2504_v5 = vadd.f32 %v7781_v55, %v2503_v19 }
0x1fa6   :  { %v6457_v20 = vpop.f32.mrf.mxu1 }
0x1fa7   :  { %v2507_v46 = vmul.f32 %v2504_v5, %v2326_v18 }
0x1fa9   :  { %2517 = vrot.lane.b32.xlu0 %v2507_v46, %s7175_s26  ;;  %2509 = vrot.lane.b32.xlu1 %v2507_v46, %s7174_s4 }
0x1fad   :  { %2513 = vrot.lane.b32.xlu1 %v2507_v46, %s7173_s25 }
0x201b   :  { %v2510_v7 = vpop.permute.xlu1 %2509  ;;  %v2518_v27 = vpop.permute.xlu0 %2517 }
0x201c   :  { %v2512_v9 = vadd.f32 %v2510_v7, %v2507_v46 }
0x201f   :  { %v2514_v22 = vpop.permute.xlu1 %2513 }
0x2020   :  { %v2516_v23 = vadd.f32 %v2514_v22, %v2512_v9  ;;  %v2737_v9 = vadd.f32 %v7723_v51, %v5855_v63 }
0x2022   :  { %v2520_v2 = vadd.f32 %v2518_v27, %v2516_v23 }
0x2024   :  { %v2524_v45 = vadd.f32 %v2523_v57, %v2520_v2 }
0x2026   :  { %v2525_v29 = vmul.f32 0.125, %v2524_v45 }
0x2028   :  { %v7921_v30 = vadd.f32 %v2525_v29, %v7711_v8 }
0x202a   :  { %2546 = vperm.xlu0 %6875, %v7921_v30   ;;  %2540 = vperm.xlu1 %6874, %v7921_v30  }
0x202e   :  { %6876 = vset.pattern.permute.xlu1 %v7168_v1 }
0x202f   :  { %2552 = vperm.xlu1 %6876, %v7921_v30  }
0x2033   :  { %6877 = vset.pattern.permute.xlu1 %v7170_v4 }
0x2034   :  { %2558 = vperm.xlu1 %6877, %v7921_v30  }
0x2038   :  { %6878 = vset.pattern.permute.xlu1 %v7167_v0 }
0x20a5   :  { %v2541_v31 = vpop.permute.xlu1 %2540  ;;  %v2547_v33 = vpop.permute.xlu0 %2546 }
0x20a6   :  { %v2543_v32 = vmul.f32 %v2541_v31, %v7292_v14  ;;  %v2549_v35 = vmul.f32 %v2547_v33, %v7301_v24 }
0x20a8   :  { %v2544_v34 = vadd.f32 %v2543_v32, %v2537_v53 }
0x20aa   :  { %v2553_v36 = vpop.permute.xlu1 %2552  ;;  %v2550_v43 = vadd.f32 %v2549_v35, %v2544_v34 }
0x20ab   :  { %v2555_v44 = vmul.f32 %v2553_v36, %v7303_v25 }
0x20ad   :  { %v2556_v54 = vadd.f32 %v2555_v44, %v2550_v43 }
0x20af   :  { %v2559_v47 = vpop.permute.xlu1 %2558 }
0x20b0   :  { %v2561_v56 = vmul.f32 %v2559_v47, %v7305_v26  ;;  %v2730_v47 = vld [vmem:[#allocation5 + $0x88] sm:$0xff] }
0x20b2   :  { %v2562_v61 = vadd.f32 %v2561_v56, %v2556_v54 }
0x20b4   :  { %6978 = vtanh.f32 %v2562_v61 }
0x20c1   :  { %v6979_v62 = vpop.eup %6978 }
0x20c2   :  { %6467 = vmatmul.mubr.msk.f32.vlgmr.msra.gmra.mxu0 %vm142_vm1, %v6979_v62 }
0x20c3   :  { %6481 = vmatpush3.msra.mxu0 %v7664_v17  ;;  %6488 = vmatprep.mubr.msk.f32.mxu0 %vm7172_vm0, %v7171_v6 }
0x20c4   :  { %6482 = vmatprep.subr.mxu0 %v7171_v6 }
0x20c5   :  { %6483 = vmatpush3.msra.mxu0 %v7673_v58 }
0x20c6   :  { %6484 = vmatprep.subr.mxu0 %v7171_v6 }
0x20c7   :  { %6485 = vmatpush3.msra.mxu0 %v7680_v59 }
0x20c8   :  { %6486 = vmatprep.subr.mxu0 %v7171_v6 }
0x20c9   :  { %6487 = vmatpush3.msra.mxu0 %v7687_v60 }
0x20ca   :  { %6502 = vmatprep.subr.mxu0 %v7171_v6 }
0x2182   :  { %v2633_v10 = vpop.f32.mrf.mxu0 }
0x2183   :  { %v2634_v11 = vadd.f32 %v7744_v42, %v2633_v10 }
0x2184   :  { %v6468_v41 = vpop.f32.mrf.mxu0 }
0x2185   :  { %6980 = vtanh.f32 %v2634_v11 }
0x2192   :  { %v6981_v12 = vpop.eup %6980 }
0x2193   :  { %6478 = vmatmul.mubr.msk.f32.vlgmr.msra.gmra.mxu1 %vm142_vm1, %v6981_v12 }
0x2194   :  { %6492 = vmatpush3.msra.mxu1 %v7751_v48  ;;  %6499 = vmatprep.mubr.msk.f32.mxu1 %vm7172_vm0, %v7171_v6 }
0x2195   :  { %6493 = vmatprep.subr.mxu1 %v7171_v6 }
0x2196   :  { %6494 = vmatpush3.msra.mxu1 %v7760_v49 }
0x2197   :  { %6495 = vmatprep.subr.mxu1 %v7171_v6 }
0x2198   :  { %6496 = vmatpush3.msra.mxu1 %v7767_v50 }
0x2199   :  { %6497 = vmatprep.subr.mxu1 %v7171_v6 }
0x219a   :  { %6498 = vmatpush3.msra.mxu1 %v7774_v52 }
0x219b   :  { %6513 = vmatprep.subr.mxu1 %v7171_v6 }
0x2253   :  { %v2707_v15 = vpop.f32.mrf.mxu1 }
0x2254   :  { %v2708_v38 = vadd.f32 %v7781_v55, %v2707_v15 }
0x2255   :  { %v6479_v39 = vpop.f32.mrf.mxu1 }
0x2256   :  { %v2711_v16 = vmul.f32 %v2708_v38, %v2530_v37 }
0x2258   :  { %2717 = vrot.lane.b32.xlu1 %v2711_v16, %s7173_s25  ;;  %2713 = vrot.lane.b32.xlu0 %v2711_v16, %s7174_s4 }
0x225c   :  { %2721 = vrot.lane.b32.xlu0 %v2711_v16, %s7175_s26 }
0x22ca   :  { %v2714_v40 = vpop.permute.xlu0 %2713  ;;  %v2718_v19 = vpop.permute.xlu1 %2717 }
0x22cb   :  { %v2716_v18 = vadd.f32 %v2714_v40, %v2711_v16  ;;  %v5859_v16 = vld [vmem:[%s8737_s2 + $0x12] ss:$0 sm:$0xff] }
0x22cc   :  { %v2937_v40 = vadd.f32 %v7723_v51, %v5859_v16 }
0x22cd   :  { %v2720_v5 = vadd.f32 %v2718_v19, %v2716_v18 }
0x22ce   :  { %v2722_v20 = vpop.permute.xlu0 %2721 }
0x22cf   :  { %v7965_v46 = vadd.f32 %v2722_v20, %v2720_v5 }
0x22d1   :  { %v7968_v21 = vmul.f32 0.33333334, %v7965_v46 }
0x22d3   :  { %v2726_v7 = vadd.f32 %v7968_v21, %v7921_v30 }
0x22d5   :  { %2746 = vperm.xlu0 %6875, %v2726_v7   ;;  %2740 = vperm.xlu1 %6878, %v2726_v7  }
0x22d9   :  { %6880 = vset.pattern.permute.xlu0 %v7170_v4  ;;  %6879 = vset.pattern.permute.xlu1 %v7168_v1 }
0x22da   :  { %2758 = vperm.xlu0 %6880, %v2726_v7   ;;  %2752 = vperm.xlu1 %6879, %v2726_v7  }
0x22de   :  { %6882 = vset.pattern.permute.xlu0 %v7169_v3  ;;  %6881 = vset.pattern.permute.xlu1 %v7167_v0 }
0x2350   :  { %v2747_v22 = vpop.permute.xlu0 %2746  ;;  %v2741_v23 = vpop.permute.xlu1 %2740 }
0x2351   :  { %v2743_v27 = vmul.f32 %v2741_v23, %v7292_v14  ;;  %v2749_v57 = vmul.f32 %v2747_v22, %v7301_v24 }
0x2353   :  { %v2744_v2 = vadd.f32 %v2743_v27, %v2737_v9 }
0x2355   :  { %v2759_v45 = vpop.permute.xlu0 %2758  ;;  %v2750_v29 = vadd.f32 %v2749_v57, %v2744_v2  ;;  %v2753_v13 = vpop.permute.xlu1 %2752 }
0x2356   :  { %v2755_v53 = vmul.f32 %v2753_v13, %v7303_v25  ;;  %v2761_v31 = vmul.f32 %v2759_v45, %v7305_v26 }
0x2358   :  { %v2756_v32 = vadd.f32 %v2755_v53, %v2750_v29 }
0x235a   :  { %v2762_v33 = vadd.f32 %v2761_v31, %v2756_v32 }
0x235c   :  { %6982 = vtanh.f32 %v2762_v33 }
0x2369   :  { %v6983_v34 = vpop.eup %6982 }
0x236a   :  { %6489 = vmatmul.mubr.msk.f32.vlgmr.msra.gmra.mxu0 %vm142_vm1, %v6983_v34 }
0x236b   :  { %6503 = vmatpush3.msra.mxu0 %v7664_v17  ;;  %6510 = vmatprep.mubr.msk.f32.mxu0 %vm7172_vm0, %v7171_v6 }
0x236c   :  { %6504 = vmatprep.subr.mxu0 %v7171_v6 }
0x236d   :  { %6505 = vmatpush3.msra.mxu0 %v7673_v58 }
0x236e   :  { %6506 = vmatprep.subr.mxu0 %v7171_v6 }
0x236f   :  { %6507 = vmatpush3.msra.mxu0 %v7680_v59 }
0x2370   :  { %6508 = vmatprep.subr.mxu0 %v7171_v6 }
0x2371   :  { %6509 = vmatpush3.msra.mxu0 %v7687_v60 }
0x2372   :  { %6524 = vmatprep.subr.mxu0 %v7171_v6 }
0x242a   :  { %v2833_v35 = vpop.f32.mrf.mxu0 }
0x242b   :  { %v2834_v36 = vadd.f32 %v7744_v42, %v2833_v35 }
0x242c   :  { %v6490_v43 = vpop.f32.mrf.mxu0 }
0x242d   :  { %6984 = vtanh.f32 %v2834_v36 }
0x243a   :  { %v6985_v44 = vpop.eup %6984 }
0x243b   :  { %6500 = vmatmul.mubr.msk.f32.vlgmr.msra.gmra.mxu1 %vm142_vm1, %v6985_v44 }
0x243c   :  { %6514 = vmatpush3.msra.mxu1 %v7751_v48  ;;  %6521 = vmatprep.mubr.msk.f32.mxu1 %vm7172_vm0, %v7171_v6 }
0x243d   :  { %6515 = vmatprep.subr.mxu1 %v7171_v6 }
0x243e   :  { %6516 = vmatpush3.msra.mxu1 %v7760_v49 }
0x243f   :  { %6517 = vmatprep.subr.mxu1 %v7171_v6 }
0x2440   :  { %6518 = vmatpush3.msra.mxu1 %v7767_v50 }
0x2441   :  { %6519 = vmatprep.subr.mxu1 %v7171_v6 }
0x2442   :  { %6520 = vmatpush3.msra.mxu1 %v7774_v52 }
0x2443   :  { %6535 = vmatprep.subr.mxu1 %v7171_v6 }
0x24fb   :  { %v2907_v54 = vpop.f32.mrf.mxu1 }
0x24fc   :  { %v2908_v56 = vadd.f32 %v7781_v55, %v2907_v54 }
0x24fd   :  { %v6501_v61 = vpop.f32.mrf.mxu1 }
0x24fe   :  { %v2911_v62 = vmul.f32 %v2908_v56, %v2730_v47  ;;  %v5863_v56 = vld [vmem:[%s8737_s2 + $0x13] ss:$0 sm:$0xff] }
0x24ff   :  { %v3138_v61 = vadd.f32 %v7723_v51, %v5863_v56  ;;  %v8076_v51 = vld [vmem:[%s8740_s5 + $0x18] sm:$0xff] }
0x2500   :  { %2921 = vrot.lane.b32.xlu0 %v2911_v62, %s7175_s26  ;;  %2913 = vrot.lane.b32.xlu1 %v2911_v62, %s7174_s4 }
0x2504   :  { %2917 = vrot.lane.b32.xlu1 %v2911_v62, %s7173_s25 }
0x2572   :  { %v2914_v10 = vpop.permute.xlu1 %2913  ;;  %v2922_v37 = vpop.permute.xlu0 %2921 }
0x2573   :  { %v2916_v11 = vadd.f32 %v2914_v10, %v2911_v62 }
0x2576   :  { %v2918_v41 = vpop.permute.xlu1 %2917 }
0x2577   :  { %v2920_v12 = vadd.f32 %v2918_v41, %v2916_v11 }
0x2579   :  { %v8011_v15 = vadd.f32 %v2922_v37, %v2920_v12 }
0x257b   :  { %v2925_v38 = vsub.f32 %v8011_v15, %v7968_v21  ;;  %v3125_v43 = vsub.f32 %v7965_v46, %v8011_v15 }
0x257d   :  { %v2926_v39 = vadd.f32 %v2925_v38, %v7921_v30 }
0x257f   :  { %2946 = vperm.xlu0 %6882, %v2926_v39   ;;  %2940 = vperm.xlu1 %6881, %v2926_v39  }
0x2583   :  { %6883 = vset.pattern.permute.xlu1 %v7168_v1 }
0x2584   :  { %2952 = vperm.xlu1 %6883, %v2926_v39  }
0x2588   :  { %6884 = vset.pattern.permute.xlu1 %v7170_v4 }
0x2589   :  { %2958 = vperm.xlu1 %6884, %v2926_v39  }
0x258d   :  { %6885 = vset.pattern.permute.xlu1 %v7167_v0 }
0x25fa   :  { %v2941_v18 = vpop.permute.xlu1 %2940  ;;  %v2947_v5 = vpop.permute.xlu0 %2946 }
0x25fb   :  { %v2943_v19 = vmul.f32 %v2941_v18, %v7292_v14  ;;  %v2949_v21 = vmul.f32 %v2947_v5, %v7301_v24 }
0x25fd   :  { %v2944_v20 = vadd.f32 %v2943_v19, %v2937_v40 }
0x25ff   :  { %v2953_v7 = vpop.permute.xlu1 %2952  ;;  %v2950_v63 = vadd.f32 %v2949_v21, %v2944_v20  ;;  %v8085_v20 = vld [vmem:[%s8740_s5 + $0x10] sm:$0xff]  ;;  %v8092_v21 = vld [vmem:[%s8740_s5 + $0x8] sm:$0xff] }
0x2600   :  { %v2955_v9 = vmul.f32 %v2953_v7, %v7303_v25  ;;  %v8099_v7 = vld [vmem:[%s8740_s5] sm:$0xff] }
0x2602   :  { %v2956_v23 = vadd.f32 %v2955_v9, %v2950_v63 }
0x2604   :  { %v2959_v22 = vpop.permute.xlu1 %2958 }
0x2605   :  { %v2961_v27 = vmul.f32 %v2959_v22, %v7305_v26 }
0x2607   :  { %v2962_v57 = vadd.f32 %v2961_v27, %v2956_v23 }
0x2609   :  { %6986 = vtanh.f32 %v2962_v57 }
0x2616   :  { %v6987_v2 = vpop.eup %6986 }
0x2617   :  { %6511 = vmatmul.mubr.msk.f32.vlgmr.msra.gmra.mxu0 %vm142_vm1, %v6987_v2 }
0x2618   :  { %6525 = vmatpush3.msra.mxu0 %v7664_v17  ;;  %6532 = vmatprep.mubr.msk.f32.mxu0 %vm7172_vm0, %v7171_v6 }
0x2619   :  { %6526 = vmatprep.subr.mxu0 %v7171_v6 }
0x261a   :  { %6527 = vmatpush3.msra.mxu0 %v7673_v58  ;;  %v2930_v58 = vld [vmem:[#allocation5 + $0x90] sm:$0xff] }
0x261b   :  { %6528 = vmatprep.subr.mxu0 %v7171_v6 }
0x261c   :  { %6529 = vmatpush3.msra.mxu0 %v7680_v59 }
0x261d   :  { %6530 = vmatprep.subr.mxu0 %v7171_v6 }
0x261e   :  { %6531 = vmatpush3.msra.mxu0 %v7687_v60 }
0x261f   :  { %6546 = vmatprep.subr.mxu0 %v7171_v6 }
0x26d7   :  { %v3033_v45 = vpop.f32.mrf.mxu0 }
0x26d8   :  { %v3034_v17 = vadd.f32 %v7744_v42, %v3033_v45 }
0x26d9   :  { %v6512_v29 = vpop.f32.mrf.mxu0 }
0x26da   :  { %6988 = vtanh.f32 %v3034_v17 }
0x26e7   :  { %v6989_v13 = vpop.eup %6988 }
0x26e8   :  { %6522 = vmatmul.mubr.msk.f32.vlgmr.msra.gmra.mxu1 %vm142_vm1, %v6989_v13 }
0x26e9   :  { %6536 = vmatpush3.msra.mxu1 %v7751_v48  ;;  %6543 = vmatprep.mubr.msk.f32.mxu1 %vm7172_vm0, %v7171_v6 }
0x26ea   :  { %6537 = vmatprep.subr.mxu1 %v7171_v6 }
0x26eb   :  { %6538 = vmatpush3.msra.mxu1 %v7760_v49 }
0x26ec   :  { %6539 = vmatprep.subr.mxu1 %v7171_v6 }
0x26ed   :  { %6540 = vmatpush3.msra.mxu1 %v7767_v50 }
0x26ee   :  { %6541 = vmatprep.subr.mxu1 %v7171_v6 }
0x26ef   :  { %6542 = vmatpush3.msra.mxu1 %v7774_v52 }
0x26f0   :  { %6557 = vmatprep.subr.mxu1 %v7171_v6 }
0x27a8   :  { %v3107_v59 = vpop.f32.mrf.mxu1 }
0x27a9   :  { %v3108_v60 = vadd.f32 %v7781_v55, %v3107_v59 }
0x27aa   :  { %v6523_v53 = vpop.f32.mrf.mxu1 }
0x27ab   :  { %v3111_v31 = vmul.f32 %v3108_v60, %v2930_v58 }
0x27ad   :  { %3117 = vrot.lane.b32.xlu1 %v3111_v31, %s7173_s25  ;;  %3113 = vrot.lane.b32.xlu0 %v3111_v31, %s7174_s4 }
0x27b1   :  { %3121 = vrot.lane.b32.xlu0 %v3111_v31, %s7175_s26 }
0x281f   :  { %v3114_v32 = vpop.permute.xlu0 %3113  ;;  %v3118_v34 = vpop.permute.xlu1 %3117 }
0x2820   :  { %v3116_v33 = vadd.f32 %v3114_v32, %v3111_v31 }
0x2822   :  { %v3120_v35 = vadd.f32 %v3118_v34, %v3116_v33 }
0x2823   :  { %v3122_v36 = vpop.permute.xlu0 %3121 }
0x2824   :  { %v8056_v44 = vadd.f32 %v3122_v36, %v3120_v35 }
0x2826   :  { %v3126_v47 = vadd.f32 %v3125_v43, %v8056_v44 }
0x2828   :  { %v3127_v54 = vadd.f32 %v3126_v47, %v7921_v30 }
0x282a   :  { %3147 = vperm.xlu0 %6882, %v3127_v54   ;;  %3141 = vperm.xlu1 %6885, %v3127_v54  }
0x282e   :  { %6887 = vset.pattern.permute.xlu0 %v7170_v4  ;;  %6886 = vset.pattern.permute.xlu1 %v7168_v1 }
0x282f   :  { %3159 = vperm.xlu0 %6887, %v3127_v54   ;;  %3153 = vperm.xlu1 %6886, %v3127_v54  }
0x2833   :  { %6889 = vset.pattern.permute.xlu0 %v7169_v3  ;;  %6888 = vset.pattern.permute.xlu1 %v7167_v0 }
0x28a5   :  { %v3148_v62 = vpop.permute.xlu0 %3147  ;;  %v3142_v10 = vpop.permute.xlu1 %3141 }
0x28a6   :  { %v3144_v11 = vmul.f32 %v3142_v10, %v7292_v14  ;;  %v3150_v41 = vmul.f32 %v3148_v62, %v7301_v24 }
0x28a8   :  { %v3145_v12 = vadd.f32 %v3144_v11, %v3138_v61 }
0x28aa   :  { %v3160_v37 = vpop.permute.xlu0 %3159  ;;  %v3151_v38 = vadd.f32 %v3150_v41, %v3145_v12  ;;  %v3154_v39 = vpop.permute.xlu1 %3153  ;;  %v8156_v41 = vld [vmem:[%s8741_s6] ss:$0 sm:$0xff] }
0x28ab   :  { %v3156_v16 = vmul.f32 %v3154_v39, %v7303_v25  ;;  %v3162_v40 = vmul.f32 %v3160_v37, %v7305_v26  ;;  %v8163_v39 = vld [vmem:[%s8742_s7 + $0x18] sm:$0xff] }
0x28ad   :  { %v3157_v18 = vadd.f32 %v3156_v16, %v3151_v38  ;;  %v8172_v16 = vld [vmem:[%s8742_s7 + $0x10] sm:$0xff] }
0x28af   :  { %v3163_v19 = vadd.f32 %v3162_v40, %v3157_v18  ;;  %v8179_v40 = vld [vmem:[%s8742_s7 + $0x8] sm:$0xff]  ;;  %v8186_v18 = vld [vmem:[%s8742_s7] sm:$0xff] }
0x28b1   :  { %6990 = vtanh.f32 %v3163_v19  ;;  %v3335_v19 = vld [vmem:[#allocation5 + $0xa0] sm:$0xff] }
0x28be   :  { %v6991_v5 = vpop.eup %6990 }
0x28bf   :  { %6533 = vmatmul.mubr.msk.f32.vlgmr.msra.gmra.mxu0 %vm142_vm1, %v6991_v5 }
0x28c0   :  { %6547 = vmatpush3.msra.mxu0 %v8076_v51  ;;  %6554 = vmatprep.mubr.msk.f32.mxu0 %vm7172_vm0, %v7171_v6 }
0x28c1   :  { %6548 = vmatprep.subr.mxu0 %v7171_v6 }
0x28c2   :  { %6549 = vmatpush3.msra.mxu0 %v8085_v20 }
0x28c3   :  { %6550 = vmatprep.subr.mxu0 %v7171_v6 }
0x28c4   :  { %6551 = vmatpush3.msra.mxu0 %v8092_v21 }
0x28c5   :  { %6552 = vmatprep.subr.mxu0 %v7171_v6 }
0x28c6   :  { %6553 = vmatpush3.msra.mxu0 %v8099_v7 }
0x28c7   :  { %6568 = vmatprep.subr.mxu0 %v7171_v6 }
0x297f   :  { %v3234_v63 = vpop.f32.mrf.mxu0 }
0x2980   :  { %v3235_v9 = vadd.f32 %v7744_v42, %v3234_v63  ;;  %v3131_v42 = vld [vmem:[#allocation5 + $0x98] sm:$0xff] }
0x2981   :  { %v6534_v22 = vpop.f32.mrf.mxu0  ;;  %v8193_v63 = vld [vmem:[%s8743_s8] ss:$0 sm:$0xff] }
0x2982   :  { %6992 = vtanh.f32 %v3235_v9 }
0x298f   :  { %v6993_v23 = vpop.eup %6992 }
0x2990   :  { %6544 = vmatmul.mubr.msk.f32.vlgmr.msra.gmra.mxu1 %vm142_vm1, %v6993_v23 }
0x2991   :  { %6558 = vmatpush3.msra.mxu1 %v7751_v48  ;;  %6565 = vmatprep.mubr.msk.f32.mxu1 %vm7172_vm0, %v7171_v6 }
0x2992   :  { %6559 = vmatprep.subr.mxu1 %v7171_v6 }
0x2993   :  { %6560 = vmatpush3.msra.mxu1 %v7760_v49  ;;  %v3326_v49 = vadd.f32 %v8056_v44, %v8011_v15  ;;  %v8135_v15 = vld [vmem:[#allocation2] sm:$0xff] }
0x2994   :  { %6561 = vmatprep.subr.mxu1 %v7171_v6 }
0x2995   :  { %6562 = vmatpush3.msra.mxu1 %v7767_v50  ;;  %v3327_v45 = vmul.f32 3.0, %v3326_v49 }
0x2996   :  { %6563 = vmatprep.subr.mxu1 %v7171_v6 }
0x2997   :  { %6564 = vmatpush3.msra.mxu1 %v7774_v52  ;;  %v3328_v58 = vadd.f32 %v3327_v45, %v7965_v46  ;;  %v5867_v46 = vld [vmem:[%s8737_s2 + $0x14] ss:$0 sm:$0xff] }
0x2998   :  { %6579 = vmatprep.subr.mxu1 %v7171_v6  ;;  %v3342_v31 = vadd.f32 %v8135_v15, %v5867_v46 }
0x2a50   :  { %v3308_v27 = vpop.f32.mrf.mxu1 }
0x2a51   :  { %v3309_v48 = vadd.f32 %v7781_v55, %v3308_v27 }
0x2a52   :  { %v6545_v57 = vpop.f32.mrf.mxu1 }
0x2a53   :  { %v3312_v2 = vmul.f32 %v3309_v48, %v3131_v42 }
0x2a55   :  { %3322 = vrot.lane.b32.xlu0 %v3312_v2, %s7175_s26  ;;  %3314 = vrot.lane.b32.xlu1 %v3312_v2, %s7174_s4 }
0x2a59   :  { %3318 = vrot.lane.b32.xlu1 %v3312_v2, %s7173_s25 }
0x2ac7   :  { %v3315_v50 = vpop.permute.xlu1 %3314  ;;  %v3323_v13 = vpop.permute.xlu0 %3322 }
0x2ac8   :  { %v3317_v52 = vadd.f32 %v3315_v50, %v3312_v2 }
0x2acb   :  { %v3319_v17 = vpop.permute.xlu1 %3318 }
0x2acc   :  { %v3321_v29 = vadd.f32 %v3319_v17, %v3317_v52  ;;  %v5871_v52 = vld [vmem:[%s8737_s2 + $0x15] ss:$0 sm:$0xff] }
0x2acd   :  { %v3542_v17 = vadd.f32 %v8135_v15, %v5871_v52 }
0x2ace   :  { %v3325_v55 = vadd.f32 %v3323_v13, %v3321_v29 }
0x2ad0   :  { %v3329_v59 = vadd.f32 %v3328_v58, %v3325_v55 }
0x2ad2   :  { %v3330_v60 = vmul.f32 0.125, %v3329_v59 }
0x2ad4   :  { %v8123_v53 = vadd.f32 %v3330_v60, %v7921_v30 }
0x2ad6   :  { %3351 = vperm.xlu0 %6889, %v8123_v53   ;;  %3345 = vperm.xlu1 %6888, %v8123_v53  }
0x2ada   :  { %6890 = vset.pattern.permute.xlu1 %v7168_v1 }
0x2adb   :  { %3357 = vperm.xlu1 %6890, %v8123_v53  }
0x2adf   :  { %6891 = vset.pattern.permute.xlu1 %v7170_v4 }
0x2ae0   :  { %3363 = vperm.xlu1 %6891, %v8123_v53  }
0x2ae4   :  { %6892 = vset.pattern.permute.xlu1 %v7167_v0 }
0x2b51   :  { %v3346_v32 = vpop.permute.xlu1 %3345  ;;  %v3352_v34 = vpop.permute.xlu0 %3351 }
0x2b52   :  { %v3348_v33 = vmul.f32 %v3346_v32, %v7292_v14  ;;  %v3354_v36 = vmul.f32 %v3352_v34, %v7301_v24 }
0x2b54   :  { %v3349_v35 = vadd.f32 %v3348_v33, %v3342_v31 }
0x2b56   :  { %v3358_v43 = vpop.permute.xlu1 %3357  ;;  %v3355_v44 = vadd.f32 %v3354_v36, %v3349_v35 }
0x2b57   :  { %v3360_v47 = vmul.f32 %v3358_v43, %v7303_v25 }
0x2b59   :  { %v3361_v56 = vadd.f32 %v3360_v47, %v3355_v44 }
0x2b5b   :  { %v3364_v54 = vpop.permute.xlu1 %3363 }
0x2b5c   :  { %v3366_v61 = vmul.f32 %v3364_v54, %v7305_v26 }
0x2b5e   :  { %v3367_v62 = vadd.f32 %v3366_v61, %v3361_v56  ;;  %v3535_v56 = vld [vmem:[#allocation5 + $0xa8] sm:$0xff] }
0x2b60   :  { %6994 = vtanh.f32 %v3367_v62 }
0x2b6d   :  { %v6995_v10 = vpop.eup %6994 }
0x2b6e   :  { %6555 = vmatmul.mubr.msk.f32.vlgmr.msra.gmra.mxu0 %vm142_vm1, %v6995_v10 }
0x2b6f   :  { %6569 = vmatpush3.msra.mxu0 %v8076_v51  ;;  %6576 = vmatprep.mubr.msk.f32.mxu0 %vm7172_vm0, %v7171_v6 }
0x2b70   :  { %6570 = vmatprep.subr.mxu0 %v7171_v6 }
0x2b71   :  { %6571 = vmatpush3.msra.mxu0 %v8085_v20 }
0x2b72   :  { %6572 = vmatprep.subr.mxu0 %v7171_v6 }
0x2b73   :  { %6573 = vmatpush3.msra.mxu0 %v8092_v21 }
0x2b74   :  { %6574 = vmatprep.subr.mxu0 %v7171_v6 }
0x2b75   :  { %6575 = vmatpush3.msra.mxu0 %v8099_v7 }
0x2b76   :  { %6590 = vmatprep.subr.mxu0 %v7171_v6 }
0x2c2e   :  { %v3438_v11 = vpop.f32.mrf.mxu0 }
0x2c2f   :  { %v3439_v12 = vadd.f32 %v8156_v41, %v3438_v11 }
0x2c30   :  { %v6556_v37 = vpop.f32.mrf.mxu0 }
0x2c31   :  { %6996 = vtanh.f32 %v3439_v12 }
0x2c3e   :  { %v6997_v38 = vpop.eup %6996 }
0x2c3f   :  { %6566 = vmatmul.mubr.msk.f32.vlgmr.msra.gmra.mxu1 %vm142_vm1, %v6997_v38 }
0x2c40   :  { %6580 = vmatpush3.msra.mxu1 %v8163_v39  ;;  %6587 = vmatprep.mubr.msk.f32.mxu1 %vm7172_vm0, %v7171_v6 }
0x2c41   :  { %6581 = vmatprep.subr.mxu1 %v7171_v6 }
0x2c42   :  { %6582 = vmatpush3.msra.mxu1 %v8172_v16 }
0x2c43   :  { %6583 = vmatprep.subr.mxu1 %v7171_v6 }
0x2c44   :  { %6584 = vmatpush3.msra.mxu1 %v8179_v40 }
0x2c45   :  { %6585 = vmatprep.subr.mxu1 %v7171_v6 }
0x2c46   :  { %6586 = vmatpush3.msra.mxu1 %v8186_v18 }
0x2c47   :  { %6601 = vmatprep.subr.mxu1 %v7171_v6 }
0x2cff   :  { %v3512_v5 = vpop.f32.mrf.mxu1 }
0x2d00   :  { %v3513_v9 = vadd.f32 %v8193_v63, %v3512_v5 }
0x2d01   :  { %v6567_v22 = vpop.f32.mrf.mxu1 }
0x2d02   :  { %v3516_v23 = vmul.f32 %v3513_v9, %v3335_v19 }
0x2d04   :  { %3522 = vrot.lane.b32.xlu1 %v3516_v23, %s7173_s25  ;;  %3518 = vrot.lane.b32.xlu0 %v3516_v23, %s7174_s4 }
0x2d08   :  { %3526 = vrot.lane.b32.xlu0 %v3516_v23, %s7175_s26 }
0x2d76   :  { %v3519_v42 = vpop.permute.xlu0 %3518  ;;  %v3523_v48 = vpop.permute.xlu1 %3522 }
0x2d77   :  { %v3521_v27 = vadd.f32 %v3519_v42, %v3516_v23  ;;  %v5875_v42 = vld [vmem:[%s8737_s2 + $0x16] ss:$0 sm:$0xff] }
0x2d79   :  { %v3525_v57 = vadd.f32 %v3523_v48, %v3521_v27  ;;  %v3742_v27 = vadd.f32 %v8135_v15, %v5875_v42 }
0x2d7a   :  { %v3527_v2 = vpop.permute.xlu0 %3526 }
0x2d7b   :  { %v8199_v49 = vadd.f32 %v3527_v2, %v3525_v57 }
0x2d7d   :  { %v8202_v50 = vmul.f32 0.33333334, %v8199_v49 }
0x2d7f   :  { %v3531_v45 = vadd.f32 %v8202_v50, %v8123_v53 }
0x2d81   :  { %3551 = vperm.xlu0 %6889, %v3531_v45   ;;  %3545 = vperm.xlu1 %6892, %v3531_v45  }
0x2d85   :  { %6894 = vset.pattern.permute.xlu0 %v7170_v4  ;;  %6893 = vset.pattern.permute.xlu1 %v7168_v1 }
0x2d86   :  { %3563 = vperm.xlu0 %6894, %v3531_v45   ;;  %3557 = vperm.xlu1 %6893, %v3531_v45  }
0x2d8a   :  { %6896 = vset.pattern.permute.xlu0 %v7169_v3  ;;  %6895 = vset.pattern.permute.xlu1 %v7167_v0 }
0x2dfc   :  { %v3552_v29 = vpop.permute.xlu0 %3551  ;;  %v3546_v13 = vpop.permute.xlu1 %3545 }
0x2dfd   :  { %v3548_v58 = vmul.f32 %v3546_v13, %v7292_v14  ;;  %v3554_v55 = vmul.f32 %v3552_v29, %v7301_v24 }
0x2dff   :  { %v3549_v59 = vadd.f32 %v3548_v58, %v3542_v17 }
0x2e01   :  { %v3564_v60 = vpop.permute.xlu0 %3563  ;;  %v3555_v46 = vadd.f32 %v3554_v55, %v3549_v59  ;;  %v3558_v31 = vpop.permute.xlu1 %3557 }
0x2e02   :  { %v3560_v32 = vmul.f32 %v3558_v31, %v7303_v25  ;;  %v3566_v33 = vmul.f32 %v3564_v60, %v7305_v26 }
0x2e04   :  { %v3561_v34 = vadd.f32 %v3560_v32, %v3555_v46 }
0x2e06   :  { %v3567_v35 = vadd.f32 %v3566_v33, %v3561_v34  ;;  %v3735_v34 = vld [vmem:[#allocation5 + $0xb0] sm:$0xff] }
0x2e08   :  { %6998 = vtanh.f32 %v3567_v35 }
0x2e15   :  { %v6999_v36 = vpop.eup %6998 }
0x2e16   :  { %6577 = vmatmul.mubr.msk.f32.vlgmr.msra.gmra.mxu0 %vm142_vm1, %v6999_v36 }
0x2e17   :  { %6591 = vmatpush3.msra.mxu0 %v8076_v51  ;;  %6598 = vmatprep.mubr.msk.f32.mxu0 %vm7172_vm0, %v7171_v6 }
0x2e18   :  { %6592 = vmatprep.subr.mxu0 %v7171_v6 }
0x2e19   :  { %6593 = vmatpush3.msra.mxu0 %v8085_v20 }
0x2e1a   :  { %6594 = vmatprep.subr.mxu0 %v7171_v6 }
0x2e1b   :  { %6595 = vmatpush3.msra.mxu0 %v8092_v21 }
0x2e1c   :  { %6596 = vmatprep.subr.mxu0 %v7171_v6 }
0x2e1d   :  { %6597 = vmatpush3.msra.mxu0 %v8099_v7 }
0x2e1e   :  { %6612 = vmatprep.subr.mxu0 %v7171_v6 }
0x2ed6   :  { %v3638_v43 = vpop.f32.mrf.mxu0 }
0x2ed7   :  { %v3639_v44 = vadd.f32 %v8156_v41, %v3638_v43 }
0x2ed8   :  { %v6578_v47 = vpop.f32.mrf.mxu0 }
0x2ed9   :  { %7000 = vtanh.f32 %v3639_v44 }
0x2ee6   :  { %v7001_v54 = vpop.eup %7000 }
0x2ee7   :  { %6588 = vmatmul.mubr.msk.f32.vlgmr.msra.gmra.mxu1 %vm142_vm1, %v7001_v54 }
0x2ee8   :  { %6602 = vmatpush3.msra.mxu1 %v8163_v39  ;;  %6609 = vmatprep.mubr.msk.f32.mxu1 %vm7172_vm0, %v7171_v6 }
0x2ee9   :  { %6603 = vmatprep.subr.mxu1 %v7171_v6 }
0x2eea   :  { %6604 = vmatpush3.msra.mxu1 %v8172_v16 }
0x2eeb   :  { %6605 = vmatprep.subr.mxu1 %v7171_v6 }
0x2eec   :  { %6606 = vmatpush3.msra.mxu1 %v8179_v40 }
0x2eed   :  { %6607 = vmatprep.subr.mxu1 %v7171_v6 }
0x2eee   :  { %6608 = vmatpush3.msra.mxu1 %v8186_v18 }
0x2eef   :  { %6623 = vmatprep.subr.mxu1 %v7171_v6 }
0x2fa7   :  { %v3712_v61 = vpop.f32.mrf.mxu1 }
0x2fa8   :  { %v3713_v62 = vadd.f32 %v8193_v63, %v3712_v61 }
0x2fa9   :  { %v6589_v10 = vpop.f32.mrf.mxu1 }
0x2faa   :  { %v3716_v11 = vmul.f32 %v3713_v62, %v3535_v56 }
0x2fac   :  { %3726 = vrot.lane.b32.xlu0 %v3716_v11, %s7175_s26  ;;  %3718 = vrot.lane.b32.xlu1 %v3716_v11, %s7174_s4 }
0x2fb0   :  { %3722 = vrot.lane.b32.xlu1 %v3716_v11, %s7173_s25 }
0x301e   :  { %v3719_v12 = vpop.permute.xlu1 %3718  ;;  %v3727_v5 = vpop.permute.xlu0 %3726 }
0x301f   :  { %v3721_v37 = vadd.f32 %v3719_v12, %v3716_v11 }
0x3022   :  { %v3723_v38 = vpop.permute.xlu1 %3722 }
0x3023   :  { %v3725_v19 = vadd.f32 %v3723_v38, %v3721_v37  ;;  %v5879_v38 = vld [vmem:[%s8737_s2 + $0x17] ss:$0 sm:$0xff] }
0x3025   :  { %v8245_v9 = vadd.f32 %v3727_v5, %v3725_v19  ;;  %v3943_v19 = vadd.f32 %v8135_v15, %v5879_v38 }
0x3027   :  { %v3730_v22 = vsub.f32 %v8245_v9, %v8202_v50  ;;  %v3930_v10 = vsub.f32 %v8199_v49, %v8245_v9 }
0x3029   :  { %v3731_v23 = vadd.f32 %v3730_v22, %v8123_v53 }
0x302b   :  { %3751 = vperm.xlu0 %6896, %v3731_v23   ;;  %3745 = vperm.xlu1 %6895, %v3731_v23  }
0x302f   :  { %6897 = vset.pattern.permute.xlu1 %v7168_v1 }
0x3030   :  { %3757 = vperm.xlu1 %6897, %v3731_v23  }
0x3034   :  { %6898 = vset.pattern.permute.xlu1 %v7170_v4 }
0x3035   :  { %3763 = vperm.xlu1 %6898, %v3731_v23  }
0x3039   :  { %6899 = vset.pattern.permute.xlu1 %v7167_v0 }
0x30a6   :  { %v3746_v48 = vpop.permute.xlu1 %3745  ;;  %v3752_v2 = vpop.permute.xlu0 %3751 }
0x30a7   :  { %v3748_v57 = vmul.f32 %v3746_v48, %v7292_v14  ;;  %v3754_v45 = vmul.f32 %v3752_v2, %v7301_v24 }
0x30a9   :  { %v3749_v50 = vadd.f32 %v3748_v57, %v3742_v27 }
0x30ab   :  { %v3758_v52 = vpop.permute.xlu1 %3757  ;;  %v3755_v17 = vadd.f32 %v3754_v45, %v3749_v50 }
0x30ac   :  { %v3760_v29 = vmul.f32 %v3758_v52, %v7303_v25 }
0x30ae   :  { %v3761_v58 = vadd.f32 %v3760_v29, %v3755_v17 }
0x30b0   :  { %v3764_v13 = vpop.permute.xlu1 %3763 }
0x30b1   :  { %v3766_v55 = vmul.f32 %v3764_v13, %v7305_v26 }
0x30b3   :  { %v3767_v59 = vadd.f32 %v3766_v55, %v3761_v58 }
0x30b5   :  { %7002 = vtanh.f32 %v3767_v59 }
0x30c2   :  { %v7003_v60 = vpop.eup %7002 }
0x30c3   :  { %6599 = vmatmul.mubr.msk.f32.vlgmr.msra.gmra.mxu0 %vm142_vm1, %v7003_v60  ;;  %v3936_v60 = vld [vmem:[#allocation5 + $0xb8] sm:$0xff] }
0x30c4   :  { %6613 = vmatpush3.msra.mxu0 %v8076_v51  ;;  %6620 = vmatprep.mubr.msk.f32.mxu0 %vm7172_vm0, %v7171_v6 }
0x30c5   :  { %6614 = vmatprep.subr.mxu0 %v7171_v6 }
0x30c6   :  { %6615 = vmatpush3.msra.mxu0 %v8085_v20 }
0x30c7   :  { %6616 = vmatprep.subr.mxu0 %v7171_v6 }
0x30c8   :  { %6617 = vmatpush3.msra.mxu0 %v8092_v21 }
0x30c9   :  { %6618 = vmatprep.subr.mxu0 %v7171_v6 }
0x30ca   :  { %6619 = vmatpush3.msra.mxu0 %v8099_v7 }
0x30cb   :  { %6634 = vmatprep.subr.mxu0 %v7171_v6 }
0x3183   :  { %v3838_v46 = vpop.f32.mrf.mxu0 }
0x3184   :  { %v3839_v31 = vadd.f32 %v8156_v41, %v3838_v46 }
0x3185   :  { %v6600_v32 = vpop.f32.mrf.mxu0 }
0x3186   :  { %7004 = vtanh.f32 %v3839_v31 }
0x3193   :  { %v7005_v33 = vpop.eup %7004 }
0x3194   :  { %6610 = vmatmul.mubr.msk.f32.vlgmr.msra.gmra.mxu1 %vm142_vm1, %v7005_v33 }
0x3195   :  { %6624 = vmatpush3.msra.mxu1 %v8163_v39  ;;  %6631 = vmatprep.mubr.msk.f32.mxu1 %vm7172_vm0, %v7171_v6 }
0x3196   :  { %6625 = vmatprep.subr.mxu1 %v7171_v6 }
0x3197   :  { %6626 = vmatpush3.msra.mxu1 %v8172_v16 }
0x3198   :  { %6627 = vmatprep.subr.mxu1 %v7171_v6 }
0x3199   :  { %6628 = vmatpush3.msra.mxu1 %v8179_v40 }
0x319a   :  { %6629 = vmatprep.subr.mxu1 %v7171_v6 }
0x319b   :  { %6630 = vmatpush3.msra.mxu1 %v8186_v18 }
0x319c   :  { %6645 = vmatprep.subr.mxu1 %v7171_v6 }
0x3254   :  { %v3912_v35 = vpop.f32.mrf.mxu1 }
0x3255   :  { %v3913_v36 = vadd.f32 %v8193_v63, %v3912_v35 }
0x3256   :  { %v6611_v43 = vpop.f32.mrf.mxu1 }
0x3257   :  { %v3916_v44 = vmul.f32 %v3913_v36, %v3735_v34 }
0x3259   :  { %3922 = vrot.lane.b32.xlu1 %v3916_v44, %s7173_s25  ;;  %3918 = vrot.lane.b32.xlu0 %v3916_v44, %s7174_s4 }
0x325d   :  { %3926 = vrot.lane.b32.xlu0 %v3916_v44, %s7175_s26 }
0x32cb   :  { %v3919_v47 = vpop.permute.xlu0 %3918  ;;  %v3923_v56 = vpop.permute.xlu1 %3922 }
0x32cc   :  { %v3921_v54 = vadd.f32 %v3919_v47, %v3916_v44 }
0x32ce   :  { %v3925_v61 = vadd.f32 %v3923_v56, %v3921_v54 }
0x32cf   :  { %v3927_v62 = vpop.permute.xlu0 %3926 }
0x32d0   :  { %v3929_v11 = vadd.f32 %v3927_v62, %v3925_v61 }
0x32d2   :  { %v3931_v12 = vadd.f32 %v3930_v10, %v3929_v11  ;;  %v4131_v34 = vadd.f32 %v3929_v11, %v8245_v9 }
0x32d4   :  { %v3932_v37 = vadd.f32 %v3931_v12, %v8123_v53  ;;  %v4132_v36 = vmul.f32 3.0, %v4131_v34 }
0x32d6   :  { %3952 = vperm.xlu0 %6896, %v3932_v37   ;;  %3946 = vperm.xlu1 %6899, %v3932_v37   ;;  %v4133_v56 = vadd.f32 %v4132_v36, %v8199_v49  ;;  %v5883_v49 = vld [vmem:[%s8737_s2 + $0x18] ss:$0 sm:$0xff] }
0x32d7   :  { %v4147_v9 = vadd.f32 %v8135_v15, %v5883_v49 }
0x32da   :  { %6901 = vset.pattern.permute.xlu0 %v7170_v4  ;;  %6900 = vset.pattern.permute.xlu1 %v7168_v1 }
0x32db   :  { %3964 = vperm.xlu0 %6901, %v3932_v37   ;;  %3958 = vperm.xlu1 %6900, %v3932_v37  }
0x32df   :  { %6903 = vset.pattern.permute.xlu0 %v7169_v3  ;;  %6902 = vset.pattern.permute.xlu1 %v7167_v0 }
0x3351   :  { %v3953_v5 = vpop.permute.xlu0 %3952  ;;  %v3947_v22 = vpop.permute.xlu1 %3946 }
0x3352   :  { %v3949_v23 = vmul.f32 %v3947_v22, %v7292_v14  ;;  %v3955_v42 = vmul.f32 %v3953_v5, %v7301_v24 }
0x3354   :  { %v3950_v27 = vadd.f32 %v3949_v23, %v3943_v19 }
0x3356   :  { %v3965_v48 = vpop.permute.xlu0 %3964  ;;  %v3956_v57 = vadd.f32 %v3955_v42, %v3950_v27  ;;  %v3959_v2 = vpop.permute.xlu1 %3958 }
0x3357   :  { %v3961_v50 = vmul.f32 %v3959_v2, %v7303_v25  ;;  %v3967_v45 = vmul.f32 %v3965_v48, %v7305_v26 }
0x3359   :  { %v3962_v52 = vadd.f32 %v3961_v50, %v3956_v57 }
0x335b   :  { %v3968_v17 = vadd.f32 %v3967_v45, %v3962_v52 }
0x335d   :  { %7006 = vtanh.f32 %v3968_v17 }
0x336a   :  { %v7007_v29 = vpop.eup %7006 }
0x336b   :  { %6621 = vmatmul.mubr.msk.f32.vlgmr.msra.gmra.mxu0 %vm142_vm1, %v7007_v29 }
0x336c   :  { %6635 = vmatpush3.msra.mxu0 %v8076_v51  ;;  %6642 = vmatprep.mubr.msk.f32.mxu0 %vm7172_vm0, %v7171_v6 }
0x336d   :  { %6636 = vmatprep.subr.mxu0 %v7171_v6 }
0x336e   :  { %6637 = vmatpush3.msra.mxu0 %v8085_v20 }
0x336f   :  { %6638 = vmatprep.subr.mxu0 %v7171_v6 }
0x3370   :  { %6639 = vmatpush3.msra.mxu0 %v8092_v21 }
0x3371   :  { %6640 = vmatprep.subr.mxu0 %v7171_v6 }
0x3372   :  { %6641 = vmatpush3.msra.mxu0 %v8099_v7 }
0x3373   :  { %6656 = vmatprep.subr.mxu0 %v7171_v6 }
0x342b   :  { %v4039_v13 = vpop.f32.mrf.mxu0 }
0x342c   :  { %v4040_v58 = vadd.f32 %v8156_v41, %v4039_v13  ;;  %v4140_v13 = vld [vmem:[#allocation5 + $0xc0] sm:$0xff] }
0x342d   :  { %v6622_v55 = vpop.f32.mrf.mxu0 }
0x342e   :  { %7008 = vtanh.f32 %v4040_v58 }
0x343b   :  { %v7009_v59 = vpop.eup %7008 }
0x343c   :  { %6632 = vmatmul.mubr.msk.f32.vlgmr.msra.gmra.mxu1 %vm142_vm1, %v7009_v59 }
0x343d   :  { %6646 = vmatpush3.msra.mxu1 %v8163_v39  ;;  %6653 = vmatprep.mubr.msk.f32.mxu1 %vm7172_vm0, %v7171_v6 }
0x343e   :  { %6647 = vmatprep.subr.mxu1 %v7171_v6 }
0x343f   :  { %6648 = vmatpush3.msra.mxu1 %v8172_v16 }
0x3440   :  { %6649 = vmatprep.subr.mxu1 %v7171_v6 }
0x3441   :  { %6650 = vmatpush3.msra.mxu1 %v8179_v40 }
0x3442   :  { %6651 = vmatprep.subr.mxu1 %v7171_v6 }
0x3443   :  { %6652 = vmatpush3.msra.mxu1 %v8186_v18 }
0x3444   :  { %6667 = vmatprep.subr.mxu1 %v7171_v6 }
0x34fc   :  { %v4113_v46 = vpop.f32.mrf.mxu1 }
0x34fd   :  { %v4114_v31 = vadd.f32 %v8193_v63, %v4113_v46 }
0x34fe   :  { %v6633_v32 = vpop.f32.mrf.mxu1 }
0x34ff   :  { %v4117_v33 = vmul.f32 %v4114_v31, %v3936_v60 }
0x3501   :  { %4127 = vrot.lane.b32.xlu0 %v4117_v33, %s7175_s26  ;;  %4119 = vrot.lane.b32.xlu1 %v4117_v33, %s7174_s4 }
0x3505   :  { %4123 = vrot.lane.b32.xlu1 %v4117_v33, %s7173_s25 }
0x3573   :  { %v4120_v35 = vpop.permute.xlu1 %4119  ;;  %v4128_v54 = vpop.permute.xlu0 %4127 }
0x3574   :  { %v4122_v43 = vadd.f32 %v4120_v35, %v4117_v33 }
0x3577   :  { %v4124_v44 = vpop.permute.xlu1 %4123 }
0x3578   :  { %v4126_v47 = vadd.f32 %v4124_v44, %v4122_v43  ;;  %v5887_v44 = vld [vmem:[%s8737_s2 + $0x19] ss:$0 sm:$0xff] }
0x357a   :  { %v4130_v61 = vadd.f32 %v4128_v54, %v4126_v47  ;;  %v4347_v47 = vadd.f32 %v8135_v15, %v5887_v44 }
0x357c   :  { %v4134_v62 = vadd.f32 %v4133_v56, %v4130_v61 }
0x357e   :  { %v4135_v10 = vmul.f32 0.125, %v4134_v62 }
0x3580   :  { %v8333_v12 = vadd.f32 %v4135_v10, %v8123_v53 }
0x3582   :  { %4156 = vperm.xlu0 %6903, %v8333_v12   ;;  %4150 = vperm.xlu1 %6902, %v8333_v12  }
0x3586   :  { %6904 = vset.pattern.permute.xlu1 %v7168_v1 }
0x3587   :  { %4162 = vperm.xlu1 %6904, %v8333_v12  }
0x358b   :  { %6905 = vset.pattern.permute.xlu1 %v7170_v4 }
0x358c   :  { %4168 = vperm.xlu1 %6905, %v8333_v12  }
0x3590   :  { %6906 = vset.pattern.permute.xlu1 %v7167_v0 }
0x35fd   :  { %v4151_v11 = vpop.permute.xlu1 %4150  ;;  %v4157_v38 = vpop.permute.xlu0 %4156 }
0x35fe   :  { %v4153_v37 = vmul.f32 %v4151_v11, %v7292_v14  ;;  %v4159_v5 = vmul.f32 %v4157_v38, %v7301_v24 }
0x3600   :  { %v4154_v19 = vadd.f32 %v4153_v37, %v4147_v9 }
0x3602   :  { %v4163_v22 = vpop.permute.xlu1 %4162  ;;  %v4160_v23 = vadd.f32 %v4159_v5, %v4154_v19 }
0x3603   :  { %v4165_v42 = vmul.f32 %v4163_v22, %v7303_v25 }
0x3605   :  { %v4166_v48 = vadd.f32 %v4165_v42, %v4160_v23 }
0x3607   :  { %v4169_v27 = vpop.permute.xlu1 %4168 }
0x3608   :  { %v4171_v57 = vmul.f32 %v4169_v27, %v7305_v26 }
0x360a   :  { %v4172_v2 = vadd.f32 %v4171_v57, %v4166_v48  ;;  %v4340_v57 = vld [vmem:[#allocation5 + $0xc8] sm:$0xff] }
0x360c   :  { %7010 = vtanh.f32 %v4172_v2 }
0x3619   :  { %v7011_v50 = vpop.eup %7010 }
0x361a   :  { %6643 = vmatmul.mubr.msk.f32.vlgmr.msra.gmra.mxu0 %vm142_vm1, %v7011_v50 }
0x361b   :  { %6657 = vmatpush3.msra.mxu0 %v8076_v51  ;;  %6664 = vmatprep.mubr.msk.f32.mxu0 %vm7172_vm0, %v7171_v6 }
0x361c   :  { %6658 = vmatprep.subr.mxu0 %v7171_v6 }
0x361d   :  { %6659 = vmatpush3.msra.mxu0 %v8085_v20 }
0x361e   :  { %6660 = vmatprep.subr.mxu0 %v7171_v6 }
0x361f   :  { %6661 = vmatpush3.msra.mxu0 %v8092_v21 }
0x3620   :  { %6662 = vmatprep.subr.mxu0 %v7171_v6 }
0x3621   :  { %6663 = vmatpush3.msra.mxu0 %v8099_v7 }
0x3622   :  { %6678 = vmatprep.subr.mxu0 %v7171_v6 }
0x36da   :  { %v4243_v45 = vpop.f32.mrf.mxu0 }
0x36db   :  { %v4244_v52 = vadd.f32 %v8156_v41, %v4243_v45 }
0x36dc   :  { %v6644_v17 = vpop.f32.mrf.mxu0 }
0x36dd   :  { %7012 = vtanh.f32 %v4244_v52 }
0x36ea   :  { %v7013_v29 = vpop.eup %7012 }
0x36eb   :  { %6654 = vmatmul.mubr.msk.f32.vlgmr.msra.gmra.mxu1 %vm142_vm1, %v7013_v29 }
0x36ec   :  { %6668 = vmatpush3.msra.mxu1 %v8163_v39  ;;  %6675 = vmatprep.mubr.msk.f32.mxu1 %vm7172_vm0, %v7171_v6 }
0x36ed   :  { %6669 = vmatprep.subr.mxu1 %v7171_v6 }
0x36ee   :  { %6670 = vmatpush3.msra.mxu1 %v8172_v16 }
0x36ef   :  { %6671 = vmatprep.subr.mxu1 %v7171_v6 }
0x36f0   :  { %6672 = vmatpush3.msra.mxu1 %v8179_v40 }
0x36f1   :  { %6673 = vmatprep.subr.mxu1 %v7171_v6 }
0x36f2   :  { %6674 = vmatpush3.msra.mxu1 %v8186_v18 }
0x36f3   :  { %6689 = vmatprep.subr.mxu1 %v7171_v6 }
0x37ab   :  { %v4317_v58 = vpop.f32.mrf.mxu1 }
0x37ac   :  { %v4318_v55 = vadd.f32 %v8193_v63, %v4317_v58 }
0x37ad   :  { %v6655_v59 = vpop.f32.mrf.mxu1 }
0x37ae   :  { %v4321_v60 = vmul.f32 %v4318_v55, %v4140_v13 }
0x37b0   :  { %4327 = vrot.lane.b32.xlu1 %v4321_v60, %s7173_s25  ;;  %4323 = vrot.lane.b32.xlu0 %v4321_v60, %s7174_s4 }
0x37b4   :  { %4331 = vrot.lane.b32.xlu0 %v4321_v60, %s7175_s26 }
0x3822   :  { %v4324_v46 = vpop.permute.xlu0 %4323  ;;  %v4328_v32 = vpop.permute.xlu1 %4327 }
0x3823   :  { %v4326_v31 = vadd.f32 %v4324_v46, %v4321_v60 }
0x3825   :  { %v4330_v33 = vadd.f32 %v4328_v32, %v4326_v31  ;;  %v5891_v31 = vld [vmem:[%s8737_s2 + $0x1a] ss:$0 sm:$0xff] }
0x3826   :  { %v4332_v34 = vpop.permute.xlu0 %4331  ;;  %v4547_v32 = vadd.f32 %v8135_v15, %v5891_v31 }
0x3827   :  { %v8377_v35 = vadd.f32 %v4332_v34, %v4330_v33 }
0x3829   :  { %v8380_v36 = vmul.f32 0.33333334, %v8377_v35 }
0x382b   :  { %v4336_v43 = vadd.f32 %v8380_v36, %v8333_v12 }
0x382d   :  { %4356 = vperm.xlu0 %6903, %v4336_v43   ;;  %4350 = vperm.xlu1 %6906, %v4336_v43  }
0x3831   :  { %6908 = vset.pattern.permute.xlu0 %v7170_v4  ;;  %6907 = vset.pattern.permute.xlu1 %v7168_v1 }
0x3832   :  { %4368 = vperm.xlu0 %6908, %v4336_v43   ;;  %4362 = vperm.xlu1 %6907, %v4336_v43  }
0x3836   :  { %6910 = vset.pattern.permute.xlu0 %v7169_v3  ;;  %6909 = vset.pattern.permute.xlu1 %v7167_v0 }
0x38a8   :  { %v4357_v54 = vpop.permute.xlu0 %4356  ;;  %v4351_v56 = vpop.permute.xlu1 %4350 }
0x38a9   :  { %v4353_v61 = vmul.f32 %v4351_v56, %v7292_v14  ;;  %v4359_v62 = vmul.f32 %v4357_v54, %v7301_v24 }
0x38ab   :  { %v4354_v10 = vadd.f32 %v4353_v61, %v4347_v47 }
0x38ad   :  { %v4369_v49 = vpop.permute.xlu0 %4368  ;;  %v4360_v9 = vadd.f32 %v4359_v62, %v4354_v10  ;;  %v4363_v11 = vpop.permute.xlu1 %4362 }
0x38ae   :  { %v4365_v37 = vmul.f32 %v4363_v11, %v7303_v25  ;;  %v4371_v38 = vmul.f32 %v4369_v49, %v7305_v26 }
0x38b0   :  { %v4366_v19 = vadd.f32 %v4365_v37, %v4360_v9 }
0x38b2   :  { %v4372_v5 = vadd.f32 %v4371_v38, %v4366_v19 }
0x38b4   :  { %7014 = vtanh.f32 %v4372_v5 }
0x38c1   :  { %v7015_v22 = vpop.eup %7014 }
0x38c2   :  { %6665 = vmatmul.mubr.msk.f32.vlgmr.msra.gmra.mxu0 %vm142_vm1, %v7015_v22 }
0x38c3   :  { %6679 = vmatpush3.msra.mxu0 %v8076_v51  ;;  %6686 = vmatprep.mubr.msk.f32.mxu0 %vm7172_vm0, %v7171_v6 }
0x38c4   :  { %6680 = vmatprep.subr.mxu0 %v7171_v6 }
0x38c5   :  { %6681 = vmatpush3.msra.mxu0 %v8085_v20 }
0x38c6   :  { %6682 = vmatprep.subr.mxu0 %v7171_v6 }
0x38c7   :  { %6683 = vmatpush3.msra.mxu0 %v8092_v21 }
0x38c8   :  { %6684 = vmatprep.subr.mxu0 %v7171_v6 }
0x38c9   :  { %6685 = vmatpush3.msra.mxu0 %v8099_v7 }
0x38ca   :  { %6700 = vmatprep.subr.mxu0 %v7171_v6 }
0x3982   :  { %v4443_v23 = vpop.f32.mrf.mxu0 }
0x3983   :  { %v4444_v42 = vadd.f32 %v8156_v41, %v4443_v23 }
0x3984   :  { %v6666_v27 = vpop.f32.mrf.mxu0 }
0x3985   :  { %7016 = vtanh.f32 %v4444_v42 }
0x3992   :  { %v7017_v48 = vpop.eup %7016 }
0x3993   :  { %6676 = vmatmul.mubr.msk.f32.vlgmr.msra.gmra.mxu1 %vm142_vm1, %v7017_v48 }
0x3994   :  { %6690 = vmatpush3.msra.mxu1 %v8163_v39  ;;  %6697 = vmatprep.mubr.msk.f32.mxu1 %vm7172_vm0, %v7171_v6 }
0x3995   :  { %6691 = vmatprep.subr.mxu1 %v7171_v6 }
0x3996   :  { %6692 = vmatpush3.msra.mxu1 %v8172_v16 }
0x3997   :  { %6693 = vmatprep.subr.mxu1 %v7171_v6 }
0x3998   :  { %6694 = vmatpush3.msra.mxu1 %v8179_v40 }
0x3999   :  { %6695 = vmatprep.subr.mxu1 %v7171_v6 }
0x399a   :  { %6696 = vmatpush3.msra.mxu1 %v8186_v18 }
0x399b   :  { %6711 = vmatprep.subr.mxu1 %v7171_v6 }
0x3a53   :  { %v4517_v2 = vpop.f32.mrf.mxu1 }
0x3a54   :  { %v4518_v50 = vadd.f32 %v8193_v63, %v4517_v2 }
0x3a55   :  { %v6677_v45 = vpop.f32.mrf.mxu1 }
0x3a56   :  { %v4521_v52 = vmul.f32 %v4518_v50, %v4340_v57 }
0x3a58   :  { %4531 = vrot.lane.b32.xlu0 %v4521_v52, %s7175_s26  ;;  %4523 = vrot.lane.b32.xlu1 %v4521_v52, %s7174_s4 }
0x3a5c   :  { %4527 = vrot.lane.b32.xlu1 %v4521_v52, %s7173_s25 }
0x3aca   :  { %v4524_v17 = vpop.permute.xlu1 %4523  ;;  %v4532_v55 = vpop.permute.xlu0 %4531 }
0x3acb   :  { %v4526_v29 = vadd.f32 %v4524_v17, %v4521_v52  ;;  %v5895_v52 = vld [vmem:[%s8737_s2 + $0x1b] ss:$0 sm:$0xff] }
0x3acc   :  { %v4748_v17 = vadd.f32 %v8135_v15, %v5895_v52  ;;  %v8488_v15 = vld [vmem:[%s8740_s5 + $0x18] sm:$0xff] }
0x3ace   :  { %v4528_v13 = vpop.permute.xlu1 %4527 }
0x3acf   :  { %v4530_v58 = vadd.f32 %v4528_v13, %v4526_v29 }
0x3ad1   :  { %v8423_v59 = vadd.f32 %v4532_v55, %v4530_v58 }
0x3ad3   :  { %v4535_v60 = vsub.f32 %v8423_v59, %v8380_v36  ;;  %v4735_v57 = vsub.f32 %v8377_v35, %v8423_v59 }
0x3ad5   :  { %v4536_v46 = vadd.f32 %v4535_v60, %v8333_v12 }
0x3ad7   :  { %4556 = vperm.xlu0 %6910, %v4536_v46   ;;  %4550 = vperm.xlu1 %6909, %v4536_v46  }
0x3adb   :  { %6911 = vset.pattern.permute.xlu1 %v7168_v1 }
0x3adc   :  { %4562 = vperm.xlu1 %6911, %v4536_v46  }
0x3ae0   :  { %6912 = vset.pattern.permute.xlu1 %v7170_v4 }
0x3ae1   :  { %4568 = vperm.xlu1 %6912, %v4536_v46  }
0x3ae5   :  { %6913 = vset.pattern.permute.xlu1 %v7167_v0 }
0x3b52   :  { %v4551_v33 = vpop.permute.xlu1 %4550  ;;  %v4557_v36 = vpop.permute.xlu0 %4556 }
0x3b53   :  { %v4553_v34 = vmul.f32 %v4551_v33, %v7292_v14  ;;  %v4559_v44 = vmul.f32 %v4557_v36, %v7301_v24 }
0x3b55   :  { %v4554_v43 = vadd.f32 %v4553_v34, %v4547_v32 }
0x3b57   :  { %v4563_v47 = vpop.permute.xlu1 %4562  ;;  %v4560_v54 = vadd.f32 %v4559_v44, %v4554_v43 }
0x3b58   :  { %v4565_v56 = vmul.f32 %v4563_v47, %v7303_v25  ;;  %v8497_v47 = vld [vmem:[%s8740_s5 + $0x10] sm:$0xff] }
0x3b5a   :  { %v4566_v62 = vadd.f32 %v4565_v56, %v4560_v54  ;;  %v8504_v54 = vld [vmem:[%s8740_s5 + $0x8] sm:$0xff]  ;;  %v8511_v56 = vld [vmem:[%s8740_s5] sm:$0xff]  ;;  %s5790_s5 = sshll.u32 %s7182_s20, 4  ;;  %s5791_s5 = int_to_ptr.vmem [resolvable:$true] %s5790_s5 }
0x3b5b   :  { %p7141_p2 = scmp.lt.s32.totalorder %s5791_s5, %s5791_s5 }
0x3b5c   :  { %v4569_v61 = vpop.permute.xlu1 %4568 }
0x3b5d   :  { %v4571_v10 = vmul.f32 %v4569_v61, %v7305_v26 }
0x3b5f   :  { %v4572_v49 = vadd.f32 %v4571_v10, %v4566_v62 }
0x3b61   :  { %7018 = vtanh.f32 %v4572_v49 }
0x3b6e   :  { %v7019_v9 = vpop.eup %7018 }
0x3b6f   :  { %6687 = vmatmul.mubr.msk.f32.vlgmr.msra.gmra.mxu0 %vm142_vm1, %v7019_v9 }
0x3b70   :  { %6701 = vmatpush3.msra.mxu0 %v8076_v51  ;;  %6708 = vmatprep.mubr.msk.f32.mxu0 %vm7172_vm0, %v7171_v6 }
0x3b71   :  { %6702 = vmatprep.subr.mxu0 %v7171_v6 }
0x3b72   :  { %6703 = vmatpush3.msra.mxu0 %v8085_v20  ;;  %v4540_v20 = vld [vmem:[#allocation5 + $0xd0] sm:$0xff] }
0x3b73   :  { %6704 = vmatprep.subr.mxu0 %v7171_v6 }
0x3b74   :  { %6705 = vmatpush3.msra.mxu0 %v8092_v21 }
0x3b75   :  { %6706 = vmatprep.subr.mxu0 %v7171_v6 }
0x3b76   :  { %6707 = vmatpush3.msra.mxu0 %v8099_v7 }
0x3b77   :  { %6722 = vmatprep.subr.mxu0 %v7171_v6 }
0x3c2f   :  { %v4643_v11 = vpop.f32.mrf.mxu0 }
0x3c30   :  { %v4644_v51 = vadd.f32 %v8156_v41, %v4643_v11 }
0x3c31   :  { %v6688_v37 = vpop.f32.mrf.mxu0 }
0x3c32   :  { %7020 = vtanh.f32 %v4644_v51 }
0x3c3f   :  { %v7021_v38 = vpop.eup %7020 }
0x3c40   :  { %6698 = vmatmul.mubr.msk.f32.vlgmr.msra.gmra.mxu1 %vm142_vm1, %v7021_v38 }
0x3c41   :  { %6712 = vmatpush3.msra.mxu1 %v8163_v39  ;;  %6719 = vmatprep.mubr.msk.f32.mxu1 %vm7172_vm0, %v7171_v6 }
0x3c42   :  { %6713 = vmatprep.subr.mxu1 %v7171_v6 }
0x3c43   :  { %6714 = vmatpush3.msra.mxu1 %v8172_v16 }
0x3c44   :  { %6715 = vmatprep.subr.mxu1 %v7171_v6 }
0x3c45   :  { %6716 = vmatpush3.msra.mxu1 %v8179_v40 }
0x3c46   :  { %6717 = vmatprep.subr.mxu1 %v7171_v6 }
0x3c47   :  { %6718 = vmatpush3.msra.mxu1 %v8186_v18 }
0x3c48   :  { %6733 = vmatprep.subr.mxu1 %v7171_v6 }
0x3d00   :  { %v4717_v21 = vpop.f32.mrf.mxu1 }
0x3d01   :  { %v4718_v7 = vadd.f32 %v8193_v63, %v4717_v21 }
0x3d02   :  { %v6699_v19 = vpop.f32.mrf.mxu1 }
0x3d03   :  { %v4721_v5 = vmul.f32 %v4718_v7, %v4540_v20 }
0x3d05   :  { %4727 = vrot.lane.b32.xlu1 %v4721_v5, %s7173_s25  ;;  %4723 = vrot.lane.b32.xlu0 %v4721_v5, %s7174_s4 }
0x3d09   :  { %4731 = vrot.lane.b32.xlu0 %v4721_v5, %s7175_s26 }
0x3d77   :  { %v4724_v22 = vpop.permute.xlu0 %4723  ;;  %v4728_v42 = vpop.permute.xlu1 %4727 }
0x3d78   :  { %v4726_v23 = vadd.f32 %v4724_v22, %v4721_v5 }
0x3d7a   :  { %v4730_v27 = vadd.f32 %v4728_v42, %v4726_v23 }
0x3d7b   :  { %v4732_v48 = vpop.permute.xlu0 %4731 }
0x3d7c   :  { %v8468_v2 = vadd.f32 %v4732_v48, %v4730_v27 }
0x3d7e   :  { %v4736_v50 = vadd.f32 %v4735_v57, %v8468_v2 }
0x3d80   :  { %v4737_v45 = vadd.f32 %v4736_v50, %v8333_v12 }
0x3d82   :  { %4757 = vperm.xlu0 %6910, %v4737_v45   ;;  %4751 = vperm.xlu1 %6913, %v4737_v45  }
0x3d86   :  { %6915 = vset.pattern.permute.xlu0 %v7170_v4  ;;  %6914 = vset.pattern.permute.xlu1 %v7168_v1 }
0x3d87   :  { %4769 = vperm.xlu0 %6915, %v4737_v45   ;;  %4763 = vperm.xlu1 %6914, %v4737_v45  }
0x3d8b   :  { %6917 = vset.pattern.permute.xlu0 %v7169_v3  ;;  %6916 = vset.pattern.permute.xlu1 %v7167_v0 }
0x3dfd   :  { %v4758_v29 = vpop.permute.xlu0 %4757  ;;  %v4752_v13 = vpop.permute.xlu1 %4751 }
0x3dfe   :  { %v4754_v58 = vmul.f32 %v4752_v13, %v7292_v14  ;;  %v4760_v55 = vmul.f32 %v4758_v29, %v7301_v24 }
0x3e00   :  { %v4755_v60 = vadd.f32 %v4754_v58, %v4748_v17 }
0x3e02   :  { %v4770_v46 = vpop.permute.xlu0 %4769  ;;  %v4761_v31 = vadd.f32 %v4760_v55, %v4755_v60  ;;  %v4764_v32 = vpop.permute.xlu1 %4763 }
0x3e03   :  { %v4766_v33 = vmul.f32 %v4764_v32, %v7303_v25  ;;  %v4772_v34 = vmul.f32 %v4770_v46, %v7305_v26  ;;  %v8568_v46 = vld [vmem:[%s8741_s6] ss:$0 sm:$0xff] }
0x3e05   :  { %v4767_v36 = vadd.f32 %v4766_v33, %v4761_v31 }
0x3e07   :  { %v4773_v43 = vadd.f32 %v4772_v34, %v4767_v36  ;;  %v8575_v34 = vld [vmem:[%s8742_s7 + $0x18] sm:$0xff]  ;;  %v8584_v36 = vld [vmem:[%s8742_s7 + $0x10] sm:$0xff] }
0x3e09   :  { %7022 = vtanh.f32 %v4773_v43  ;;  %v8591_v43 = vld [vmem:[%s8742_s7 + $0x8] sm:$0xff] }
0x3e16   :  { %v7023_v44 = vpop.eup %7022 }
0x3e17   :  { %6709 = vmatmul.mubr.msk.f32.vlgmr.msra.gmra.mxu0 %vm142_vm1, %v7023_v44  ;;  %v8598_v44 = vld [vmem:[%s8742_s7] sm:$0xff] }
0x3e18   :  { %6723 = vmatpush3.msra.mxu0 %v8488_v15  ;;  %6730 = vmatprep.mubr.msk.f32.mxu0 %vm7172_vm0, %v7171_v6 }
0x3e19   :  { %6724 = vmatprep.subr.mxu0 %v7171_v6 }
0x3e1a   :  { %6725 = vmatpush3.msra.mxu0 %v8497_v47 }
0x3e1b   :  { %6726 = vmatprep.subr.mxu0 %v7171_v6 }
0x3e1c   :  { %6727 = vmatpush3.msra.mxu0 %v8504_v54 }
0x3e1d   :  { %6728 = vmatprep.subr.mxu0 %v7171_v6 }
0x3e1e   :  { %6729 = vmatpush3.msra.mxu0 %v8511_v56 }
0x3e1f   :  { %6744 = vmatprep.subr.mxu0 %v7171_v6 }
0x3ed7   :  { %v4844_v61 = vpop.f32.mrf.mxu0 }
0x3ed8   :  { %v4845_v62 = vadd.f32 %v8156_v41, %v4844_v61  ;;  %v4741_v41 = vld [vmem:[#allocation5 + $0xd8] sm:$0xff]  ;;  %v4945_v61 = vld [vmem:[#allocation5 + $0xe0] sm:$0xff] }
0x3ed9   :  { %v6710_v10 = vpop.f32.mrf.mxu0 }
0x3eda   :  { %7024 = vtanh.f32 %v4845_v62  ;;  %v8605_v10 = vld [vmem:[%s8743_s8] ss:$0 sm:$0xff] }
0x3ee7   :  { %v7025_v49 = vpop.eup %7024 }
0x3ee8   :  { %6720 = vmatmul.mubr.msk.f32.vlgmr.msra.gmra.mxu1 %vm142_vm1, %v7025_v49 }
0x3ee9   :  { %6734 = vmatpush3.msra.mxu1 %v8163_v39  ;;  %6741 = vmatprep.mubr.msk.f32.mxu1 %vm7172_vm0, %v7171_v6 }
0x3eea   :  { %6735 = vmatprep.subr.mxu1 %v7171_v6 }
0x3eeb   :  { %6736 = vmatpush3.msra.mxu1 %v8172_v16  ;;  %v4936_v16 = vadd.f32 %v8468_v2, %v8423_v59  ;;  %v8547_v59 = vld [vmem:[#allocation2] sm:$0xff] }
0x3eec   :  { %6737 = vmatprep.subr.mxu1 %v7171_v6 }
0x3eed   :  { %6738 = vmatpush3.msra.mxu1 %v8179_v40  ;;  %v4937_v37 = vmul.f32 3.0, %v4936_v16 }
0x3eee   :  { %6739 = vmatprep.subr.mxu1 %v7171_v6 }
0x3eef   :  { %6740 = vmatpush3.msra.mxu1 %v8186_v18  ;;  %v4938_v7 = vadd.f32 %v4937_v37, %v8377_v35  ;;  %v5899_v35 = vld [vmem:[%s8737_s2 + $0x1c] ss:$0 sm:$0xff] }
0x3ef0   :  { %6755 = vmatprep.subr.mxu1 %v7171_v6  ;;  %v4952_v23 = vadd.f32 %v8547_v59, %v5899_v35 }
0x3fa8   :  { %v4918_v9 = vpop.f32.mrf.mxu1 }
0x3fa9   :  { %v4919_v39 = vadd.f32 %v8193_v63, %v4918_v9 }
0x3faa   :  { %v6721_v11 = vpop.f32.mrf.mxu1 }
0x3fab   :  { %v4922_v51 = vmul.f32 %v4919_v39, %v4741_v41 }
0x3fad   :  { %4932 = vrot.lane.b32.xlu0 %v4922_v51, %s7175_s26  ;;  %4924 = vrot.lane.b32.xlu1 %v4922_v51, %s7174_s4 }
0x3fb1   :  { %4928 = vrot.lane.b32.xlu1 %v4922_v51, %s7173_s25 }
0x401f   :  { %v4925_v40 = vpop.permute.xlu1 %4924  ;;  %v4933_v21 = vpop.permute.xlu0 %4932 }
0x4020   :  { %v4927_v18 = vadd.f32 %v4925_v40, %v4922_v51 }
0x4023   :  { %v4929_v38 = vpop.permute.xlu1 %4928 }
0x4024   :  { %v4931_v20 = vadd.f32 %v4929_v38, %v4927_v18 }
0x4026   :  { %v4935_v63 = vadd.f32 %v4933_v21, %v4931_v20  ;;  %v5903_v20 = vld [vmem:[%s8737_s2 + $0x1d] ss:$0 sm:$0xff] }
0x4027   :  { %v5152_v21 = vadd.f32 %v8547_v59, %v5903_v20 }
0x4028   :  { %v4939_v19 = vadd.f32 %v4938_v7, %v4935_v63 }
0x402a   :  { %v4940_v5 = vmul.f32 0.125, %v4939_v19 }
0x402c   :  { %v8535_v22 = vadd.f32 %v4940_v5, %v8333_v12 }
0x402e   :  { %4961 = vperm.xlu0 %6917, %v8535_v22   ;;  %4955 = vperm.xlu1 %6916, %v8535_v22  }
0x4032   :  { %6918 = vset.pattern.permute.xlu1 %v7168_v1 }
0x4033   :  { %4967 = vperm.xlu1 %6918, %v8535_v22  }
0x4037   :  { %6919 = vset.pattern.permute.xlu1 %v7170_v4 }
0x4038   :  { %4973 = vperm.xlu1 %6919, %v8535_v22  }
0x403c   :  { %6920 = vset.pattern.permute.xlu1 %v7167_v0 }
0x40a9   :  { %v4956_v42 = vpop.permute.xlu1 %4955  ;;  %v4962_v48 = vpop.permute.xlu0 %4961 }
0x40aa   :  { %v4958_v27 = vmul.f32 %v4956_v42, %v7292_v14  ;;  %v4964_v2 = vmul.f32 %v4962_v48, %v7301_v24 }
0x40ac   :  { %v4959_v57 = vadd.f32 %v4958_v27, %v4952_v23 }
0x40ae   :  { %v4968_v50 = vpop.permute.xlu1 %4967  ;;  %v4965_v45 = vadd.f32 %v4964_v2, %v4959_v57 }
0x40af   :  { %v4970_v52 = vmul.f32 %v4968_v50, %v7303_v25 }
0x40b1   :  { %v4971_v29 = vadd.f32 %v4970_v52, %v4965_v45 }
0x40b3   :  { %v4974_v17 = vpop.permute.xlu1 %4973 }
0x40b4   :  { %v4976_v13 = vmul.f32 %v4974_v17, %v7305_v26 }
0x40b6   :  { %v4977_v58 = vadd.f32 %v4976_v13, %v4971_v29  ;;  %v5145_v13 = vld [vmem:[#allocation5 + $0xe8] sm:$0xff] }
0x40b8   :  { %7026 = vtanh.f32 %v4977_v58 }
0x40c5   :  { %v7027_v55 = vpop.eup %7026 }
0x40c6   :  { %6731 = vmatmul.mubr.msk.f32.vlgmr.msra.gmra.mxu0 %vm142_vm1, %v7027_v55 }
0x40c7   :  { %6745 = vmatpush3.msra.mxu0 %v8488_v15  ;;  %6752 = vmatprep.mubr.msk.f32.mxu0 %vm7172_vm0, %v7171_v6 }
0x40c8   :  { %6746 = vmatprep.subr.mxu0 %v7171_v6 }
0x40c9   :  { %6747 = vmatpush3.msra.mxu0 %v8497_v47 }
0x40ca   :  { %6748 = vmatprep.subr.mxu0 %v7171_v6 }
0x40cb   :  { %6749 = vmatpush3.msra.mxu0 %v8504_v54 }
0x40cc   :  { %6750 = vmatprep.subr.mxu0 %v7171_v6 }
0x40cd   :  { %6751 = vmatpush3.msra.mxu0 %v8511_v56 }
0x40ce   :  { %6766 = vmatprep.subr.mxu0 %v7171_v6 }
0x4186   :  { %v5048_v60 = vpop.f32.mrf.mxu0 }
0x4187   :  { %v5049_v31 = vadd.f32 %v8568_v46, %v5048_v60 }
0x4188   :  { %v6732_v32 = vpop.f32.mrf.mxu0 }
0x4189   :  { %7028 = vtanh.f32 %v5049_v31 }
0x4196   :  { %v7029_v33 = vpop.eup %7028 }
0x4197   :  { %6742 = vmatmul.mubr.msk.f32.vlgmr.msra.gmra.mxu1 %vm142_vm1, %v7029_v33 }
0x4198   :  { %6756 = vmatpush3.msra.mxu1 %v8575_v34  ;;  %6763 = vmatprep.mubr.msk.f32.mxu1 %vm7172_vm0, %v7171_v6 }
0x4199   :  { %6757 = vmatprep.subr.mxu1 %v7171_v6 }
0x419a   :  { %6758 = vmatpush3.msra.mxu1 %v8584_v36 }
0x419b   :  { %6759 = vmatprep.subr.mxu1 %v7171_v6 }
0x419c   :  { %6760 = vmatpush3.msra.mxu1 %v8591_v43 }
0x419d   :  { %6761 = vmatprep.subr.mxu1 %v7171_v6 }
0x419e   :  { %6762 = vmatpush3.msra.mxu1 %v8598_v44 }
0x419f   :  { %6777 = vmatprep.subr.mxu1 %v7171_v6 }
0x4257   :  { %v5122_v62 = vpop.f32.mrf.mxu1 }
0x4258   :  { %v5123_v49 = vadd.f32 %v8605_v10, %v5122_v62 }
0x4259   :  { %v6743_v41 = vpop.f32.mrf.mxu1 }
0x425a   :  { %v5126_v9 = vmul.f32 %v5123_v49, %v4945_v61 }
0x425c   :  { %5132 = vrot.lane.b32.xlu1 %v5126_v9, %s7173_s25  ;;  %5128 = vrot.lane.b32.xlu0 %v5126_v9, %s7174_s4 }
0x4260   :  { %5136 = vrot.lane.b32.xlu0 %v5126_v9, %s7175_s26 }
0x42ce   :  { %v5129_v39 = vpop.permute.xlu0 %5128  ;;  %v5133_v51 = vpop.permute.xlu1 %5132 }
0x42cf   :  { %v5131_v11 = vadd.f32 %v5129_v39, %v5126_v9 }
0x42d1   :  { %v5135_v16 = vadd.f32 %v5133_v51, %v5131_v11  ;;  %v5907_v11 = vld [vmem:[%s8737_s2 + $0x1e] ss:$0 sm:$0xff] }
0x42d2   :  { %v5137_v40 = vpop.permute.xlu0 %5136  ;;  %v5352_v51 = vadd.f32 %v8547_v59, %v5907_v11  ;;  %v5546_v11 = vld [vmem:[#allocation5 + $0xf8] sm:$0xff] }
0x42d3   :  { %v8611_v37 = vadd.f32 %v5137_v40, %v5135_v16 }
0x42d5   :  { %v8614_v18 = vmul.f32 0.33333334, %v8611_v37 }
0x42d7   :  { %v5141_v38 = vadd.f32 %v8614_v18, %v8535_v22 }
0x42d9   :  { %5161 = vperm.xlu0 %6917, %v5141_v38   ;;  %5155 = vperm.xlu1 %6920, %v5141_v38  }
0x42dd   :  { %6922 = vset.pattern.permute.xlu0 %v7170_v4  ;;  %6921 = vset.pattern.permute.xlu1 %v7168_v1 }
0x42de   :  { %5173 = vperm.xlu0 %6922, %v5141_v38   ;;  %5167 = vperm.xlu1 %6921, %v5141_v38  }
0x42e2   :  { %6924 = vset.pattern.permute.xlu0 %v7169_v3  ;;  %6923 = vset.pattern.permute.xlu1 %v7167_v0 }
0x4354   :  { %v5162_v7 = vpop.permute.xlu0 %5161  ;;  %v5156_v63 = vpop.permute.xlu1 %5155 }
0x4355   :  { %v5158_v19 = vmul.f32 %v5156_v63, %v7292_v14  ;;  %v5164_v5 = vmul.f32 %v5162_v7, %v7301_v24 }
0x4357   :  { %v5159_v35 = vadd.f32 %v5158_v19, %v5152_v21 }
0x4359   :  { %v5174_v23 = vpop.permute.xlu0 %5173  ;;  %v5165_v42 = vadd.f32 %v5164_v5, %v5159_v35  ;;  %v5168_v27 = vpop.permute.xlu1 %5167 }
0x435a   :  { %v5170_v3 = vmul.f32 %v5168_v27, %v7303_v25  ;;  %v5176_v48 = vmul.f32 %v5174_v23, %v7305_v26 }
0x435c   :  { %v5171_v57 = vadd.f32 %v5170_v3, %v5165_v42 }
0x435e   :  { %v5177_v2 = vadd.f32 %v5176_v48, %v5171_v57 }
0x4360   :  { %7030 = vtanh.f32 %v5177_v2 }
0x436d   :  { %v7031_v50 = vpop.eup %7030 }
0x436e   :  { %6753 = vmatmul.mubr.msk.f32.vlgmr.msra.gmra.mxu0 %vm142_vm1, %v7031_v50 }
0x436f   :  { %6767 = vmatpush3.msra.mxu0 %v8488_v15  ;;  %6774 = vmatprep.mubr.msk.f32.mxu0 %vm7172_vm0, %v7171_v6 }
0x4370   :  { %6768 = vmatprep.subr.mxu0 %v7171_v6 }
0x4371   :  { %6769 = vmatpush3.msra.mxu0 %v8497_v47 }
0x4372   :  { %6770 = vmatprep.subr.mxu0 %v7171_v6 }
0x4373   :  { %6771 = vmatpush3.msra.mxu0 %v8504_v54 }
0x4374   :  { %6772 = vmatprep.subr.mxu0 %v7171_v6 }
0x4375   :  { %6773 = vmatpush3.msra.mxu0 %v8511_v56 }
0x4376   :  { %6788 = vmatprep.subr.mxu0 %v7171_v6 }
0x442e   :  { %v5248_v45 = vpop.f32.mrf.mxu0 }
0x442f   :  { %v5249_v52 = vadd.f32 %v8568_v46, %v5248_v45 }
0x4430   :  { %v6754_v17 = vpop.f32.mrf.mxu0 }
0x4431   :  { %7032 = vtanh.f32 %v5249_v52  ;;  %v5911_v17 = vld [vmem:[%s8737_s2 + $0x1f] ss:$0 sm:$0xff]  ;;  %s7176_s2 = smov 16  }
0x443e   :  { %v7033_v29 = vpop.eup %7032 }
0x443f   :  { %6764 = vmatmul.mubr.msk.f32.vlgmr.msra.gmra.mxu1 %vm142_vm1, %v7033_v29  ;;  %v5553_v29 = vadd.f32 %v8547_v59, %v5911_v17 }
0x4440   :  { %6778 = vmatpush3.msra.mxu1 %v8575_v34  ;;  %6785 = vmatprep.mubr.msk.f32.mxu1 %vm7172_vm0, %v7171_v6 }
0x4441   :  { %6779 = vmatprep.subr.mxu1 %v7171_v6 }
0x4442   :  { %6780 = vmatpush3.msra.mxu1 %v8584_v36 }
0x4443   :  { %6781 = vmatprep.subr.mxu1 %v7171_v6 }
0x4444   :  { %6782 = vmatpush3.msra.mxu1 %v8591_v43 }
0x4445   :  { %6783 = vmatprep.subr.mxu1 %v7171_v6 }
0x4446   :  { %6784 = vmatpush3.msra.mxu1 %v8598_v44 }
0x4447   :  { %6799 = vmatprep.subr.mxu1 %v7171_v6 }
0x44ff   :  { %v5322_v58 = vpop.f32.mrf.mxu1 }
0x4500   :  { %v5323_v55 = vadd.f32 %v8605_v10, %v5322_v58 }
0x4501   :  { %v6765_v60 = vpop.f32.mrf.mxu1 }
0x4502   :  { %v5326_v31 = vmul.f32 %v5323_v55, %v5145_v13 }
0x4504   :  { %5336 = vrot.lane.b32.xlu0 %v5326_v31, %s7175_s26  ;;  %5328 = vrot.lane.b32.xlu1 %v5326_v31, %s7174_s4 }
0x4508   :  { %5332 = vrot.lane.b32.xlu1 %v5326_v31, %s7173_s25 }
0x4576   :  { %v5329_v32 = vpop.permute.xlu1 %5328  ;;  %v5337_v49 = vpop.permute.xlu0 %5336 }
0x4577   :  { %v5331_v33 = vadd.f32 %v5329_v32, %v5326_v31 }
0x457a   :  { %v5333_v61 = vpop.permute.xlu1 %5332 }
0x457b   :  { %v5335_v62 = vadd.f32 %v5333_v61, %v5331_v33 }
0x457d   :  { %v8657_v41 = vadd.f32 %v5337_v49, %v5335_v62 }
0x457f   :  { %v5340_v9 = vsub.f32 %v8657_v41, %v8614_v18 }
0x4581   :  { %v5341_v39 = vadd.f32 %v5340_v9, %v8535_v22 }
0x4583   :  { %5361 = vperm.xlu0 %6924, %v5341_v39   ;;  %5355 = vperm.xlu1 %6923, %v5341_v39  }
0x4587   :  { %6925 = vset.pattern.permute.xlu1 %v7168_v1 }
0x4588   :  { %5367 = vperm.xlu1 %6925, %v5341_v39  }
0x458c   :  { %6926 = vset.pattern.permute.xlu1 %v7170_v4 }
0x458d   :  { %5373 = vperm.xlu1 %6926, %v5341_v39  }
0x4591   :  { %6927 = vset.pattern.permute.xlu1 %v7167_v0 }
0x45fe   :  { %v5356_v16 = vpop.permute.xlu1 %5355  ;;  %v5362_v18 = vpop.permute.xlu0 %5361 }
0x45ff   :  { %v5358_v40 = vmul.f32 %v5356_v16, %v7292_v14  ;;  %v5364_v20 = vmul.f32 %v5362_v18, %v7301_v24 }
0x4601   :  { %v5359_v38 = vadd.f32 %v5358_v40, %v5352_v51 }
0x4603   :  { %v5368_v21 = vpop.permute.xlu1 %5367  ;;  %v5365_v7 = vadd.f32 %v5364_v20, %v5359_v38 }
0x4604   :  { %v5370_v63 = vmul.f32 %v5368_v21, %v7303_v25 }
0x4606   :  { %v5371_v5 = vadd.f32 %v5370_v63, %v5365_v7 }
0x4608   :  { %v5374_v19 = vpop.permute.xlu1 %5373 }
0x4609   :  { %v5376_v0 = vmul.f32 %v5374_v19, %v7305_v26 }
0x460b   :  { %v5377_v35 = vadd.f32 %v5376_v0, %v5371_v5 }
0x460d   :  { %7034 = vtanh.f32 %v5377_v35 }
0x461a   :  { %v7035_v23 = vpop.eup %7034 }
0x461b   :  { %6775 = vmatmul.mubr.msk.f32.vlgmr.msra.gmra.mxu0 %vm142_vm1, %v7035_v23 }
0x461c   :  { %6789 = vmatpush3.msra.mxu0 %v8488_v15  ;;  %6796 = vmatprep.mubr.msk.f32.mxu0 %vm7172_vm0, %v7171_v6 }
0x461d   :  { %6790 = vmatprep.subr.mxu0 %v7171_v6 }
0x461e   :  { %6791 = vmatpush3.msra.mxu0 %v8497_v47  ;;  %v5345_v47 = vld [vmem:[#allocation5 + $0xf0] sm:$0xff] }
0x461f   :  { %6792 = vmatprep.subr.mxu0 %v7171_v6 }
0x4620   :  { %6793 = vmatpush3.msra.mxu0 %v8504_v54 }
0x4621   :  { %6794 = vmatprep.subr.mxu0 %v7171_v6 }
0x4622   :  { %6795 = vmatpush3.msra.mxu0 %v8511_v56 }
0x46db   :  { %v5448_v42 = vpop.f32.mrf.mxu0 }
0x46dc   :  { %v5449_v27 = vadd.f32 %v8568_v46, %v5448_v42 }
0x46dd   :  { %v6776_v3 = vpop.f32.mrf.mxu0 }
0x46de   :  { %7036 = vtanh.f32 %v5449_v27 }
0x46eb   :  { %v7037_v15 = vpop.eup %7036 }
0x46ec   :  { %6786 = vmatmul.mubr.msk.f32.vlgmr.msra.gmra.mxu1 %vm142_vm1, %v7037_v15 }
0x46ed   :  { %6800 = vmatpush3.msra.mxu1 %v8575_v34  ;;  %6807 = vmatprep.mubr.msk.f32.mxu1 %vm7172_vm0, %v7171_v6 }
0x46ee   :  { %6801 = vmatprep.subr.mxu1 %v7171_v6 }
0x46ef   :  { %6802 = vmatpush3.msra.mxu1 %v8584_v36 }
0x46f0   :  { %6803 = vmatprep.subr.mxu1 %v7171_v6 }
0x46f1   :  { %6804 = vmatpush3.msra.mxu1 %v8591_v43 }
0x46f2   :  { %6805 = vmatprep.subr.mxu1 %v7171_v6  ;;  %v5540_v6 = vsub.f32 %v8611_v37, %v8657_v41 }
0x46f3   :  { %6806 = vmatpush3.msra.mxu1 %v8598_v44 }
0x47ac   :  { %v5522_v54 = vpop.f32.mrf.mxu1 }
0x47ad   :  { %v5523_v56 = vadd.f32 %v8605_v10, %v5522_v54 }
0x47ae   :  { %v6787_v34 = vpop.f32.mrf.mxu1 }
0x47af   :  { %v5526_v48 = vmul.f32 %v5523_v56, %v5345_v47 }
0x47b1   :  { %5532 = vrot.lane.b32.xlu1 %v5526_v48, %s7173_s25  ;;  %5528 = vrot.lane.b32.xlu0 %v5526_v48, %s7174_s4 }
0x47b5   :  { %5536 = vrot.lane.b32.xlu0 %v5526_v48, %s7175_s26 }
0x4823   :  { %v5529_v36 = vpop.permute.xlu0 %5528  ;;  %v5533_v2 = vpop.permute.xlu1 %5532 }
0x4824   :  { %v5531_v57 = vadd.f32 %v5529_v36, %v5526_v48 }
0x4826   :  { %v5535_v43 = vadd.f32 %v5533_v2, %v5531_v57 }
0x4827   :  { %v5537_v50 = vpop.permute.xlu0 %5536 }
0x4828   :  { %v5539_v44 = vadd.f32 %v5537_v50, %v5535_v43 }
0x482a   :  { %v5541_v45 = vadd.f32 %v5540_v6, %v5539_v44 }
0x482c   :  { %v5542_v52 = vadd.f32 %v5541_v45, %v8535_v22 }
0x482e   :  { %5562 = vperm.xlu0 %6924, %v5542_v52   ;;  %5556 = vperm.xlu1 %6927, %v5542_v52  }
0x4832   :  { %6929 = vset.pattern.permute.xlu0 %v7170_v4  ;;  %6928 = vset.pattern.permute.xlu1 %v7168_v1 }
0x4833   :  { %5574 = vperm.xlu0 %6929, %v5542_v52   ;;  %5568 = vperm.xlu1 %6928, %v5542_v52  }
0x48a9   :  { %v5563_v13 = vpop.permute.xlu0 %5562  ;;  %v5557_v58 = vpop.permute.xlu1 %5556 }
0x48aa   :  { %v5559_v55 = vmul.f32 %v5557_v58, %v7292_v14  ;;  %v5565_v60 = vmul.f32 %v5563_v13, %v7301_v24 }
0x48ac   :  { %v5560_v31 = vadd.f32 %v5559_v55, %v5553_v29 }
0x48ae   :  { %v5575_v32 = vpop.permute.xlu0 %5574  ;;  %v5566_v33 = vadd.f32 %v5565_v60, %v5560_v31  ;;  %v5569_v4 = vpop.permute.xlu1 %5568 }
0x48af   :  { %v5571_v1 = vmul.f32 %v5569_v4, %v7303_v25  ;;  %v5577_v61 = vmul.f32 %v5575_v32, %v7305_v26 }
0x48b1   :  { %v5572_v62 = vadd.f32 %v5571_v1, %v5566_v33 }
0x48b3   :  { %v5578_v49 = vadd.f32 %v5577_v61, %v5572_v62 }
0x48b5   :  { %7038 = vtanh.f32 %v5578_v49 }
0x48c2   :  { %v7039_v9 = vpop.eup %7038 }
0x48c3   :  { %6797 = vmatmul.mubr.msk.f32.vlgmr.msra.gmra.mxu0 %vm142_vm1, %v7039_v9 }
0x4983   :  { %v5649_v59 = vpop.f32.mrf.mxu0 }
0x4984   :  { %v5650_v39 = vadd.f32 %v8568_v46, %v5649_v59  ;;  %v5741_v46 = vadd.f32 %v5539_v44, %v8657_v41  ;;  %v7075_v41 = vld [vmem:[%s8735_s0] sm:$0xff]  ;;  %s7136_s0 = scalar_lea.vmem %s5791_s5, 128 }
0x4985   :  { %v6798_v14 = vpop.f32.mrf.mxu0  ;;  %p7137_p1 = scmp.ne.s32.totalorder %s5791_s5, %s7136_s0  ;;  %p7142_p3 = scmp.lt.s32.totalorder %s7136_s0, %s7136_s0 }
0x4986   :  { %7040 = vtanh.f32 %v5650_v39 }
0x4987   :  { %p7143_p4 = por %p7142_p3, %p7141_p2 }
0x4989   :  { %p7144_p5 = pnand %p7143_p4, %p7137_p1 }
0x4993   :  { %v7041_v24 = vpop.eup %7040 }
0x4994   :  { %6808 = vmatmul.mubr.msk.f32.vlgmr.msra.gmra.mxu1 %vm142_vm1, %v7041_v24 }
0x4a54   :  { %v5723_v51 = vpop.f32.mrf.mxu1 }
0x4a55   :  { %v5724_v25 = vadd.f32 %v8605_v10, %v5723_v51  ;;  %v5742_v10 = vmul.f32 3.0, %v5741_v46 }
0x4a56   :  { %v6809_v16 = vpop.f32.mrf.mxu1 }
0x4a57   :  { %v5727_v26 = vmul.f32 %v5724_v25, %v5546_v11  ;;  %v5743_v20 = vadd.f32 %v5742_v10, %v8611_v37 }
0x4a59   :  { %5737 = vrot.lane.b32.xlu0 %v5727_v26, %s7175_s26  ;;  %5729 = vrot.lane.b32.xlu1 %v5727_v26, %s7174_s4  ;;  %s7180_s26 = smov 20  }
0x4a5d   :  { %5750 = vrot.lane.b32.xlu0 %v7711_v8, %s7164_s13  ;;  %5733 = vrot.lane.b32.xlu1 %v5727_v26, %s7173_s25  ;;  %s7181_s13 = smov 28  }
0x4a61   :  { %5756 = vrot.lane.b32.xlu0 %v8123_v53, %s7176_s2  ;;  %5747 = vrot.lane.b32.xlu1 %v7509_v28, %s7177_s17 }
0x4a65   :  { %5762 = vrot.lane.b32.xlu0 %v8535_v22, %s7178_s18  ;;  %5753 = vrot.lane.b32.xlu1 %v7921_v30, %s7179_s19 }
0x4a69   :  { %5759 = vrot.lane.b32.xlu1 %v8333_v12, %s7180_s26 }
0x4acb   :  { %v5730_v8 = vpop.permute.xlu1 %5729  ;;  %v5738_v53 = vpop.permute.xlu0 %5737 }
0x4acc   :  { %v5732_v40 = vadd.f32 %v5730_v8, %v5727_v26 }
0x4acf   :  { %v5734_v18 = vpop.permute.xlu1 %5733  ;;  %v5751_v12 = vpop.permute.xlu0 %5750 }
0x4ad0   :  { %v5736_v38 = vadd.f32 %v5734_v18, %v5732_v40 }
0x4ad2   :  { %v5740_v28 = vadd.f32 %v5738_v53, %v5736_v38 }
0x4ad3   :  { %v5748_v30 = vpop.permute.xlu1 %5747  ;;  %v5757_v37 = vpop.permute.xlu0 %5756 }
0x4ad4   :  { %v5744_v21 = vadd.f32 %v5743_v20, %v5740_v28  ;;  %v5770_v5 = vsel %vm5769_vm2, %v7075_v41, %v5748_v30 }
0x4ad5   :  { %v5772_v0 = vsel %vm5771_vm3, %v5770_v5, %v5751_v12 }
0x4ad6   :  { %v5745_v7 = vmul.f32 0.125, %v5744_v21 }
0x4ad7   :  { %v5754_v19 = vpop.permute.xlu1 %5753  ;;  %v5763_v27 = vpop.permute.xlu0 %5762 }
0x4ad8   :  { %v5746_v63 = vadd.f32 %v5745_v7, %v8535_v22  ;;  %v5774_v35 = vsel %vm5773_vm4, %v5772_v0, %v5754_v19 }
0x4ad9   :  { %v5776_v22 = vsel %vm5775_vm5, %v5774_v35, %v5757_v37 }
0x4ada   :  { %5766 = vrot.lane.b32.xlu1 %v5746_v63, %s7181_s13 }
0x4adb   :  { %v5760_v23 = vpop.permute.xlu1 %5759 }
0x4adc   :  { %v5778_v42 = vsel %vm5777_vm6, %v5776_v22, %v5760_v23 }
0x4add   :  { %v5780_v3 = vsel %vm5779_vm7, %v5778_v42, %v5763_v27 }
0x4b4c   :  { %v5767_v15 = vpop.permute.xlu1 %5766 }
0x4b4d   :  { %v5782_v47 = vsel %vm5781_vm8, %v5780_v3, %v5767_v15 }
0x4b4e   :  { %5783 = vst.msk [vmem:[#allocation8] sm:$0xff] %vm142_vm1, %v5782_v47 }
0x4b4f   :  { %7147 = shalt.err (!%p7144_p5)
}
0x4b50   :  { %5793 = dma.vmem_to_hbm [thread:$0]  %s5791_s5, 128, %s8744_s9, [#allocation4]  }
0x4b51   :  { %7160 = dma.done.wait [#allocation4], 128  }
0x4b52   :  { %7161 = vsyncadd [#allocation4], 4294967168 }
0x4b53   :  { %5797 = vsyncpa [#allocation3], 1 }
0x4b54   :  { %5798 = vsyncpa [#allocation6], 1 }
0x4b55   :  { %5799 = vsyncpa [#allocation4], 1 }

</bundles_post_ra>
